<compile_context>
chip_gen: v5e
topology: v5e:2x2
jax: 0.10.0
libtpu: 0.0.40
codegen_flags: <defaults>
</compile_context>

<pallas_src>
import functools

import numpy as np

import jax
import jax.numpy as jnp
from jax import lax
from jax.experimental import pallas as pl
from jax.experimental.pallas import tpu as pltpu

LRELU_SLOPE = 0.1

CPAD = 8      # fp32 sublane granule: pad all channel counts to a multiple of 8
HALO = 128    # halo block width in lanes (>= max fused halo, here 27)


def get_padding(k, d):
    return int((k * d - d) / 2)


def _round_up(v, m):
    return (v + m - 1) // m * m


# ----------------------------------------------------------------------------
# Generator configuration (small, deterministic)
# ----------------------------------------------------------------------------
IN_CH = 4
OUT_CH = 1
UP_INIT_CH = 16
UP_FACTORS = [2, 2]
UP_KERNELS = [4, 4]
RES_KERNELS = [3, 5]
RES_DILATIONS = [[1, 3, 5], [1, 3, 5]]   # ResBlock1 ('1')
NUM_KERNELS = len(RES_KERNELS)


def _conv_params(key, cout, cin, k):
    kw, kb = jax.random.split(key)
    w = jax.random.normal(kw, (cout, cin, k), jnp.float32) * 0.1
    b = jax.random.normal(kb, (cout,), jnp.float32) * 0.1
    return w, b


def init_params(seed=0):
    base = jax.random.PRNGKey(seed)
    ctr = [0]

    def nk():
        k = jax.random.fold_in(base, ctr[0])
        ctr[0] += 1
        return k

    params = {}
    params["conv_pre_w"], params["conv_pre_b"] = _conv_params(
        nk(), UP_INIT_CH, IN_CH, 7)

    params["ups"] = []
    for i, (u, k) in enumerate(zip(UP_FACTORS, UP_KERNELS)):
        cin = UP_INIT_CH // (2 ** i)
        cout = UP_INIT_CH // (2 ** (i + 1))
        kw, kb = jax.random.split(nk())
        # ConvTranspose1d weight layout: (Cin, Cout, K)
        w = jax.random.normal(kw, (cin, cout, k), jnp.float32) * 0.1
        b = jax.random.normal(kb, (cout,), jnp.float32) * 0.1
        params["ups"].append({"w": w, "b": b})

    params["resblocks"] = []
    ch = UP_INIT_CH
    for i in range(len(UP_FACTORS)):
        ch = UP_INIT_CH // (2 ** (i + 1))
        for k, dils in zip(RES_KERNELS, RES_DILATIONS):
            rb = {"convs1": [], "convs2": []}
            for _d in dils:
                rb["convs1"].append(_conv_params(nk(), ch, ch, k))
            for _d in dils:
                rb["convs2"].append(_conv_params(nk(), ch, ch, k))
            params["resblocks"].append(rb)

    params["conv_post_w"], params["conv_post_b"] = _conv_params(
        nk(), OUT_CH, ch, 7)
    return params


# ----------------------------------------------------------------------------
# Weight packing (done once, outside jit)
# ----------------------------------------------------------------------------
def pack_conv(w, b):
    """(Cout, Cin, K) Conv1d weight -> (Cout_pad, K*Cin_pad) matmul weight
    (tap-major columns) and (Cout_pad, 1) bias, zero-padded channels."""
    cout, cin, K = w.shape
    cop, cip = _round_up(cout, CPAD), _round_up(cin, CPAD)
    wp = jnp.zeros((cop, cip, K), jnp.float32).at[:cout, :cin, :].set(w)
    wmat = jnp.transpose(wp, (0, 2, 1)).reshape(cop, K * cip)
    bp = jnp.zeros((cop, 1), jnp.float32).at[:cout, 0].set(b)
    return wmat, bp


def _poly_offsets(k, s):
    """Input offsets used by the polyphase decomposition of ConvTranspose1d
    (stride s, kernel k, padding (k-s)//2)."""
    p_t = (k - s) // 2
    offs = []
    for r in range(s):
        rho = (r + p_t) % s
        delta = (r + p_t - rho) // s
        m_taps = (k - 1 - rho) // s + 1
        offs += [delta - m for m in range(m_taps)]
    return min(offs), max(offs) - min(offs) + 1


def pack_convtranspose(w_t, b, s):
    """(Cin, Cout, K) ConvTranspose1d weight -> polyphase matmul weight
    (s*Cout_pad, n_off*Cin_pad) and bias (s*Cout_pad, 1)."""
    w_t = np.asarray(w_t, np.float32)
    b = np.asarray(b, np.float32)
    cin, cout, k = w_t.shape
    cip, cop = _round_up(cin, CPAD), _round_up(cout, CPAD)
    p_t = (k - s) // 2
    off_min, n_off = _poly_offsets(k, s)
    wc = np.zeros((s * cop, n_off * cip), np.float32)
    bc = np.zeros((s * cop, 1), np.float32)
    for r in range(s):
        rho = (r + p_t) % s
        delta = (r + p_t - rho) // s
        m_taps = (k - 1 - rho) // s + 1
        for m in range(m_taps):
            j = (delta - m) - off_min
            wc[r * cop:r * cop + cout,
               j * cip:j * cip + cin] = w_t[:, :, s * m + rho].T
        bc[r * cop:r * cop + cout, 0] = b
    return jnp.asarray(wc), jnp.asarray(bc)


def pack_params(params):
    packed = {
        "conv_pre": pack_conv(params["conv_pre_w"], params["conv_pre_b"]),
        "conv_post": pack_conv(params["conv_post_w"], params["conv_post_b"]),
        "ups": [],
        "stages": [],
    }
    for i, up in enumerate(params["ups"]):
        wc, bc = pack_convtranspose(up["w"], up["b"], UP_FACTORS[i])
        packed["ups"].append({"w": wc, "b": bc})
    for i in range(len(UP_FACTORS)):
        branches = []
        for j in range(NUM_KERNELS):
            rb = params["resblocks"][i * NUM_KERNELS + j]
            branches.append({
                "w1": jnp.stack([pack_conv(w, b)[0] for w, b in rb["convs1"]]),
                "b1": jnp.stack([pack_conv(w, b)[1] for w, b in rb["convs1"]]),
                "w2": jnp.stack([pack_conv(w, b)[0] for w, b in rb["convs2"]]),
                "b2": jnp.stack([pack_conv(w, b)[1] for w, b in rb["convs2"]]),
            })
        packed["stages"].append(branches)
    return packed


# ----------------------------------------------------------------------------
# In-kernel helpers
# ----------------------------------------------------------------------------
def _lrelu(x, slope):
    return jnp.where(x >= 0, x, slope * x)


def _mask_valid(val, ti, t_tile, start_off, t_valid):
    """Zero out columns whose global time position is outside [0, t_valid)."""
    pos = ti * t_tile + start_off + lax.broadcasted_iota(jnp.int32, val.shape, 1)
    ok = jnp.logical_and(pos >= 0, pos < t_valid)
    return jnp.where(ok, val, 0.0)


def _conv_valid(x, wmat, bias, K, d):
    """Valid dilated conv: all K taps folded into a single MXU matmul.
    x: (Cin_pad, W) -> (Cout_pad, W - (K-1)*d)."""
    w_out = x.shape[1] - (K - 1) * d
    stacked = jnp.concatenate(
        [x[:, j * d: j * d + w_out] for j in range(K)], axis=0)
    y = jnp.dot(wmat, stacked, preferred_element_type=jnp.float32)
    return y + bias


def _window(xc_ref, xl_ref, xr_ref):
    """Assemble (Cpad, t_tile + 2*HALO) window; column j corresponds to
    global time position ti*t_tile - HALO + j.  Halo blocks of edge tiles are
    zeroed so out-of-range reads behave like zero padding."""
    ti = pl.program_id(1)
    nt = pl.num_programs(1)
    lh = jnp.where(ti > 0, xl_ref[0], 0.0)
    rh = jnp.where(ti < nt - 1, xr_ref[0], 0.0)
    return jnp.concatenate([lh, xc_ref[0], rh], axis=-1)


# ----------------------------------------------------------------------------
# Kernels
# ----------------------------------------------------------------------------
def _make_upsample_kernel(stride, off_min, n_off, t_tile, t_valid_in,
                          pre_conv_K):
    """leaky_relu + polyphase ConvTranspose1d; optionally the conv_pre (K=7)
    is fused in front (its output never leaves VMEM)."""
    halo_up = max(-off_min, off_min + n_off - 1)

    def kernel(*refs):
        xc_ref, xl_ref, xr_ref = refs[:3]
        o_ref = refs[-1]
        ti = pl.program_id(1)
        xw = _window(xc_ref, xl_ref, xr_ref)

        if pre_conv_K is None:
            w_ref, b_ref = refs[3], refs[4]
            # input already masked to zero beyond t_valid by previous layer
            act = _lrelu(xw[:, HALO - halo_up: HALO + t_tile + halo_up],
                         LRELU_SLOPE)
        else:
            pw_ref, pb_ref, w_ref, b_ref = refs[3], refs[4], refs[5], refs[6]
            p_pre = (pre_conv_K - 1) // 2
            h = halo_up + p_pre
            pre = _conv_valid(xw[:, HALO - h: HALO + t_tile + h],
                              pw_ref[...], pb_ref[...], pre_conv_K, 1)
            pre = _mask_valid(pre, ti, t_tile, -halo_up, t_valid_in)
            act = _lrelu(pre, LRELU_SLOPE)

        # act: width t_tile + 2*halo_up, col j <-> global pos ti*t_tile-halo_up+j
        lo = halo_up + off_min
        xs = act[:, lo: lo + t_tile + n_off - 1]
        stacked = jnp.concatenate(
            [xs[:, j: j + t_tile] for j in range(n_off)], axis=0)
        ph = jnp.dot(w_ref[...], stacked, preferred_element_type=jnp.float32)
        ph = ph + b_ref[...]
        cop = o_ref.shape[2]
        for r in range(stride):
            o_ref[0, r] = _mask_valid(ph[r * cop:(r + 1) * cop, :],
                                      ti, t_tile, 0, t_valid_in)

    return kernel


def _make_stage_kernel(kernels, dilations, t_tile, t_valid, post_K=None,
                       post_slope=0.01, post_tanh=True):
    """Fused kernel: sum of ResBlock1 branches over the same input divided by
    the number of branches; optionally followed by the final
    leaky_relu(post_slope) + conv_post + tanh (last stage).  All intermediates
    stay in VMEM / vregs."""
    n_branches = len(kernels)
    post_h = 0 if post_K is None else (post_K - 1) // 2

    def kernel(*refs):
        xc_ref, xl_ref, xr_ref = refs[:3]
        wrefs = refs[3:3 + 4 * n_branches]
        if post_K is not None:
            pw_ref = refs[3 + 4 * n_branches]
            pb_ref = refs[4 + 4 * n_branches]
        o_ref = refs[-1]

        ti = pl.program_id(1)
        xw = _window(xc_ref, xl_ref, xr_ref)
        cpad = xc_ref.shape[1]
        acc = jnp.zeros((cpad, t_tile + 2 * post_h), jnp.float32)

        for bi in range(n_branches):
            K = kernels[bi]
            dils = dilations[bi]
            w1, b1, w2, b2 = wrefs[4 * bi: 4 * bi + 4]
            p2 = (K - 1) // 2
            Hb = sum(((K - 1) * d) // 2 + p2 for d in dils) + post_h
            xb = xw[:, HALO - Hb: HALO + t_tile + Hb]
            off = -Hb
            for li, d in enumerate(dils):
                p1 = ((K - 1) * d) // 2
                t1 = _conv_valid(_lrelu(xb, LRELU_SLOPE), w1[li], b1[li], K, d)
                t1 = _mask_valid(t1, ti, t_tile, off + p1, t_valid)
                t2 = _conv_valid(_lrelu(t1, LRELU_SLOPE), w2[li], b2[li], K, 1)
                t2 = _mask_valid(t2, ti, t_tile, off + p1 + p2, t_valid)
                xb = t2 + xb[:, p1 + p2: p1 + p2 + t2.shape[1]]
                off += p1 + p2
            acc = acc + xb

        z = acc * (1.0 / n_branches)
        if post_K is None:
            o_ref[0] = _mask_valid(z, ti, t_tile, 0, t_valid)
        else:
            z = _mask_valid(z, ti, t_tile, -post_h, t_valid)
            y = _conv_valid(_lrelu(z, post_slope), pw_ref[...], pb_ref[...],
                            post_K, 1)
            if post_tanh:
                y = jnp.tanh(y)
            o_ref[0] = _mask_valid(y, ti, t_tile, 0, t_valid)

    return kernel


# ----------------------------------------------------------------------------
# pallas_call wrappers
# ----------------------------------------------------------------------------
def _halo_in_specs(cpad, t_tile, total_nb):
    nb = t_tile // HALO
    cur = pl.BlockSpec((1, cpad, t_tile), lambda b, ti: (b, 0, ti))
    lh = pl.BlockSpec((1, cpad, HALO),
                      lambda b, ti: (b, 0, jnp.maximum(ti * nb - 1, 0)))
    rh = pl.BlockSpec((1, cpad, HALO),
                      lambda b, ti: (b, 0, jnp.minimum((ti + 1) * nb,
                                                       total_nb - 1)))
    return [cur, lh, rh]


def _full_spec(shape):
    n = len(shape)
    return pl.BlockSpec(shape, lambda *_: (0,) * n)


def _pcall(kernel, x, weights, out_shape, out_spec, t_tile):
    B, cpad, Tp = x.shape
    return pl.pallas_call(
        kernel,
        out_shape=out_shape,
        grid=(B, Tp // t_tile),
        in_specs=_halo_in_specs(cpad, t_tile, Tp // HALO)
        + [_full_spec(w.shape) for w in weights],
        out_specs=out_spec,
        compiler_params=pltpu.CompilerParams(
            dimension_semantics=("parallel", "parallel")),
    )(x, x, x, *weights)


def upsample_layer(x, t_valid, wc, bc, *, stride, kernel_size, t_tile,
                   pre=None):
    B, cpad, Tp = x.shape
    cout_pad = wc.shape[0] // stride
    off_min, n_off = _poly_offsets(kernel_size, stride)
    if pre is None:
        assert wc.shape[1] == n_off * cpad
        weights = (wc, bc)
        pre_K = None
    else:
        pre_w, pre_b, pre_K = pre
        assert pre_w.shape[1] == pre_K * cpad
        assert wc.shape[1] == n_off * pre_w.shape[0]
        weights = (pre_w, pre_b, wc, bc)
    kern = _make_upsample_kernel(stride, off_min, n_off, t_tile, t_valid,
                                 pre_conv_K=pre_K)
    ph = _pcall(kern, x, weights,
                jax.ShapeDtypeStruct((B, stride, cout_pad, Tp), jnp.float32),
                pl.BlockSpec((1, stride, cout_pad, t_tile),
                             lambda b, ti: (b, 0, 0, ti)),
                t_tile)
    # Interleave polyphase outputs: out[b, c, s*q + r] = ph[b, r, c, q].
    out = jnp.transpose(ph, (0, 2, 3, 1)).reshape(B, cout_pad, Tp * stride)
    return out, t_valid * stride


def resblock_stage(x, t_valid, branches, *, kernels, dilations, t_tile,
                   post=None):
    B, cpad, Tp = x.shape
    weights = []
    for br in branches:
        weights += [br["w1"], br["b1"], br["w2"], br["b2"]]
    if post is None:
        cout_pad = cpad
        post_K = None
    else:
        pw, pb, post_K = post
        weights += [pw, pb]
        cout_pad = pw.shape[0]
    kern = _make_stage_kernel(tuple(kernels),
                              tuple(tuple(d) for d in dilations),
                              t_tile, t_valid, post_K=post_K)
    out = _pcall(kern, x, tuple(weights),
                 jax.ShapeDtypeStruct((B, cout_pad, Tp), jnp.float32),
                 pl.BlockSpec((1, cout_pad, t_tile), lambda b, ti: (b, 0, ti)),
                 t_tile)
    return out, t_valid


# ----------------------------------------------------------------------------
# Pallas-backed forward
# ----------------------------------------------------------------------------
def hifigan_forward(packed, x, *, t_tile=512):
    """x: [B, IN_CH, T] -> [B, OUT_CH, T * prod(UP_FACTORS)].

    t_tile (multiple of 128) bounds VMEM per grid step; for long audio raise
    it (inputs/outputs stay double-buffered tiles, never the full sequence)."""
    B, cin, T = x.shape
    # Shrink the tile for short inputs so padded columns don't dominate.
    t_tile = max(HALO, min(t_tile, _round_up(T, HALO)))
    assert t_tile % HALO == 0
    cpad = _round_up(cin, CPAD)
    Tp = _round_up(T, t_tile)
    xb = jnp.zeros((B, cpad, Tp), jnp.float32).at[:, :cin, :T].set(x)

    o, tv = xb, T
    n_up = len(UP_FACTORS)
    pre_w, pre_b = packed["conv_pre"]
    post_w, post_b = packed["conv_post"]
    for i, (u, k) in enumerate(zip(UP_FACTORS, UP_KERNELS)):
        # conv_pre is fused into the first upsample kernel; leaky_relu(0.1) is
        # fused into every polyphase transposed conv.
        pre = (pre_w, pre_b, 7) if i == 0 else None
        o, tv = upsample_layer(o, tv, packed["ups"][i]["w"],
                               packed["ups"][i]["b"],
                               stride=u, kernel_size=k, t_tile=t_tile, pre=pre)
        # Both ResBlock1's + residuals + /num_kernels average in one kernel;
        # for the last stage the final leaky_relu(0.01)+conv_post+tanh is
        # fused into the same kernel.
        post = (post_w, post_b, 7) if i == n_up - 1 else None
        o, tv = resblock_stage(o, tv, packed["stages"][i],
                               kernels=RES_KERNELS, dilations=RES_DILATIONS,
                               t_tile=t_tile, post=post)
    return o[:, :OUT_CH, :tv]


# ----------------------------------------------------------------------------
# Pure-JAX reference (lax.conv) for correctness check
# ----------------------------------------------------------------------------
def _ref_conv1d(x, w, b, dilation, padding, pre_slope=None, post_tanh=False):
    if pre_slope is not None:
        x = jnp.where(x >= 0, x, pre_slope * x)
    y = lax.conv_general_dilated(x, w, (1,), [(padding, padding)],
                                 rhs_dilation=(dilation,),
                                 dimension_numbers=("NCH", "OIH", "NCH"))
    y = y + b[None, :, None]
    return jnp.tanh(y) if post_tanh else y


def _ref_conv_transpose1d(x, w_t, b, stride, kernel_size, pre_slope):
    x = jnp.where(x >= 0, x, pre_slope * x)
    pad_t = (kernel_size - stride) // 2
    w_conv = jnp.flip(jnp.transpose(w_t, (1, 0, 2)), axis=2)
    p = kernel_size - 1 - pad_t
    y = lax.conv_general_dilated(x, w_conv, (1,), [(p, p)],
                                 lhs_dilation=(stride,),
                                 dimension_numbers=("NCH", "OIH", "NCH"))
    return y + b[None, :, None]


def hifigan_forward_ref(params, x):
    o = _ref_conv1d(x, params["conv_pre_w"], params["conv_pre_b"], 1, 3)
    for i in range(len(UP_FACTORS)):
        o = _ref_conv_transpose1d(o, params["ups"][i]["w"],
                                  params["ups"][i]["b"],
                                  UP_FACTORS[i], UP_KERNELS[i], LRELU_SLOPE)
        z_sum = None
        for j in range(NUM_KERNELS):
            rb = params["resblocks"][i * NUM_KERNELS + j]
            z = o
            for (w1, b1), (w2, b2), d in zip(rb["convs1"], rb["convs2"],
                                             RES_DILATIONS[j]):
                zt = _ref_conv1d(z, w1, b1, d,
                                 get_padding(RES_KERNELS[j], d), LRELU_SLOPE)
                zt = _ref_conv1d(zt, w2, b2, 1,
                                 get_padding(RES_KERNELS[j], 1), LRELU_SLOPE)
                z = zt + z
            z_sum = z if z_sum is None else z_sum + z
        o = z_sum / NUM_KERNELS
    o = _ref_conv1d(o, params["conv_post_w"], params["conv_post_b"], 1, 3,
                    pre_slope=0.01, post_tanh=True)
    return o


# ----------------------------------------------------------------------------
if __name__ == "__main__":
    params = init_params(seed=0)
    packed = pack_params(params)

    up_total = 1
    for u in UP_FACTORS:
        up_total *= u

    # 1) Small shapes consistent with the module: B=2, C=4, T=16.
    key = jax.random.PRNGKey(0)
    B, T = 2, 16
    x = jax.random.normal(key, (B, IN_CH, T), jnp.float32)

    fwd = jax.jit(hifigan_forward)
    out = jax.block_until_ready(fwd(packed, x))
    assert out.shape == (B, OUT_CH, T * up_total), out.shape

    ref = jax.block_until_ready(hifigan_forward_ref(params, x))
    err = float(jnp.max(jnp.abs(out - ref)))
    assert err < 3e-2, err

    # 2) Longer input with a small tile so several time tiles (and the halo
    #    exchange between them, incl. the fused conv_pre / conv_post halos)
    #    are exercised with real data at every layer.
    x2 = jax.random.normal(jax.random.PRNGKey(1), (1, IN_CH, 300), jnp.float32)
    fwd2 = jax.jit(functools.partial(hifigan_forward, t_tile=128))
    out2 = jax.block_until_ready(fwd2(packed, x2))
    assert out2.shape == (1, OUT_CH, 300 * up_total), out2.shape

    ref2 = jax.block_until_ready(hifigan_forward_ref(params, x2))
    err2 = float(jnp.max(jnp.abs(out2 - ref2)))
    assert err2 < 3e-2, err2

    print("KERNEL_OK")
</pallas_src>

<mosaic_0001>
module attributes {stable_mosaic.version = 11 : i64} {
  func.func @kernel(%arg0: i32, %arg1: i32, %arg2: memref<1x8x128xf32, #tpu.memory_space<vmem>>, %arg3: memref<1x8x128xf32, #tpu.memory_space<vmem>>, %arg4: memref<1x8x128xf32, #tpu.memory_space<vmem>>, %arg5: memref<16x56xf32, #tpu.memory_space<vmem>>, %arg6: memref<16x1xf32, #tpu.memory_space<vmem>>, %arg7: memref<16x48xf32, #tpu.memory_space<vmem>>, %arg8: memref<16x1xf32, #tpu.memory_space<vmem>>, %arg9: memref<1x2x8x128xf32, #tpu.memory_space<vmem>>) attributes {dimension_semantics = [#tpu.dimension_semantics<parallel>, #tpu.dimension_semantics<parallel>], iteration_bounds = array<i64: 2, 1>, scalar_prefetch = 0 : i64, scratch_operands = 0 : i64, tpu.core_type = #tpu.core_type<tc>, window_params = [{transform_indices = @transform_0, window_bounds = array<i64: 1, 8, 128>}, {transform_indices = @transform_1, window_bounds = array<i64: 1, 8, 128>}, {transform_indices = @transform_2, window_bounds = array<i64: 1, 8, 128>}, {pipeline_mode = #tpu.pipeline_mode<synchronous>, transform_indices = @transform_3, window_bounds = array<i64: 16, 56>}, {pipeline_mode = #tpu.pipeline_mode<synchronous>, transform_indices = @transform_4, window_bounds = array<i64: 16, 1>}, {pipeline_mode = #tpu.pipeline_mode<synchronous>, transform_indices = @transform_5, window_bounds = array<i64: 16, 48>}, {pipeline_mode = #tpu.pipeline_mode<synchronous>, transform_indices = @transform_6, window_bounds = array<i64: 16, 1>}, {transform_indices = @transform_7, window_bounds = array<i64: 1, 2, 8, 128>}]} {
    %c0_i32 = arith.constant 0 : i32
    %0 = arith.cmpi sgt, %arg1, %c0_i32 : i32
    %c0 = arith.constant 0 : index
    %c0_0 = arith.constant 0 : index
    %c0_1 = arith.constant 0 : index
    %1 = vector.load %arg3[%c0, %c0_0, %c0_1] : memref<1x8x128xf32, #tpu.memory_space<vmem>>, vector<1x8x128xf32>
    %2 = vector.shape_cast %1 : vector<1x8x128xf32> to vector<8x128xf32>
    %cst = arith.constant 0.000000e+00 : f32
    %3 = vector.broadcast %cst : f32 to vector<8x128xf32>
    %4 = arith.select %0, %2, %3 : vector<8x128xf32>
    %c0_i32_2 = arith.constant 0 : i32
    %5 = arith.cmpi slt, %arg1, %c0_i32_2 : i32
    %c0_3 = arith.constant 0 : index
    %c0_4 = arith.constant 0 : index
    %c0_5 = arith.constant 0 : index
    %6 = vector.load %arg4[%c0_3, %c0_4, %c0_5] : memref<1x8x128xf32, #tpu.memory_space<vmem>>, vector<1x8x128xf32>
    %7 = vector.shape_cast %6 : vector<1x8x128xf32> to vector<8x128xf32>
    %cst_6 = arith.constant 0.000000e+00 : f32
    %8 = vector.broadcast %cst_6 : f32 to vector<8x128xf32>
    %9 = arith.select %5, %7, %8 : vector<8x128xf32>
    %c0_7 = arith.constant 0 : index
    %c0_8 = arith.constant 0 : index
    %c0_9 = arith.constant 0 : index
    %10 = vector.load %arg2[%c0_7, %c0_8, %c0_9] : memref<1x8x128xf32, #tpu.memory_space<vmem>>, vector<1x8x128xf32>
    %11 = vector.shape_cast %10 : vector<1x8x128xf32> to vector<8x128xf32>
    %12 = tpu.concatenate %4, %11, %9 in 1 : vector<8x128xf32>, vector<8x128xf32>, vector<8x128xf32> -> vector<8x384xf32>
    %13 = vector.extract_strided_slice %12 {offsets = [0, 124], sizes = [8, 136], strides = [1, 1]} : vector<8x384xf32> to vector<8x136xf32>
    %c0_10 = arith.constant 0 : index
    %c0_11 = arith.constant 0 : index
    %14 = vector.load %arg5[%c0_10, %c0_11] : memref<16x56xf32, #tpu.memory_space<vmem>>, vector<16x56xf32>
    %c0_12 = arith.constant 0 : index
    %c0_13 = arith.constant 0 : index
    %15 = vector.load %arg6[%c0_12, %c0_13] : memref<16x1xf32, #tpu.memory_space<vmem>>, vector<16x1xf32>
    %16 = vector.extract_strided_slice %13 {offsets = [0, 0], sizes = [8, 130], strides = [1, 1]} : vector<8x136xf32> to vector<8x130xf32>
    %17 = vector.extract_strided_slice %13 {offsets = [0, 1], sizes = [8, 130], strides = [1, 1]} : vector<8x136xf32> to vector<8x130xf32>
    %18 = vector.extract_strided_slice %13 {offsets = [0, 2], sizes = [8, 130], strides = [1, 1]} : vector<8x136xf32> to vector<8x130xf32>
    %19 = vector.extract_strided_slice %13 {offsets = [0, 3], sizes = [8, 130], strides = [1, 1]} : vector<8x136xf32> to vector<8x130xf32>
    %20 = vector.extract_strided_slice %13 {offsets = [0, 4], sizes = [8, 130], strides = [1, 1]} : vector<8x136xf32> to vector<8x130xf32>
    %21 = vector.extract_strided_slice %13 {offsets = [0, 5], sizes = [8, 130], strides = [1, 1]} : vector<8x136xf32> to vector<8x130xf32>
    %22 = vector.extract_strided_slice %13 {offsets = [0, 6], sizes = [8, 130], strides = [1, 1]} : vector<8x136xf32> to vector<8x130xf32>
    %23 = tpu.concatenate %16, %17, %18, %19, %20, %21, %22 in 0 : vector<8x130xf32>, vector<8x130xf32>, vector<8x130xf32>, vector<8x130xf32>, vector<8x130xf32>, vector<8x130xf32>, vector<8x130xf32> -> vector<56x130xf32>
    %cst_14 = arith.constant dense<0.000000e+00> : vector<16x130xf32>
    %24 = tpu.matmul %14, %23, %cst_14 {dimension_numbers = #tpu.dot_dimension_numbers<[1], [0], [0], [1], [0, 0, 1, 1], [], []>} : vector<16x56xf32>, vector<56x130xf32>, vector<16x130xf32> -> vector<16x130xf32>
    %25 = vector.broadcast %15 : vector<16x1xf32> to vector<16x130xf32>
    %26 = arith.addf %24, %25 : vector<16x130xf32>
    %c128_i32 = arith.constant 128 : i32
    %27 = arith.muli %arg1, %c128_i32 : i32
    %c-1_i32 = arith.constant -1 : i32
    %28 = arith.addi %27, %c-1_i32 : i32
    %29 = tpu.iota {dimensions = array<i32: 1>} : vector<16x130xi32>
    %30 = vector.broadcast %28 : i32 to vector<16x130xi32>
    %31 = arith.addi %30, %29 : vector<16x130xi32>
    %c0_i32_15 = arith.constant 0 : i32
    %32 = vector.broadcast %c0_i32_15 : i32 to vector<16x130xi32>
    %33 = arith.cmpi sge, %31, %32 : vector<16x130xi32>
    %c16_i32 = arith.constant 16 : i32
    %34 = vector.broadcast %c16_i32 : i32 to vector<16x130xi32>
    %35 = arith.cmpi slt, %31, %34 : vector<16x130xi32>
    %36 = arith.andi %33, %35 : vector<16x130xi1>
    %cst_16 = arith.constant 0.000000e+00 : f32
    %37 = vector.broadcast %cst_16 : f32 to vector<16x130xf32>
    %38 = arith.select %36, %26, %37 : vector<16x130xi1>, vector<16x130xf32>
    %cst_17 = arith.constant 0.000000e+00 : f32
    %39 = vector.broadcast %cst_17 : f32 to vector<16x130xf32>
    %40 = arith.cmpf oge, %38, %39 : vector<16x130xf32>
    %cst_18 = arith.constant 1.000000e-01 : f32
    %41 = vector.broadcast %cst_18 : f32 to vector<16x130xf32>
    %42 = arith.mulf %41, %38 : vector<16x130xf32>
    %43 = arith.select %40, %38, %42 : vector<16x130xi1>, vector<16x130xf32>
    %44 = vector.extract_strided_slice %43 {offsets = [0, 0], sizes = [16, 128], strides = [1, 1]} : vector<16x130xf32> to vector<16x128xf32>
    %45 = vector.extract_strided_slice %43 {offsets = [0, 1], sizes = [16, 128], strides = [1, 1]} : vector<16x130xf32> to vector<16x128xf32>
    %46 = vector.extract_strided_slice %43 {offsets = [0, 2], sizes = [16, 128], strides = [1, 1]} : vector<16x130xf32> to vector<16x128xf32>
    %47 = tpu.concatenate %44, %45, %46 in 0 : vector<16x128xf32>, vector<16x128xf32>, vector<16x128xf32> -> vector<48x128xf32>
    %c0_19 = arith.constant 0 : index
    %c0_20 = arith.constant 0 : index
    %48 = vector.load %arg7[%c0_19, %c0_20] : memref<16x48xf32, #tpu.memory_space<vmem>>, vector<16x48xf32>
    %cst_21 = arith.constant dense<0.000000e+00> : vector<16x128xf32>
    %49 = tpu.matmul %48, %47, %cst_21 {dimension_numbers = #tpu.dot_dimension_numbers<[1], [0], [0], [1], [0, 0, 1, 1], [], []>} : vector<16x48xf32>, vector<48x128xf32>, vector<16x128xf32> -> vector<16x128xf32>
    %c0_22 = arith.constant 0 : index
    %c0_23 = arith.constant 0 : index
    %50 = vector.load %arg8[%c0_22, %c0_23] : memref<16x1xf32, #tpu.memory_space<vmem>>, vector<16x1xf32>
    %51 = vector.broadcast %50 : vector<16x1xf32> to vector<16x128xf32>
    %52 = arith.addf %49, %51 : vector<16x128xf32>
    %53 = vector.extract_strided_slice %52 {offsets = [0, 0], sizes = [8, 128], strides = [1, 1]} : vector<16x128xf32> to vector<8x128xf32>
    %c128_i32_24 = arith.constant 128 : i32
    %54 = arith.muli %arg1, %c128_i32_24 : i32
    %c0_i32_25 = arith.constant 0 : i32
    %55 = arith.addi %54, %c0_i32_25 : i32
    %56 = tpu.iota {dimensions = array<i32: 1>} : vector<8x128xi32>
    %57 = vector.broadcast %55 : i32 to vector<8x128xi32>
    %58 = arith.addi %57, %56 : vector<8x128xi32>
    %c0_i32_26 = arith.constant 0 : i32
    %59 = vector.broadcast %c0_i32_26 : i32 to vector<8x128xi32>
    %60 = arith.cmpi sge, %58, %59 : vector<8x128xi32>
    %c16_i32_27 = arith.constant 16 : i32
    %61 = vector.broadcast %c16_i32_27 : i32 to vector<8x128xi32>
    %62 = arith.cmpi slt, %58, %61 : vector<8x128xi32>
    %63 = arith.andi %60, %62 : vector<8x128xi1>
    %cst_28 = arith.constant 0.000000e+00 : f32
    %64 = vector.broadcast %cst_28 : f32 to vector<8x128xf32>
    %65 = arith.select %63, %53, %64 : vector<8x128xi1>, vector<8x128xf32>
    %c0_29 = arith.constant 0 : index
    %c0_30 = arith.constant 0 : index
    %c0_31 = arith.constant 0 : index
    %c0_32 = arith.constant 0 : index
    %66 = vector.load %arg9[%c0_29, %c0_30, %c0_31, %c0_32] : memref<1x2x8x128xf32, #tpu.memory_space<vmem>>, vector<1x1x8x128xf32>
    %67 = vector.shape_cast %66 : vector<1x1x8x128xf32> to vector<8x128xf32>
    %68 = vector.shape_cast %65 : vector<8x128xf32> to vector<1x1x8x128xf32>
    tpu.vector_store %arg9[%c0_29, %c0_30, %c0_31, %c0_32], %68 {strides = array<i32>} : memref<1x2x8x128xf32, #tpu.memory_space<vmem>>, vector<1x1x8x128xf32>,
    %69 = vector.extract_strided_slice %52 {offsets = [8, 0], sizes = [8, 128], strides = [1, 1]} : vector<16x128xf32> to vector<8x128xf32>
    %c128_i32_33 = arith.constant 128 : i32
    %70 = arith.muli %arg1, %c128_i32_33 : i32
    %c0_i32_34 = arith.constant 0 : i32
    %71 = arith.addi %70, %c0_i32_34 : i32
    %72 = tpu.iota {dimensions = array<i32: 1>} : vector<8x128xi32>
    %73 = vector.broadcast %71 : i32 to vector<8x128xi32>
    %74 = arith.addi %73, %72 : vector<8x128xi32>
    %c0_i32_35 = arith.constant 0 : i32
    %75 = vector.broadcast %c0_i32_35 : i32 to vector<8x128xi32>
    %76 = arith.cmpi sge, %74, %75 : vector<8x128xi32>
    %c16_i32_36 = arith.constant 16 : i32
    %77 = vector.broadcast %c16_i32_36 : i32 to vector<8x128xi32>
    %78 = arith.cmpi slt, %74, %77 : vector<8x128xi32>
    %79 = arith.andi %76, %78 : vector<8x128xi1>
    %cst_37 = arith.constant 0.000000e+00 : f32
    %80 = vector.broadcast %cst_37 : f32 to vector<8x128xf32>
    %81 = arith.select %79, %69, %80 : vector<8x128xi1>, vector<8x128xf32>
    %c0_38 = arith.constant 0 : index
    %c1 = arith.constant 1 : index
    %c0_39 = arith.constant 0 : index
    %c0_40 = arith.constant 0 : index
    %82 = vector.load %arg9[%c0_38, %c1, %c0_39, %c0_40] : memref<1x2x8x128xf32, #tpu.memory_space<vmem>>, vector<1x1x8x128xf32>
    %83 = vector.shape_cast %82 : vector<1x1x8x128xf32> to vector<8x128xf32>
    %84 = vector.shape_cast %81 : vector<8x128xf32> to vector<1x1x8x128xf32>
    tpu.vector_store %arg9[%c0_38, %c1, %c0_39, %c0_40], %84 {strides = array<i32>} : memref<1x2x8x128xf32, #tpu.memory_space<vmem>>, vector<1x1x8x128xf32>,
    return
  }
  func.func @transform_0(%arg0: i32, %arg1: i32) -> (i32, i32, i32) {
    %c0_i32 = arith.constant 0 : i32
    %c0_i32_0 = arith.constant 0 : i32
    return %arg0, %c0_i32, %arg1 : i32, i32, i32
  }
  func.func @transform_1(%arg0: i32, %arg1: i32) -> (i32, i32, i32) {
    %c1_i32 = arith.constant 1 : i32
    %0 = arith.muli %arg1, %c1_i32 : i32
    %c1_i32_0 = arith.constant 1 : i32
    %1 = arith.subi %0, %c1_i32_0 : i32
    %c0_i32 = arith.constant 0 : i32
    %2 = arith.maxsi %1, %c0_i32 : i32
    %c0_i32_1 = arith.constant 0 : i32
    %c0_i32_2 = arith.constant 0 : i32
    return %arg0, %c0_i32_1, %2 : i32, i32, i32
  }
  func.func @transform_2(%arg0: i32, %arg1: i32) -> (i32, i32, i32) {
    %c1_i32 = arith.constant 1 : i32
    %0 = arith.addi %arg1, %c1_i32 : i32
    %c1_i32_0 = arith.constant 1 : i32
    %1 = arith.muli %0, %c1_i32_0 : i32
    %c0_i32 = arith.constant 0 : i32
    %2 = arith.minsi %1, %c0_i32 : i32
    %c0_i32_1 = arith.constant 0 : i32
    %c0_i32_2 = arith.constant 0 : i32
    return %arg0, %c0_i32_1, %2 : i32, i32, i32
  }
  func.func @transform_3(%arg0: i32, %arg1: i32) -> (i32, i32) {
    %c0_i32 = arith.constant 0 : i32
    %c0_i32_0 = arith.constant 0 : i32
    %c0_i32_1 = arith.constant 0 : i32
    return %c0_i32, %c0_i32_0 : i32, i32
  }
  func.func @transform_4(%arg0: i32, %arg1: i32) -> (i32, i32) {
    %c0_i32 = arith.constant 0 : i32
    %c0_i32_0 = arith.constant 0 : i32
    %c0_i32_1 = arith.constant 0 : i32
    return %c0_i32, %c0_i32_0 : i32, i32
  }
  func.func @transform_5(%arg0: i32, %arg1: i32) -> (i32, i32) {
    %c0_i32 = arith.constant 0 : i32
    %c0_i32_0 = arith.constant 0 : i32
    %c0_i32_1 = arith.constant 0 : i32
    return %c0_i32, %c0_i32_0 : i32, i32
  }
  func.func @transform_6(%arg0: i32, %arg1: i32) -> (i32, i32) {
    %c0_i32 = arith.constant 0 : i32
    %c0_i32_0 = arith.constant 0 : i32
    %c0_i32_1 = arith.constant 0 : i32
    return %c0_i32, %c0_i32_0 : i32, i32
  }
  func.func @transform_7(%arg0: i32, %arg1: i32) -> (i32, i32, i32, i32) {
    %c0_i32 = arith.constant 0 : i32
    %c0_i32_0 = arith.constant 0 : i32
    %c0_i32_1 = arith.constant 0 : i32
    return %arg0, %c0_i32, %c0_i32_0, %arg1 : i32, i32, i32, i32
  }
}

module attributes {stable_mosaic.version = 11 : i64} {
  func.func @kernel(%arg0: i32, %arg1: i32, %arg2: memref<1x8x128xf32, #tpu.memory_space<vmem>>, %arg3: memref<1x8x128xf32, #tpu.memory_space<vmem>>, %arg4: memref<1x8x128xf32, #tpu.memory_space<vmem>>, %arg5: memref<16x24xf32, #tpu.memory_space<vmem>>, %arg6: memref<16x1xf32, #tpu.memory_space<vmem>>, %arg7: memref<1x2x8x128xf32, #tpu.memory_space<vmem>>) attributes {dimension_semantics = [#tpu.dimension_semantics<parallel>, #tpu.dimension_semantics<parallel>], iteration_bounds = array<i64: 2, 2>, scalar_prefetch = 0 : i64, scratch_operands = 0 : i64, tpu.core_type = #tpu.core_type<tc>, window_params = [{transform_indices = @transform_0, window_bounds = array<i64: 1, 8, 128>}, {transform_indices = @transform_1, window_bounds = array<i64: 1, 8, 128>}, {transform_indices = @transform_2, window_bounds = array<i64: 1, 8, 128>}, {pipeline_mode = #tpu.pipeline_mode<synchronous>, transform_indices = @transform_3, window_bounds = array<i64: 16, 24>}, {pipeline_mode = #tpu.pipeline_mode<synchronous>, transform_indices = @transform_4, window_bounds = array<i64: 16, 1>}, {transform_indices = @transform_5, window_bounds = array<i64: 1, 2, 8, 128>}]} {
    %c0_i32 = arith.constant 0 : i32
    %0 = arith.cmpi sgt, %arg1, %c0_i32 : i32
    %c0 = arith.constant 0 : index
    %c0_0 = arith.constant 0 : index
    %c0_1 = arith.constant 0 : index
    %1 = vector.load %arg3[%c0, %c0_0, %c0_1] : memref<1x8x128xf32, #tpu.memory_space<vmem>>, vector<1x8x128xf32>
    %2 = vector.shape_cast %1 : vector<1x8x128xf32> to vector<8x128xf32>
    %cst = arith.constant 0.000000e+00 : f32
    %3 = vector.broadcast %cst : f32 to vector<8x128xf32>
    %4 = arith.select %0, %2, %3 : vector<8x128xf32>
    %c1_i32 = arith.constant 1 : i32
    %5 = arith.cmpi slt, %arg1, %c1_i32 : i32
    %c0_2 = arith.constant 0 : index
    %c0_3 = arith.constant 0 : index
    %c0_4 = arith.constant 0 : index
    %6 = vector.load %arg4[%c0_2, %c0_3, %c0_4] : memref<1x8x128xf32, #tpu.memory_space<vmem>>, vector<1x8x128xf32>
    %7 = vector.shape_cast %6 : vector<1x8x128xf32> to vector<8x128xf32>
    %cst_5 = arith.constant 0.000000e+00 : f32
    %8 = vector.broadcast %cst_5 : f32 to vector<8x128xf32>
    %9 = arith.select %5, %7, %8 : vector<8x128xf32>
    %c0_6 = arith.constant 0 : index
    %c0_7 = arith.constant 0 : index
    %c0_8 = arith.constant 0 : index
    %10 = vector.load %arg2[%c0_6, %c0_7, %c0_8] : memref<1x8x128xf32, #tpu.memory_space<vmem>>, vector<1x8x128xf32>
    %11 = vector.shape_cast %10 : vector<1x8x128xf32> to vector<8x128xf32>
    %12 = tpu.concatenate %4, %11, %9 in 1 : vector<8x128xf32>, vector<8x128xf32>, vector<8x128xf32> -> vector<8x384xf32>
    %13 = vector.extract_strided_slice %12 {offsets = [0, 127], sizes = [8, 130], strides = [1, 1]} : vector<8x384xf32> to vector<8x130xf32>
    %cst_9 = arith.constant 0.000000e+00 : f32
    %14 = vector.broadcast %cst_9 : f32 to vector<8x130xf32>
    %15 = arith.cmpf oge, %13, %14 : vector<8x130xf32>
    %cst_10 = arith.constant 1.000000e-01 : f32
    %16 = vector.broadcast %cst_10 : f32 to vector<8x130xf32>
    %17 = arith.mulf %16, %13 : vector<8x130xf32>
    %18 = arith.select %15, %13, %17 : vector<8x130xi1>, vector<8x130xf32>
    %19 = vector.extract_strided_slice %18 {offsets = [0, 0], sizes = [8, 128], strides = [1, 1]} : vector<8x130xf32> to vector<8x128xf32>
    %20 = vector.extract_strided_slice %18 {offsets = [0, 1], sizes = [8, 128], strides = [1, 1]} : vector<8x130xf32> to vector<8x128xf32>
    %21 = vector.extract_strided_slice %18 {offsets = [0, 2], sizes = [8, 128], strides = [1, 1]} : vector<8x130xf32> to vector<8x128xf32>
    %22 = tpu.concatenate %19, %20, %21 in 0 : vector<8x128xf32>, vector<8x128xf32>, vector<8x128xf32> -> vector<24x128xf32>
    %c0_11 = arith.constant 0 : index
    %c0_12 = arith.constant 0 : index
    %23 = vector.load %arg5[%c0_11, %c0_12] : memref<16x24xf32, #tpu.memory_space<vmem>>, vector<16x24xf32>
    %cst_13 = arith.constant dense<0.000000e+00> : vector<16x128xf32>
    %24 = tpu.matmul %23, %22, %cst_13 {dimension_numbers = #tpu.dot_dimension_numbers<[1], [0], [0], [1], [0, 0, 1, 1], [], []>} : vector<16x24xf32>, vector<24x128xf32>, vector<16x128xf32> -> vector<16x128xf32>
    %c0_14 = arith.constant 0 : index
    %c0_15 = arith.constant 0 : index
    %25 = vector.load %arg6[%c0_14, %c0_15] : memref<16x1xf32, #tpu.memory_space<vmem>>, vector<16x1xf32>
    %26 = vector.broadcast %25 : vector<16x1xf32> to vector<16x128xf32>
    %27 = arith.addf %24, %26 : vector<16x128xf32>
    %28 = vector.extract_strided_slice %27 {offsets = [0, 0], sizes = [8, 128], strides = [1, 1]} : vector<16x128xf32> to vector<8x128xf32>
    %c128_i32 = arith.constant 128 : i32
    %29 = arith.muli %arg1, %c128_i32 : i32
    %c0_i32_16 = arith.constant 0 : i32
    %30 = arith.addi %29, %c0_i32_16 : i32
    %31 = tpu.iota {dimensions = array<i32: 1>} : vector<8x128xi32>
    %32 = vector.broadcast %30 : i32 to vector<8x128xi32>
    %33 = arith.addi %32, %31 : vector<8x128xi32>
    %c0_i32_17 = arith.constant 0 : i32
    %34 = vector.broadcast %c0_i32_17 : i32 to vector<8x128xi32>
    %35 = arith.cmpi sge, %33, %34 : vector<8x128xi32>
    %c32_i32 = arith.constant 32 : i32
    %36 = vector.broadcast %c32_i32 : i32 to vector<8x128xi32>
    %37 = arith.cmpi slt, %33, %36 : vector<8x128xi32>
    %38 = arith.andi %35, %37 : vector<8x128xi1>
    %cst_18 = arith.constant 0.000000e+00 : f32
    %39 = vector.broadcast %cst_18 : f32 to vector<8x128xf32>
    %40 = arith.select %38, %28, %39 : vector<8x128xi1>, vector<8x128xf32>
    %c0_19 = arith.constant 0 : index
    %c0_20 = arith.constant 0 : index
    %c0_21 = arith.constant 0 : index
    %c0_22 = arith.constant 0 : index
    %41 = vector.load %arg7[%c0_19, %c0_20, %c0_21, %c0_22] : memref<1x2x8x128xf32, #tpu.memory_space<vmem>>, vector<1x1x8x128xf32>
    %42 = vector.shape_cast %41 : vector<1x1x8x128xf32> to vector<8x128xf32>
    %43 = vector.shape_cast %40 : vector<8x128xf32> to vector<1x1x8x128xf32>
    tpu.vector_store %arg7[%c0_19, %c0_20, %c0_21, %c0_22], %43 {strides = array<i32>} : memref<1x2x8x128xf32, #tpu.memory_space<vmem>>, vector<1x1x8x128xf32>,
    %44 = vector.extract_strided_slice %27 {offsets = [8, 0], sizes = [8, 128], strides = [1, 1]} : vector<16x128xf32> to vector<8x128xf32>
    %c128_i32_23 = arith.constant 128 : i32
    %45 = arith.muli %arg1, %c128_i32_23 : i32
    %c0_i32_24 = arith.constant 0 : i32
    %46 = arith.addi %45, %c0_i32_24 : i32
    %47 = tpu.iota {dimensions = array<i32: 1>} : vector<8x128xi32>
    %48 = vector.broadcast %46 : i32 to vector<8x128xi32>
    %49 = arith.addi %48, %47 : vector<8x128xi32>
    %c0_i32_25 = arith.constant 0 : i32
    %50 = vector.broadcast %c0_i32_25 : i32 to vector<8x128xi32>
    %51 = arith.cmpi sge, %49, %50 : vector<8x128xi32>
    %c32_i32_26 = arith.constant 32 : i32
    %52 = vector.broadcast %c32_i32_26 : i32 to vector<8x128xi32>
    %53 = arith.cmpi slt, %49, %52 : vector<8x128xi32>
    %54 = arith.andi %51, %53 : vector<8x128xi1>
    %cst_27 = arith.constant 0.000000e+00 : f32
    %55 = vector.broadcast %cst_27 : f32 to vector<8x128xf32>
    %56 = arith.select %54, %44, %55 : vector<8x128xi1>, vector<8x128xf32>
    %c0_28 = arith.constant 0 : index
    %c1 = arith.constant 1 : index
    %c0_29 = arith.constant 0 : index
    %c0_30 = arith.constant 0 : index
    %57 = vector.load %arg7[%c0_28, %c1, %c0_29, %c0_30] : memref<1x2x8x128xf32, #tpu.memory_space<vmem>>, vector<1x1x8x128xf32>
    %58 = vector.shape_cast %57 : vector<1x1x8x128xf32> to vector<8x128xf32>
    %59 = vector.shape_cast %56 : vector<8x128xf32> to vector<1x1x8x128xf32>
    tpu.vector_store %arg7[%c0_28, %c1, %c0_29, %c0_30], %59 {strides = array<i32>} : memref<1x2x8x128xf32, #tpu.memory_space<vmem>>, vector<1x1x8x128xf32>,
    return
  }
  func.func @transform_0(%arg0: i32, %arg1: i32) -> (i32, i32, i32) {
    %c0_i32 = arith.constant 0 : i32
    %c0_i32_0 = arith.constant 0 : i32
    return %arg0, %c0_i32, %arg1 : i32, i32, i32
  }
  func.func @transform_1(%arg0: i32, %arg1: i32) -> (i32, i32, i32) {
    %c1_i32 = arith.constant 1 : i32
    %0 = arith.muli %arg1, %c1_i32 : i32
    %c1_i32_0 = arith.constant 1 : i32
    %1 = arith.subi %0, %c1_i32_0 : i32
    %c0_i32 = arith.constant 0 : i32
    %2 = arith.maxsi %1, %c0_i32 : i32
    %c0_i32_1 = arith.constant 0 : i32
    %c0_i32_2 = arith.constant 0 : i32
    return %arg0, %c0_i32_1, %2 : i32, i32, i32
  }
  func.func @transform_2(%arg0: i32, %arg1: i32) -> (i32, i32, i32) {
    %c1_i32 = arith.constant 1 : i32
    %0 = arith.addi %arg1, %c1_i32 : i32
    %c1_i32_0 = arith.constant 1 : i32
    %1 = arith.muli %0, %c1_i32_0 : i32
    %c1_i32_1 = arith.constant 1 : i32
    %2 = arith.minsi %1, %c1_i32_1 : i32
    %c0_i32 = arith.constant 0 : i32
    %c0_i32_2 = arith.constant 0 : i32
    return %arg0, %c0_i32, %2 : i32, i32, i32
  }
  func.func @transform_3(%arg0: i32, %arg1: i32) -> (i32, i32) {
    %c0_i32 = arith.constant 0 : i32
    %c0_i32_0 = arith.constant 0 : i32
    %c0_i32_1 = arith.constant 0 : i32
    return %c0_i32, %c0_i32_0 : i32, i32
  }
  func.func @transform_4(%arg0: i32, %arg1: i32) -> (i32, i32) {
    %c0_i32 = arith.constant 0 : i32
    %c0_i32_0 = arith.constant 0 : i32
    %c0_i32_1 = arith.constant 0 : i32
    return %c0_i32, %c0_i32_0 : i32, i32
  }
  func.func @transform_5(%arg0: i32, %arg1: i32) -> (i32, i32, i32, i32) {
    %c0_i32 = arith.constant 0 : i32
    %c0_i32_0 = arith.constant 0 : i32
    %c0_i32_1 = arith.constant 0 : i32
    return %arg0, %c0_i32, %c0_i32_0, %arg1 : i32, i32, i32, i32
  }
}

module attributes {stable_mosaic.version = 11 : i64} {
  func.func @kernel(%arg0: i32, %arg1: i32, %arg2: memref<1x8x128xf32, #tpu.memory_space<vmem>>, %arg3: memref<1x8x128xf32, #tpu.memory_space<vmem>>, %arg4: memref<1x8x128xf32, #tpu.memory_space<vmem>>, %arg5: memref<3x8x24xf32, #tpu.memory_space<vmem>>, %arg6: memref<3x8x1xf32, #tpu.memory_space<vmem>>, %arg7: memref<3x8x24xf32, #tpu.memory_space<vmem>>, %arg8: memref<3x8x1xf32, #tpu.memory_space<vmem>>, %arg9: memref<3x8x40xf32, #tpu.memory_space<vmem>>, %arg10: memref<3x8x1xf32, #tpu.memory_space<vmem>>, %arg11: memref<3x8x40xf32, #tpu.memory_space<vmem>>, %arg12: memref<3x8x1xf32, #tpu.memory_space<vmem>>, %arg13: memref<1x8x128xf32, #tpu.memory_space<vmem>>) attributes {dimension_semantics = [#tpu.dimension_semantics<parallel>, #tpu.dimension_semantics<parallel>], iteration_bounds = array<i64: 2, 2>, scalar_prefetch = 0 : i64, scratch_operands = 0 : i64, tpu.core_type = #tpu.core_type<tc>, window_params = [{transform_indices = @transform_0, window_bounds = array<i64: 1, 8, 128>}, {transform_indices = @transform_1, window_bounds = array<i64: 1, 8, 128>}, {transform_indices = @transform_2, window_bounds = array<i64: 1, 8, 128>}, {pipeline_mode = #tpu.pipeline_mode<synchronous>, transform_indices = @transform_3, window_bounds = array<i64: 3, 8, 24>}, {pipeline_mode = #tpu.pipeline_mode<synchronous>, transform_indices = @transform_4, window_bounds = array<i64: 3, 8, 1>}, {pipeline_mode = #tpu.pipeline_mode<synchronous>, transform_indices = @transform_5, window_bounds = array<i64: 3, 8, 24>}, {pipeline_mode = #tpu.pipeline_mode<synchronous>, transform_indices = @transform_6, window_bounds = array<i64: 3, 8, 1>}, {pipeline_mode = #tpu.pipeline_mode<synchronous>, transform_indices = @transform_7, window_bounds = array<i64: 3, 8, 40>}, {pipeline_mode = #tpu.pipeline_mode<synchronous>, transform_indices = @transform_8, window_bounds = array<i64: 3, 8, 1>}, {pipeline_mode = #tpu.pipeline_mode<synchronous>, transform_indices = @transform_9, window_bounds = array<i64: 3, 8, 40>}, {pipeline_mode = #tpu.pipeline_mode<synchronous>, transform_indices = @transform_10, window_bounds = array<i64: 3, 8, 1>}, {transform_indices = @transform_11, window_bounds = array<i64: 1, 8, 128>}]} {
    %c0_i32 = arith.constant 0 : i32
    %0 = arith.cmpi sgt, %arg1, %c0_i32 : i32
    %c0 = arith.constant 0 : index
    %c0_0 = arith.constant 0 : index
    %c0_1 = arith.constant 0 : index
    %1 = vector.load %arg3[%c0, %c0_0, %c0_1] : memref<1x8x128xf32, #tpu.memory_space<vmem>>, vector<1x8x128xf32>
    %2 = vector.shape_cast %1 : vector<1x8x128xf32> to vector<8x128xf32>
    %cst = arith.constant 0.000000e+00 : f32
    %3 = vector.broadcast %cst : f32 to vector<8x128xf32>
    %4 = arith.select %0, %2, %3 : vector<8x128xf32>
    %c1_i32 = arith.constant 1 : i32
    %5 = arith.cmpi slt, %arg1, %c1_i32 : i32
    %c0_2 = arith.constant 0 : index
    %c0_3 = arith.constant 0 : index
    %c0_4 = arith.constant 0 : index
    %6 = vector.load %arg4[%c0_2, %c0_3, %c0_4] : memref<1x8x128xf32, #tpu.memory_space<vmem>>, vector<1x8x128xf32>
    %7 = vector.shape_cast %6 : vector<1x8x128xf32> to vector<8x128xf32>
    %cst_5 = arith.constant 0.000000e+00 : f32
    %8 = vector.broadcast %cst_5 : f32 to vector<8x128xf32>
    %9 = arith.select %5, %7, %8 : vector<8x128xf32>
    %c0_6 = arith.constant 0 : index
    %c0_7 = arith.constant 0 : index
    %c0_8 = arith.constant 0 : index
    %10 = vector.load %arg2[%c0_6, %c0_7, %c0_8] : memref<1x8x128xf32, #tpu.memory_space<vmem>>, vector<1x8x128xf32>
    %11 = vector.shape_cast %10 : vector<1x8x128xf32> to vector<8x128xf32>
    %12 = tpu.concatenate %4, %11, %9 in 1 : vector<8x128xf32>, vector<8x128xf32>, vector<8x128xf32> -> vector<8x384xf32>
    %cst_9 = arith.constant 0.000000e+00 : f32
    %13 = vector.broadcast %cst_9 : f32 to vector<8x128xf32>
    %14 = vector.extract_strided_slice %12 {offsets = [0, 116], sizes = [8, 152], strides = [1, 1]} : vector<8x384xf32> to vector<8x152xf32>
    %cst_10 = arith.constant 0.000000e+00 : f32
    %15 = vector.broadcast %cst_10 : f32 to vector<8x152xf32>
    %16 = arith.cmpf oge, %14, %15 : vector<8x152xf32>
    %cst_11 = arith.constant 1.000000e-01 : f32
    %17 = vector.broadcast %cst_11 : f32 to vector<8x152xf32>
    %18 = arith.mulf %17, %14 : vector<8x152xf32>
    %19 = arith.select %16, %14, %18 : vector<8x152xi1>, vector<8x152xf32>
    %c0_12 = arith.constant 0 : index
    %c0_13 = arith.constant 0 : index
    %c0_14 = arith.constant 0 : index
    %20 = vector.load %arg5[%c0_12, %c0_13, %c0_14] : memref<3x8x24xf32, #tpu.memory_space<vmem>>, vector<1x8x24xf32>
    %21 = vector.shape_cast %20 : vector<1x8x24xf32> to vector<8x24xf32>
    %c0_15 = arith.constant 0 : index
    %c0_16 = arith.constant 0 : index
    %c0_17 = arith.constant 0 : index
    %22 = vector.load %arg6[%c0_15, %c0_16, %c0_17] : memref<3x8x1xf32, #tpu.memory_space<vmem>>, vector<1x8x1xf32>
    %23 = vector.shape_cast %22 : vector<1x8x1xf32> to vector<8x1xf32>
    %24 = vector.extract_strided_slice %19 {offsets = [0, 0], sizes = [8, 150], strides = [1, 1]} : vector<8x152xf32> to vector<8x150xf32>
    %25 = vector.extract_strided_slice %19 {offsets = [0, 1], sizes = [8, 150], strides = [1, 1]} : vector<8x152xf32> to vector<8x150xf32>
    %26 = vector.extract_strided_slice %19 {offsets = [0, 2], sizes = [8, 150], strides = [1, 1]} : vector<8x152xf32> to vector<8x150xf32>
    %27 = tpu.concatenate %24, %25, %26 in 0 : vector<8x150xf32>, vector<8x150xf32>, vector<8x150xf32> -> vector<24x150xf32>
    %cst_18 = arith.constant dense<0.000000e+00> : vector<8x150xf32>
    %28 = tpu.matmul %21, %27, %cst_18 {dimension_numbers = #tpu.dot_dimension_numbers<[1], [0], [0], [1], [0, 0, 1, 1], [], []>} : vector<8x24xf32>, vector<24x150xf32>, vector<8x150xf32> -> vector<8x150xf32>
    %29 = vector.broadcast %23 : vector<8x1xf32> to vector<8x150xf32>
    %30 = arith.addf %28, %29 : vector<8x150xf32>
    %c128_i32 = arith.constant 128 : i32
    %31 = arith.muli %arg1, %c128_i32 : i32
    %c-11_i32 = arith.constant -11 : i32
    %32 = arith.addi %31, %c-11_i32 : i32
    %33 = tpu.iota {dimensions = array<i32: 1>} : vector<8x150xi32>
    %34 = vector.broadcast %32 : i32 to vector<8x150xi32>
    %35 = arith.addi %34, %33 : vector<8x150xi32>
    %c0_i32_19 = arith.constant 0 : i32
    %36 = vector.broadcast %c0_i32_19 : i32 to vector<8x150xi32>
    %37 = arith.cmpi sge, %35, %36 : vector<8x150xi32>
    %c32_i32 = arith.constant 32 : i32
    %38 = vector.broadcast %c32_i32 : i32 to vector<8x150xi32>
    %39 = arith.cmpi slt, %35, %38 : vector<8x150xi32>
    %40 = arith.andi %37, %39 : vector<8x150xi1>
    %cst_20 = arith.constant 0.000000e+00 : f32
    %41 = vector.broadcast %cst_20 : f32 to vector<8x150xf32>
    %42 = arith.select %40, %30, %41 : vector<8x150xi1>, vector<8x150xf32>
    %cst_21 = arith.constant 0.000000e+00 : f32
    %43 = vector.broadcast %cst_21 : f32 to vector<8x150xf32>
    %44 = arith.cmpf oge, %42, %43 : vector<8x150xf32>
    %cst_22 = arith.constant 1.000000e-01 : f32
    %45 = vector.broadcast %cst_22 : f32 to vector<8x150xf32>
    %46 = arith.mulf %45, %42 : vector<8x150xf32>
    %47 = arith.select %44, %42, %46 : vector<8x150xi1>, vector<8x150xf32>
    %c0_23 = arith.constant 0 : index
    %c0_24 = arith.constant 0 : index
    %c0_25 = arith.constant 0 : index
    %48 = vector.load %arg7[%c0_23, %c0_24, %c0_25] : memref<3x8x24xf32, #tpu.memory_space<vmem>>, vector<1x8x24xf32>
    %49 = vector.shape_cast %48 : vector<1x8x24xf32> to vector<8x24xf32>
    %c0_26 = arith.constant 0 : index
    %c0_27 = arith.constant 0 : index
    %c0_28 = arith.constant 0 : index
    %50 = vector.load %arg8[%c0_26, %c0_27, %c0_28] : memref<3x8x1xf32, #tpu.memory_space<vmem>>, vector<1x8x1xf32>
    %51 = vector.shape_cast %50 : vector<1x8x1xf32> to vector<8x1xf32>
    %52 = vector.extract_strided_slice %47 {offsets = [0, 0], sizes = [8, 148], strides = [1, 1]} : vector<8x150xf32> to vector<8x148xf32>
    %53 = vector.extract_strided_slice %47 {offsets = [0, 1], sizes = [8, 148], strides = [1, 1]} : vector<8x150xf32> to vector<8x148xf32>
    %54 = vector.extract_strided_slice %47 {offsets = [0, 2], sizes = [8, 148], strides = [1, 1]} : vector<8x150xf32> to vector<8x148xf32>
    %55 = tpu.concatenate %52, %53, %54 in 0 : vector<8x148xf32>, vector<8x148xf32>, vector<8x148xf32> -> vector<24x148xf32>
    %cst_29 = arith.constant dense<0.000000e+00> : vector<8x148xf32>
    %56 = tpu.matmul %49, %55, %cst_29 {dimension_numbers = #tpu.dot_dimension_numbers<[1], [0], [0], [1], [0, 0, 1, 1], [], []>} : vector<8x24xf32>, vector<24x148xf32>, vector<8x148xf32> -> vector<8x148xf32>
    %57 = vector.broadcast %51 : vector<8x1xf32> to vector<8x148xf32>
    %58 = arith.addf %56, %57 : vector<8x148xf32>
    %c128_i32_30 = arith.constant 128 : i32
    %59 = arith.muli %arg1, %c128_i32_30 : i32
    %c-10_i32 = arith.constant -10 : i32
    %60 = arith.addi %59, %c-10_i32 : i32
    %61 = tpu.iota {dimensions = array<i32: 1>} : vector<8x148xi32>
    %62 = vector.broadcast %60 : i32 to vector<8x148xi32>
    %63 = arith.addi %62, %61 : vector<8x148xi32>
    %c0_i32_31 = arith.constant 0 : i32
    %64 = vector.broadcast %c0_i32_31 : i32 to vector<8x148xi32>
    %65 = arith.cmpi sge, %63, %64 : vector<8x148xi32>
    %c32_i32_32 = arith.constant 32 : i32
    %66 = vector.broadcast %c32_i32_32 : i32 to vector<8x148xi32>
    %67 = arith.cmpi slt, %63, %66 : vector<8x148xi32>
    %68 = arith.andi %65, %67 : vector<8x148xi1>
    %cst_33 = arith.constant 0.000000e+00 : f32
    %69 = vector.broadcast %cst_33 : f32 to vector<8x148xf32>
    %70 = arith.select %68, %58, %69 : vector<8x148xi1>, vector<8x148xf32>
    %71 = vector.extract_strided_slice %14 {offsets = [0, 2], sizes = [8, 148], strides = [1, 1]} : vector<8x152xf32> to vector<8x148xf32>
    %72 = arith.addf %70, %71 : vector<8x148xf32>
    %cst_34 = arith.constant 0.000000e+00 : f32
    %73 = vector.broadcast %cst_34 : f32 to vector<8x148xf32>
    %74 = arith.cmpf oge, %72, %73 : vector<8x148xf32>
    %cst_35 = arith.constant 1.000000e-01 : f32
    %75 = vector.broadcast %cst_35 : f32 to vector<8x148xf32>
    %76 = arith.mulf %75, %72 : vector<8x148xf32>
    %77 = arith.select %74, %72, %76 : vector<8x148xi1>, vector<8x148xf32>
    %c1 = arith.constant 1 : index
    %c0_36 = arith.constant 0 : index
    %c0_37 = arith.constant 0 : index
    %78 = vector.load %arg5[%c1, %c0_36, %c0_37] : memref<3x8x24xf32, #tpu.memory_space<vmem>>, vector<1x8x24xf32>
    %79 = vector.shape_cast %78 : vector<1x8x24xf32> to vector<8x24xf32>
    %c1_38 = arith.constant 1 : index
    %c0_39 = arith.constant 0 : index
    %c0_40 = arith.constant 0 : index
    %80 = vector.load %arg6[%c1_38, %c0_39, %c0_40] : memref<3x8x1xf32, #tpu.memory_space<vmem>>, vector<1x8x1xf32>
    %81 = vector.shape_cast %80 : vector<1x8x1xf32> to vector<8x1xf32>
    %82 = vector.extract_strided_slice %77 {offsets = [0, 0], sizes = [8, 142], strides = [1, 1]} : vector<8x148xf32> to vector<8x142xf32>
    %83 = vector.extract_strided_slice %77 {offsets = [0, 3], sizes = [8, 142], strides = [1, 1]} : vector<8x148xf32> to vector<8x142xf32>
    %84 = vector.extract_strided_slice %77 {offsets = [0, 6], sizes = [8, 142], strides = [1, 1]} : vector<8x148xf32> to vector<8x142xf32>
    %85 = tpu.concatenate %82, %83, %84 in 0 : vector<8x142xf32>, vector<8x142xf32>, vector<8x142xf32> -> vector<24x142xf32>
    %cst_41 = arith.constant dense<0.000000e+00> : vector<8x142xf32>
    %86 = tpu.matmul %79, %85, %cst_41 {dimension_numbers = #tpu.dot_dimension_numbers<[1], [0], [0], [1], [0, 0, 1, 1], [], []>} : vector<8x24xf32>, vector<24x142xf32>, vector<8x142xf32> -> vector<8x142xf32>
    %87 = vector.broadcast %81 : vector<8x1xf32> to vector<8x142xf32>
    %88 = arith.addf %86, %87 : vector<8x142xf32>
    %c128_i32_42 = arith.constant 128 : i32
    %89 = arith.muli %arg1, %c128_i32_42 : i32
    %c-7_i32 = arith.constant -7 : i32
    %90 = arith.addi %89, %c-7_i32 : i32
    %91 = tpu.iota {dimensions = array<i32: 1>} : vector<8x142xi32>
    %92 = vector.broadcast %90 : i32 to vector<8x142xi32>
    %93 = arith.addi %92, %91 : vector<8x142xi32>
    %c0_i32_43 = arith.constant 0 : i32
    %94 = vector.broadcast %c0_i32_43 : i32 to vector<8x142xi32>
    %95 = arith.cmpi sge, %93, %94 : vector<8x142xi32>
    %c32_i32_44 = arith.constant 32 : i32
    %96 = vector.broadcast %c32_i32_44 : i32 to vector<8x142xi32>
    %97 = arith.cmpi slt, %93, %96 : vector<8x142xi32>
    %98 = arith.andi %95, %97 : vector<8x142xi1>
    %cst_45 = arith.constant 0.000000e+00 : f32
    %99 = vector.broadcast %cst_45 : f32 to vector<8x142xf32>
    %100 = arith.select %98, %88, %99 : vector<8x142xi1>, vector<8x142xf32>
    %cst_46 = arith.constant 0.000000e+00 : f32
    %101 = vector.broadcast %cst_46 : f32 to vector<8x142xf32>
    %102 = arith.cmpf oge, %100, %101 : vector<8x142xf32>
    %cst_47 = arith.constant 1.000000e-01 : f32
    %103 = vector.broadcast %cst_47 : f32 to vector<8x142xf32>
    %104 = arith.mulf %103, %100 : vector<8x142xf32>
    %105 = arith.select %102, %100, %104 : vector<8x142xi1>, vector<8x142xf32>
    %c1_48 = arith.constant 1 : index
    %c0_49 = arith.constant 0 : index
    %c0_50 = arith.constant 0 : index
    %106 = vector.load %arg7[%c1_48, %c0_49, %c0_50] : memref<3x8x24xf32, #tpu.memory_space<vmem>>, vector<1x8x24xf32>
    %107 = vector.shape_cast %106 : vector<1x8x24xf32> to vector<8x24xf32>
    %c1_51 = arith.constant 1 : index
    %c0_52 = arith.constant 0 : index
    %c0_53 = arith.constant 0 : index
    %108 = vector.load %arg8[%c1_51, %c0_52, %c0_53] : memref<3x8x1xf32, #tpu.memory_space<vmem>>, vector<1x8x1xf32>
    %109 = vector.shape_cast %108 : vector<1x8x1xf32> to vector<8x1xf32>
    %110 = vector.extract_strided_slice %105 {offsets = [0, 0], sizes = [8, 140], strides = [1, 1]} : vector<8x142xf32> to vector<8x140xf32>
    %111 = vector.extract_strided_slice %105 {offsets = [0, 1], sizes = [8, 140], strides = [1, 1]} : vector<8x142xf32> to vector<8x140xf32>
    %112 = vector.extract_strided_slice %105 {offsets = [0, 2], sizes = [8, 140], strides = [1, 1]} : vector<8x142xf32> to vector<8x140xf32>
    %113 = tpu.concatenate %110, %111, %112 in 0 : vector<8x140xf32>, vector<8x140xf32>, vector<8x140xf32> -> vector<24x140xf32>
    %cst_54 = arith.constant dense<0.000000e+00> : vector<8x140xf32>
    %114 = tpu.matmul %107, %113, %cst_54 {dimension_numbers = #tpu.dot_dimension_numbers<[1], [0], [0], [1], [0, 0, 1, 1], [], []>} : vector<8x24xf32>, vector<24x140xf32>, vector<8x140xf32> -> vector<8x140xf32>
    %115 = vector.broadcast %109 : vector<8x1xf32> to vector<8x140xf32>
    %116 = arith.addf %114, %115 : vector<8x140xf32>
    %c128_i32_55 = arith.constant 128 : i32
    %117 = arith.muli %arg1, %c128_i32_55 : i32
    %c-6_i32 = arith.constant -6 : i32
    %118 = arith.addi %117, %c-6_i32 : i32
    %119 = tpu.iota {dimensions = array<i32: 1>} : vector<8x140xi32>
    %120 = vector.broadcast %118 : i32 to vector<8x140xi32>
    %121 = arith.addi %120, %119 : vector<8x140xi32>
    %c0_i32_56 = arith.constant 0 : i32
    %122 = vector.broadcast %c0_i32_56 : i32 to vector<8x140xi32>
    %123 = arith.cmpi sge, %121, %122 : vector<8x140xi32>
    %c32_i32_57 = arith.constant 32 : i32
    %124 = vector.broadcast %c32_i32_57 : i32 to vector<8x140xi32>
    %125 = arith.cmpi slt, %121, %124 : vector<8x140xi32>
    %126 = arith.andi %123, %125 : vector<8x140xi1>
    %cst_58 = arith.constant 0.000000e+00 : f32
    %127 = vector.broadcast %cst_58 : f32 to vector<8x140xf32>
    %128 = arith.select %126, %116, %127 : vector<8x140xi1>, vector<8x140xf32>
    %129 = vector.extract_strided_slice %72 {offsets = [0, 4], sizes = [8, 140], strides = [1, 1]} : vector<8x148xf32> to vector<8x140xf32>
    %130 = arith.addf %128, %129 : vector<8x140xf32>
    %cst_59 = arith.constant 0.000000e+00 : f32
    %131 = vector.broadcast %cst_59 : f32 to vector<8x140xf32>
    %132 = arith.cmpf oge, %130, %131 : vector<8x140xf32>
    %cst_60 = arith.constant 1.000000e-01 : f32
    %133 = vector.broadcast %cst_60 : f32 to vector<8x140xf32>
    %134 = arith.mulf %133, %130 : vector<8x140xf32>
    %135 = arith.select %132, %130, %134 : vector<8x140xi1>, vector<8x140xf32>
    %c2 = arith.constant 2 : index
    %c0_61 = arith.constant 0 : index
    %c0_62 = arith.constant 0 : index
    %136 = vector.load %arg5[%c2, %c0_61, %c0_62] : memref<3x8x24xf32, #tpu.memory_space<vmem>>, vector<1x8x24xf32>
    %137 = vector.shape_cast %136 : vector<1x8x24xf32> to vector<8x24xf32>
    %c2_63 = arith.constant 2 : index
    %c0_64 = arith.constant 0 : index
    %c0_65 = arith.constant 0 : index
    %138 = vector.load %arg6[%c2_63, %c0_64, %c0_65] : memref<3x8x1xf32, #tpu.memory_space<vmem>>, vector<1x8x1xf32>
    %139 = vector.shape_cast %138 : vector<1x8x1xf32> to vector<8x1xf32>
    %140 = vector.extract_strided_slice %135 {offsets = [0, 0], sizes = [8, 130], strides = [1, 1]} : vector<8x140xf32> to vector<8x130xf32>
    %141 = vector.extract_strided_slice %135 {offsets = [0, 5], sizes = [8, 130], strides = [1, 1]} : vector<8x140xf32> to vector<8x130xf32>
    %142 = vector.extract_strided_slice %135 {offsets = [0, 10], sizes = [8, 130], strides = [1, 1]} : vector<8x140xf32> to vector<8x130xf32>
    %143 = tpu.concatenate %140, %141, %142 in 0 : vector<8x130xf32>, vector<8x130xf32>, vector<8x130xf32> -> vector<24x130xf32>
    %cst_66 = arith.constant dense<0.000000e+00> : vector<8x130xf32>
    %144 = tpu.matmul %137, %143, %cst_66 {dimension_numbers = #tpu.dot_dimension_numbers<[1], [0], [0], [1], [0, 0, 1, 1], [], []>} : vector<8x24xf32>, vector<24x130xf32>, vector<8x130xf32> -> vector<8x130xf32>
    %145 = vector.broadcast %139 : vector<8x1xf32> to vector<8x130xf32>
    %146 = arith.addf %144, %145 : vector<8x130xf32>
    %c128_i32_67 = arith.constant 128 : i32
    %147 = arith.muli %arg1, %c128_i32_67 : i32
    %c-1_i32 = arith.constant -1 : i32
    %148 = arith.addi %147, %c-1_i32 : i32
    %149 = tpu.iota {dimensions = array<i32: 1>} : vector<8x130xi32>
    %150 = vector.broadcast %148 : i32 to vector<8x130xi32>
    %151 = arith.addi %150, %149 : vector<8x130xi32>
    %c0_i32_68 = arith.constant 0 : i32
    %152 = vector.broadcast %c0_i32_68 : i32 to vector<8x130xi32>
    %153 = arith.cmpi sge, %151, %152 : vector<8x130xi32>
    %c32_i32_69 = arith.constant 32 : i32
    %154 = vector.broadcast %c32_i32_69 : i32 to vector<8x130xi32>
    %155 = arith.cmpi slt, %151, %154 : vector<8x130xi32>
    %156 = arith.andi %153, %155 : vector<8x130xi1>
    %cst_70 = arith.constant 0.000000e+00 : f32
    %157 = vector.broadcast %cst_70 : f32 to vector<8x130xf32>
    %158 = arith.select %156, %146, %157 : vector<8x130xi1>, vector<8x130xf32>
    %cst_71 = arith.constant 0.000000e+00 : f32
    %159 = vector.broadcast %cst_71 : f32 to vector<8x130xf32>
    %160 = arith.cmpf oge, %158, %159 : vector<8x130xf32>
    %cst_72 = arith.constant 1.000000e-01 : f32
    %161 = vector.broadcast %cst_72 : f32 to vector<8x130xf32>
    %162 = arith.mulf %161, %158 : vector<8x130xf32>
    %163 = arith.select %160, %158, %162 : vector<8x130xi1>, vector<8x130xf32>
    %c2_73 = arith.constant 2 : index
    %c0_74 = arith.constant 0 : index
    %c0_75 = arith.constant 0 : index
    %164 = vector.load %arg7[%c2_73, %c0_74, %c0_75] : memref<3x8x24xf32, #tpu.memory_space<vmem>>, vector<1x8x24xf32>
    %165 = vector.shape_cast %164 : vector<1x8x24xf32> to vector<8x24xf32>
    %c2_76 = arith.constant 2 : index
    %c0_77 = arith.constant 0 : index
    %c0_78 = arith.constant 0 : index
    %166 = vector.load %arg8[%c2_76, %c0_77, %c0_78] : memref<3x8x1xf32, #tpu.memory_space<vmem>>, vector<1x8x1xf32>
    %167 = vector.shape_cast %166 : vector<1x8x1xf32> to vector<8x1xf32>
    %168 = vector.extract_strided_slice %163 {offsets = [0, 0], sizes = [8, 128], strides = [1, 1]} : vector<8x130xf32> to vector<8x128xf32>
    %169 = vector.extract_strided_slice %163 {offsets = [0, 1], sizes = [8, 128], strides = [1, 1]} : vector<8x130xf32> to vector<8x128xf32>
    %170 = vector.extract_strided_slice %163 {offsets = [0, 2], sizes = [8, 128], strides = [1, 1]} : vector<8x130xf32> to vector<8x128xf32>
    %171 = tpu.concatenate %168, %169, %170 in 0 : vector<8x128xf32>, vector<8x128xf32>, vector<8x128xf32> -> vector<24x128xf32>
    %cst_79 = arith.constant dense<0.000000e+00> : vector<8x128xf32>
    %172 = tpu.matmul %165, %171, %cst_79 {dimension_numbers = #tpu.dot_dimension_numbers<[1], [0], [0], [1], [0, 0, 1, 1], [], []>} : vector<8x24xf32>, vector<24x128xf32>, vector<8x128xf32> -> vector<8x128xf32>
    %173 = vector.broadcast %167 : vector<8x1xf32> to vector<8x128xf32>
    %174 = arith.addf %172, %173 : vector<8x128xf32>
    %c128_i32_80 = arith.constant 128 : i32
    %175 = arith.muli %arg1, %c128_i32_80 : i32
    %c0_i32_81 = arith.constant 0 : i32
    %176 = arith.addi %175, %c0_i32_81 : i32
    %177 = tpu.iota {dimensions = array<i32: 1>} : vector<8x128xi32>
    %178 = vector.broadcast %176 : i32 to vector<8x128xi32>
    %179 = arith.addi %178, %177 : vector<8x128xi32>
    %c0_i32_82 = arith.constant 0 : i32
    %180 = vector.broadcast %c0_i32_82 : i32 to vector<8x128xi32>
    %181 = arith.cmpi sge, %179, %180 : vector<8x128xi32>
    %c32_i32_83 = arith.constant 32 : i32
    %182 = vector.broadcast %c32_i32_83 : i32 to vector<8x128xi32>
    %183 = arith.cmpi slt, %179, %182 : vector<8x128xi32>
    %184 = arith.andi %181, %183 : vector<8x128xi1>
    %cst_84 = arith.constant 0.000000e+00 : f32
    %185 = vector.broadcast %cst_84 : f32 to vector<8x128xf32>
    %186 = arith.select %184, %174, %185 : vector<8x128xi1>, vector<8x128xf32>
    %187 = vector.extract_strided_slice %130 {offsets = [0, 6], sizes = [8, 128], strides = [1, 1]} : vector<8x140xf32> to vector<8x128xf32>
    %188 = arith.addf %186, %187 : vector<8x128xf32>
    %189 = arith.addf %13, %188 : vector<8x128xf32>
    %190 = vector.extract_strided_slice %12 {offsets = [0, 104], sizes = [8, 176], strides = [1, 1]} : vector<8x384xf32> to vector<8x176xf32>
    %cst_85 = arith.constant 0.000000e+00 : f32
    %191 = vector.broadcast %cst_85 : f32 to vector<8x176xf32>
    %192 = arith.cmpf oge, %190, %191 : vector<8x176xf32>
    %cst_86 = arith.constant 1.000000e-01 : f32
    %193 = vector.broadcast %cst_86 : f32 to vector<8x176xf32>
    %194 = arith.mulf %193, %190 : vector<8x176xf32>
    %195 = arith.select %192, %190, %194 : vector<8x176xi1>, vector<8x176xf32>
    %c0_87 = arith.constant 0 : index
    %c0_88 = arith.constant 0 : index
    %c0_89 = arith.constant 0 : index
    %196 = vector.load %arg9[%c0_87, %c0_88, %c0_89] : memref<3x8x40xf32, #tpu.memory_space<vmem>>, vector<1x8x40xf32>
    %197 = vector.shape_cast %196 : vector<1x8x40xf32> to vector<8x40xf32>
    %c0_90 = arith.constant 0 : index
    %c0_91 = arith.constant 0 : index
    %c0_92 = arith.constant 0 : index
    %198 = vector.load %arg10[%c0_90, %c0_91, %c0_92] : memref<3x8x1xf32, #tpu.memory_space<vmem>>, vector<1x8x1xf32>
    %199 = vector.shape_cast %198 : vector<1x8x1xf32> to vector<8x1xf32>
    %200 = vector.extract_strided_slice %195 {offsets = [0, 0], sizes = [8, 172], strides = [1, 1]} : vector<8x176xf32> to vector<8x172xf32>
    %201 = vector.extract_strided_slice %195 {offsets = [0, 1], sizes = [8, 172], strides = [1, 1]} : vector<8x176xf32> to vector<8x172xf32>
    %202 = vector.extract_strided_slice %195 {offsets = [0, 2], sizes = [8, 172], strides = [1, 1]} : vector<8x176xf32> to vector<8x172xf32>
    %203 = vector.extract_strided_slice %195 {offsets = [0, 3], sizes = [8, 172], strides = [1, 1]} : vector<8x176xf32> to vector<8x172xf32>
    %204 = vector.extract_strided_slice %195 {offsets = [0, 4], sizes = [8, 172], strides = [1, 1]} : vector<8x176xf32> to vector<8x172xf32>
    %205 = tpu.concatenate %200, %201, %202, %203, %204 in 0 : vector<8x172xf32>, vector<8x172xf32>, vector<8x172xf32>, vector<8x172xf32>, vector<8x172xf32> -> vector<40x172xf32>
    %cst_93 = arith.constant dense<0.000000e+00> : vector<8x172xf32>
    %206 = tpu.matmul %197, %205, %cst_93 {dimension_numbers = #tpu.dot_dimension_numbers<[1], [0], [0], [1], [0, 0, 1, 1], [], []>} : vector<8x40xf32>, vector<40x172xf32>, vector<8x172xf32> -> vector<8x172xf32>
    %207 = vector.broadcast %199 : vector<8x1xf32> to vector<8x172xf32>
    %208 = arith.addf %206, %207 : vector<8x172xf32>
    %c128_i32_94 = arith.constant 128 : i32
    %209 = arith.muli %arg1, %c128_i32_94 : i32
    %c-22_i32 = arith.constant -22 : i32
    %210 = arith.addi %209, %c-22_i32 : i32
    %211 = tpu.iota {dimensions = array<i32: 1>} : vector<8x172xi32>
    %212 = vector.broadcast %210 : i32 to vector<8x172xi32>
    %213 = arith.addi %212, %211 : vector<8x172xi32>
    %c0_i32_95 = arith.constant 0 : i32
    %214 = vector.broadcast %c0_i32_95 : i32 to vector<8x172xi32>
    %215 = arith.cmpi sge, %213, %214 : vector<8x172xi32>
    %c32_i32_96 = arith.constant 32 : i32
    %216 = vector.broadcast %c32_i32_96 : i32 to vector<8x172xi32>
    %217 = arith.cmpi slt, %213, %216 : vector<8x172xi32>
    %218 = arith.andi %215, %217 : vector<8x172xi1>
    %cst_97 = arith.constant 0.000000e+00 : f32
    %219 = vector.broadcast %cst_97 : f32 to vector<8x172xf32>
    %220 = arith.select %218, %208, %219 : vector<8x172xi1>, vector<8x172xf32>
    %cst_98 = arith.constant 0.000000e+00 : f32
    %221 = vector.broadcast %cst_98 : f32 to vector<8x172xf32>
    %222 = arith.cmpf oge, %220, %221 : vector<8x172xf32>
    %cst_99 = arith.constant 1.000000e-01 : f32
    %223 = vector.broadcast %cst_99 : f32 to vector<8x172xf32>
    %224 = arith.mulf %223, %220 : vector<8x172xf32>
    %225 = arith.select %222, %220, %224 : vector<8x172xi1>, vector<8x172xf32>
    %c0_100 = arith.constant 0 : index
    %c0_101 = arith.constant 0 : index
    %c0_102 = arith.constant 0 : index
    %226 = vector.load %arg11[%c0_100, %c0_101, %c0_102] : memref<3x8x40xf32, #tpu.memory_space<vmem>>, vector<1x8x40xf32>
    %227 = vector.shape_cast %226 : vector<1x8x40xf32> to vector<8x40xf32>
    %c0_103 = arith.constant 0 : index
    %c0_104 = arith.constant 0 : index
    %c0_105 = arith.constant 0 : index
    %228 = vector.load %arg12[%c0_103, %c0_104, %c0_105] : memref<3x8x1xf32, #tpu.memory_space<vmem>>, vector<1x8x1xf32>
    %229 = vector.shape_cast %228 : vector<1x8x1xf32> to vector<8x1xf32>
    %230 = vector.extract_strided_slice %225 {offsets = [0, 0], sizes = [8, 168], strides = [1, 1]} : vector<8x172xf32> to vector<8x168xf32>
    %231 = vector.extract_strided_slice %225 {offsets = [0, 1], sizes = [8, 168], strides = [1, 1]} : vector<8x172xf32> to vector<8x168xf32>
    %232 = vector.extract_strided_slice %225 {offsets = [0, 2], sizes = [8, 168], strides = [1, 1]} : vector<8x172xf32> to vector<8x168xf32>
    %233 = vector.extract_strided_slice %225 {offsets = [0, 3], sizes = [8, 168], strides = [1, 1]} : vector<8x172xf32> to vector<8x168xf32>
    %234 = vector.extract_strided_slice %225 {offsets = [0, 4], sizes = [8, 168], strides = [1, 1]} : vector<8x172xf32> to vector<8x168xf32>
    %235 = tpu.concatenate %230, %231, %232, %233, %234 in 0 : vector<8x168xf32>, vector<8x168xf32>, vector<8x168xf32>, vector<8x168xf32>, vector<8x168xf32> -> vector<40x168xf32>
    %cst_106 = arith.constant dense<0.000000e+00> : vector<8x168xf32>
    %236 = tpu.matmul %227, %235, %cst_106 {dimension_numbers = #tpu.dot_dimension_numbers<[1], [0], [0], [1], [0, 0, 1, 1], [], []>} : vector<8x40xf32>, vector<40x168xf32>, vector<8x168xf32> -> vector<8x168xf32>
    %237 = vector.broadcast %229 : vector<8x1xf32> to vector<8x168xf32>
    %238 = arith.addf %236, %237 : vector<8x168xf32>
    %c128_i32_107 = arith.constant 128 : i32
    %239 = arith.muli %arg1, %c128_i32_107 : i32
    %c-20_i32 = arith.constant -20 : i32
    %240 = arith.addi %239, %c-20_i32 : i32
    %241 = tpu.iota {dimensions = array<i32: 1>} : vector<8x168xi32>
    %242 = vector.broadcast %240 : i32 to vector<8x168xi32>
    %243 = arith.addi %242, %241 : vector<8x168xi32>
    %c0_i32_108 = arith.constant 0 : i32
    %244 = vector.broadcast %c0_i32_108 : i32 to vector<8x168xi32>
    %245 = arith.cmpi sge, %243, %244 : vector<8x168xi32>
    %c32_i32_109 = arith.constant 32 : i32
    %246 = vector.broadcast %c32_i32_109 : i32 to vector<8x168xi32>
    %247 = arith.cmpi slt, %243, %246 : vector<8x168xi32>
    %248 = arith.andi %245, %247 : vector<8x168xi1>
    %cst_110 = arith.constant 0.000000e+00 : f32
    %249 = vector.broadcast %cst_110 : f32 to vector<8x168xf32>
    %250 = arith.select %248, %238, %249 : vector<8x168xi1>, vector<8x168xf32>
    %251 = vector.extract_strided_slice %190 {offsets = [0, 4], sizes = [8, 168], strides = [1, 1]} : vector<8x176xf32> to vector<8x168xf32>
    %252 = arith.addf %250, %251 : vector<8x168xf32>
    %cst_111 = arith.constant 0.000000e+00 : f32
    %253 = vector.broadcast %cst_111 : f32 to vector<8x168xf32>
    %254 = arith.cmpf oge, %252, %253 : vector<8x168xf32>
    %cst_112 = arith.constant 1.000000e-01 : f32
    %255 = vector.broadcast %cst_112 : f32 to vector<8x168xf32>
    %256 = arith.mulf %255, %252 : vector<8x168xf32>
    %257 = arith.select %254, %252, %256 : vector<8x168xi1>, vector<8x168xf32>
    %c1_113 = arith.constant 1 : index
    %c0_114 = arith.constant 0 : index
    %c0_115 = arith.constant 0 : index
    %258 = vector.load %arg9[%c1_113, %c0_114, %c0_115] : memref<3x8x40xf32, #tpu.memory_space<vmem>>, vector<1x8x40xf32>
    %259 = vector.shape_cast %258 : vector<1x8x40xf32> to vector<8x40xf32>
    %c1_116 = arith.constant 1 : index
    %c0_117 = arith.constant 0 : index
    %c0_118 = arith.constant 0 : index
    %260 = vector.load %arg10[%c1_116, %c0_117, %c0_118] : memref<3x8x1xf32, #tpu.memory_space<vmem>>, vector<1x8x1xf32>
    %261 = vector.shape_cast %260 : vector<1x8x1xf32> to vector<8x1xf32>
    %262 = vector.extract_strided_slice %257 {offsets = [0, 0], sizes = [8, 156], strides = [1, 1]} : vector<8x168xf32> to vector<8x156xf32>
    %263 = vector.extract_strided_slice %257 {offsets = [0, 3], sizes = [8, 156], strides = [1, 1]} : vector<8x168xf32> to vector<8x156xf32>
    %264 = vector.extract_strided_slice %257 {offsets = [0, 6], sizes = [8, 156], strides = [1, 1]} : vector<8x168xf32> to vector<8x156xf32>
    %265 = vector.extract_strided_slice %257 {offsets = [0, 9], sizes = [8, 156], strides = [1, 1]} : vector<8x168xf32> to vector<8x156xf32>
    %266 = vector.extract_strided_slice %257 {offsets = [0, 12], sizes = [8, 156], strides = [1, 1]} : vector<8x168xf32> to vector<8x156xf32>
    %267 = tpu.concatenate %262, %263, %264, %265, %266 in 0 : vector<8x156xf32>, vector<8x156xf32>, vector<8x156xf32>, vector<8x156xf32>, vector<8x156xf32> -> vector<40x156xf32>
    %cst_119 = arith.constant dense<0.000000e+00> : vector<8x156xf32>
    %268 = tpu.matmul %259, %267, %cst_119 {dimension_numbers = #tpu.dot_dimension_numbers<[1], [0], [0], [1], [0, 0, 1, 1], [], []>} : vector<8x40xf32>, vector<40x156xf32>, vector<8x156xf32> -> vector<8x156xf32>
    %269 = vector.broadcast %261 : vector<8x1xf32> to vector<8x156xf32>
    %270 = arith.addf %268, %269 : vector<8x156xf32>
    %c128_i32_120 = arith.constant 128 : i32
    %271 = arith.muli %arg1, %c128_i32_120 : i32
    %c-14_i32 = arith.constant -14 : i32
    %272 = arith.addi %271, %c-14_i32 : i32
    %273 = tpu.iota {dimensions = array<i32: 1>} : vector<8x156xi32>
    %274 = vector.broadcast %272 : i32 to vector<8x156xi32>
    %275 = arith.addi %274, %273 : vector<8x156xi32>
    %c0_i32_121 = arith.constant 0 : i32
    %276 = vector.broadcast %c0_i32_121 : i32 to vector<8x156xi32>
    %277 = arith.cmpi sge, %275, %276 : vector<8x156xi32>
    %c32_i32_122 = arith.constant 32 : i32
    %278 = vector.broadcast %c32_i32_122 : i32 to vector<8x156xi32>
    %279 = arith.cmpi slt, %275, %278 : vector<8x156xi32>
    %280 = arith.andi %277, %279 : vector<8x156xi1>
    %cst_123 = arith.constant 0.000000e+00 : f32
    %281 = vector.broadcast %cst_123 : f32 to vector<8x156xf32>
    %282 = arith.select %280, %270, %281 : vector<8x156xi1>, vector<8x156xf32>
    %cst_124 = arith.constant 0.000000e+00 : f32
    %283 = vector.broadcast %cst_124 : f32 to vector<8x156xf32>
    %284 = arith.cmpf oge, %282, %283 : vector<8x156xf32>
    %cst_125 = arith.constant 1.000000e-01 : f32
    %285 = vector.broadcast %cst_125 : f32 to vector<8x156xf32>
    %286 = arith.mulf %285, %282 : vector<8x156xf32>
    %287 = arith.select %284, %282, %286 : vector<8x156xi1>, vector<8x156xf32>
    %c1_126 = arith.constant 1 : index
    %c0_127 = arith.constant 0 : index
    %c0_128 = arith.constant 0 : index
    %288 = vector.load %arg11[%c1_126, %c0_127, %c0_128] : memref<3x8x40xf32, #tpu.memory_space<vmem>>, vector<1x8x40xf32>
    %289 = vector.shape_cast %288 : vector<1x8x40xf32> to vector<8x40xf32>
    %c1_129 = arith.constant 1 : index
    %c0_130 = arith.constant 0 : index
    %c0_131 = arith.constant 0 : index
    %290 = vector.load %arg12[%c1_129, %c0_130, %c0_131] : memref<3x8x1xf32, #tpu.memory_space<vmem>>, vector<1x8x1xf32>
    %291 = vector.shape_cast %290 : vector<1x8x1xf32> to vector<8x1xf32>
    %292 = vector.extract_strided_slice %287 {offsets = [0, 0], sizes = [8, 152], strides = [1, 1]} : vector<8x156xf32> to vector<8x152xf32>
    %293 = vector.extract_strided_slice %287 {offsets = [0, 1], sizes = [8, 152], strides = [1, 1]} : vector<8x156xf32> to vector<8x152xf32>
    %294 = vector.extract_strided_slice %287 {offsets = [0, 2], sizes = [8, 152], strides = [1, 1]} : vector<8x156xf32> to vector<8x152xf32>
    %295 = vector.extract_strided_slice %287 {offsets = [0, 3], sizes = [8, 152], strides = [1, 1]} : vector<8x156xf32> to vector<8x152xf32>
    %296 = vector.extract_strided_slice %287 {offsets = [0, 4], sizes = [8, 152], strides = [1, 1]} : vector<8x156xf32> to vector<8x152xf32>
    %297 = tpu.concatenate %292, %293, %294, %295, %296 in 0 : vector<8x152xf32>, vector<8x152xf32>, vector<8x152xf32>, vector<8x152xf32>, vector<8x152xf32> -> vector<40x152xf32>
    %cst_132 = arith.constant dense<0.000000e+00> : vector<8x152xf32>
    %298 = tpu.matmul %289, %297, %cst_132 {dimension_numbers = #tpu.dot_dimension_numbers<[1], [0], [0], [1], [0, 0, 1, 1], [], []>} : vector<8x40xf32>, vector<40x152xf32>, vector<8x152xf32> -> vector<8x152xf32>
    %299 = vector.broadcast %291 : vector<8x1xf32> to vector<8x152xf32>
    %300 = arith.addf %298, %299 : vector<8x152xf32>
    %c128_i32_133 = arith.constant 128 : i32
    %301 = arith.muli %arg1, %c128_i32_133 : i32
    %c-12_i32 = arith.constant -12 : i32
    %302 = arith.addi %301, %c-12_i32 : i32
    %303 = tpu.iota {dimensions = array<i32: 1>} : vector<8x152xi32>
    %304 = vector.broadcast %302 : i32 to vector<8x152xi32>
    %305 = arith.addi %304, %303 : vector<8x152xi32>
    %c0_i32_134 = arith.constant 0 : i32
    %306 = vector.broadcast %c0_i32_134 : i32 to vector<8x152xi32>
    %307 = arith.cmpi sge, %305, %306 : vector<8x152xi32>
    %c32_i32_135 = arith.constant 32 : i32
    %308 = vector.broadcast %c32_i32_135 : i32 to vector<8x152xi32>
    %309 = arith.cmpi slt, %305, %308 : vector<8x152xi32>
    %310 = arith.andi %307, %309 : vector<8x152xi1>
    %cst_136 = arith.constant 0.000000e+00 : f32
    %311 = vector.broadcast %cst_136 : f32 to vector<8x152xf32>
    %312 = arith.select %310, %300, %311 : vector<8x152xi1>, vector<8x152xf32>
    %313 = vector.extract_strided_slice %252 {offsets = [0, 8], sizes = [8, 152], strides = [1, 1]} : vector<8x168xf32> to vector<8x152xf32>
    %314 = arith.addf %312, %313 : vector<8x152xf32>
    %cst_137 = arith.constant 0.000000e+00 : f32
    %315 = vector.broadcast %cst_137 : f32 to vector<8x152xf32>
    %316 = arith.cmpf oge, %314, %315 : vector<8x152xf32>
    %cst_138 = arith.constant 1.000000e-01 : f32
    %317 = vector.broadcast %cst_138 : f32 to vector<8x152xf32>
    %318 = arith.mulf %317, %314 : vector<8x152xf32>
    %319 = arith.select %316, %314, %318 : vector<8x152xi1>, vector<8x152xf32>
    %c2_139 = arith.constant 2 : index
    %c0_140 = arith.constant 0 : index
    %c0_141 = arith.constant 0 : index
    %320 = vector.load %arg9[%c2_139, %c0_140, %c0_141] : memref<3x8x40xf32, #tpu.memory_space<vmem>>, vector<1x8x40xf32>
    %321 = vector.shape_cast %320 : vector<1x8x40xf32> to vector<8x40xf32>
    %c2_142 = arith.constant 2 : index
    %c0_143 = arith.constant 0 : index
    %c0_144 = arith.constant 0 : index
    %322 = vector.load %arg10[%c2_142, %c0_143, %c0_144] : memref<3x8x1xf32, #tpu.memory_space<vmem>>, vector<1x8x1xf32>
    %323 = vector.shape_cast %322 : vector<1x8x1xf32> to vector<8x1xf32>
    %324 = vector.extract_strided_slice %319 {offsets = [0, 0], sizes = [8, 132], strides = [1, 1]} : vector<8x152xf32> to vector<8x132xf32>
    %325 = vector.extract_strided_slice %319 {offsets = [0, 5], sizes = [8, 132], strides = [1, 1]} : vector<8x152xf32> to vector<8x132xf32>
    %326 = vector.extract_strided_slice %319 {offsets = [0, 10], sizes = [8, 132], strides = [1, 1]} : vector<8x152xf32> to vector<8x132xf32>
    %327 = vector.extract_strided_slice %319 {offsets = [0, 15], sizes = [8, 132], strides = [1, 1]} : vector<8x152xf32> to vector<8x132xf32>
    %328 = vector.extract_strided_slice %319 {offsets = [0, 20], sizes = [8, 132], strides = [1, 1]} : vector<8x152xf32> to vector<8x132xf32>
    %329 = tpu.concatenate %324, %325, %326, %327, %328 in 0 : vector<8x132xf32>, vector<8x132xf32>, vector<8x132xf32>, vector<8x132xf32>, vector<8x132xf32> -> vector<40x132xf32>
    %cst_145 = arith.constant dense<0.000000e+00> : vector<8x132xf32>
    %330 = tpu.matmul %321, %329, %cst_145 {dimension_numbers = #tpu.dot_dimension_numbers<[1], [0], [0], [1], [0, 0, 1, 1], [], []>} : vector<8x40xf32>, vector<40x132xf32>, vector<8x132xf32> -> vector<8x132xf32>
    %331 = vector.broadcast %323 : vector<8x1xf32> to vector<8x132xf32>
    %332 = arith.addf %330, %331 : vector<8x132xf32>
    %c128_i32_146 = arith.constant 128 : i32
    %333 = arith.muli %arg1, %c128_i32_146 : i32
    %c-2_i32 = arith.constant -2 : i32
    %334 = arith.addi %333, %c-2_i32 : i32
    %335 = tpu.iota {dimensions = array<i32: 1>} : vector<8x132xi32>
    %336 = vector.broadcast %334 : i32 to vector<8x132xi32>
    %337 = arith.addi %336, %335 : vector<8x132xi32>
    %c0_i32_147 = arith.constant 0 : i32
    %338 = vector.broadcast %c0_i32_147 : i32 to vector<8x132xi32>
    %339 = arith.cmpi sge, %337, %338 : vector<8x132xi32>
    %c32_i32_148 = arith.constant 32 : i32
    %340 = vector.broadcast %c32_i32_148 : i32 to vector<8x132xi32>
    %341 = arith.cmpi slt, %337, %340 : vector<8x132xi32>
    %342 = arith.andi %339, %341 : vector<8x132xi1>
    %cst_149 = arith.constant 0.000000e+00 : f32
    %343 = vector.broadcast %cst_149 : f32 to vector<8x132xf32>
    %344 = arith.select %342, %332, %343 : vector<8x132xi1>, vector<8x132xf32>
    %cst_150 = arith.constant 0.000000e+00 : f32
    %345 = vector.broadcast %cst_150 : f32 to vector<8x132xf32>
    %346 = arith.cmpf oge, %344, %345 : vector<8x132xf32>
    %cst_151 = arith.constant 1.000000e-01 : f32
    %347 = vector.broadcast %cst_151 : f32 to vector<8x132xf32>
    %348 = arith.mulf %347, %344 : vector<8x132xf32>
    %349 = arith.select %346, %344, %348 : vector<8x132xi1>, vector<8x132xf32>
    %c2_152 = arith.constant 2 : index
    %c0_153 = arith.constant 0 : index
    %c0_154 = arith.constant 0 : index
    %350 = vector.load %arg11[%c2_152, %c0_153, %c0_154] : memref<3x8x40xf32, #tpu.memory_space<vmem>>, vector<1x8x40xf32>
    %351 = vector.shape_cast %350 : vector<1x8x40xf32> to vector<8x40xf32>
    %c2_155 = arith.constant 2 : index
    %c0_156 = arith.constant 0 : index
    %c0_157 = arith.constant 0 : index
    %352 = vector.load %arg12[%c2_155, %c0_156, %c0_157] : memref<3x8x1xf32, #tpu.memory_space<vmem>>, vector<1x8x1xf32>
    %353 = vector.shape_cast %352 : vector<1x8x1xf32> to vector<8x1xf32>
    %354 = vector.extract_strided_slice %349 {offsets = [0, 0], sizes = [8, 128], strides = [1, 1]} : vector<8x132xf32> to vector<8x128xf32>
    %355 = vector.extract_strided_slice %349 {offsets = [0, 1], sizes = [8, 128], strides = [1, 1]} : vector<8x132xf32> to vector<8x128xf32>
    %356 = vector.extract_strided_slice %349 {offsets = [0, 2], sizes = [8, 128], strides = [1, 1]} : vector<8x132xf32> to vector<8x128xf32>
    %357 = vector.extract_strided_slice %349 {offsets = [0, 3], sizes = [8, 128], strides = [1, 1]} : vector<8x132xf32> to vector<8x128xf32>
    %358 = vector.extract_strided_slice %349 {offsets = [0, 4], sizes = [8, 128], strides = [1, 1]} : vector<8x132xf32> to vector<8x128xf32>
    %359 = tpu.concatenate %354, %355, %356, %357, %358 in 0 : vector<8x128xf32>, vector<8x128xf32>, vector<8x128xf32>, vector<8x128xf32>, vector<8x128xf32> -> vector<40x128xf32>
    %cst_158 = arith.constant dense<0.000000e+00> : vector<8x128xf32>
    %360 = tpu.matmul %351, %359, %cst_158 {dimension_numbers = #tpu.dot_dimension_numbers<[1], [0], [0], [1], [0, 0, 1, 1], [], []>} : vector<8x40xf32>, vector<40x128xf32>, vector<8x128xf32> -> vector<8x128xf32>
    %361 = vector.broadcast %353 : vector<8x1xf32> to vector<8x128xf32>
    %362 = arith.addf %360, %361 : vector<8x128xf32>
    %c128_i32_159 = arith.constant 128 : i32
    %363 = arith.muli %arg1, %c128_i32_159 : i32
    %c0_i32_160 = arith.constant 0 : i32
    %364 = arith.addi %363, %c0_i32_160 : i32
    %365 = tpu.iota {dimensions = array<i32: 1>} : vector<8x128xi32>
    %366 = vector.broadcast %364 : i32 to vector<8x128xi32>
    %367 = arith.addi %366, %365 : vector<8x128xi32>
    %c0_i32_161 = arith.constant 0 : i32
    %368 = vector.broadcast %c0_i32_161 : i32 to vector<8x128xi32>
    %369 = arith.cmpi sge, %367, %368 : vector<8x128xi32>
    %c32_i32_162 = arith.constant 32 : i32
    %370 = vector.broadcast %c32_i32_162 : i32 to vector<8x128xi32>
    %371 = arith.cmpi slt, %367, %370 : vector<8x128xi32>
    %372 = arith.andi %369, %371 : vector<8x128xi1>
    %cst_163 = arith.constant 0.000000e+00 : f32
    %373 = vector.broadcast %cst_163 : f32 to vector<8x128xf32>
    %374 = arith.select %372, %362, %373 : vector<8x128xi1>, vector<8x128xf32>
    %375 = vector.extract_strided_slice %314 {offsets = [0, 12], sizes = [8, 128], strides = [1, 1]} : vector<8x152xf32> to vector<8x128xf32>
    %376 = arith.addf %374, %375 : vector<8x128xf32>
    %377 = arith.addf %189, %376 : vector<8x128xf32>
    %cst_164 = arith.constant 5.000000e-01 : f32
    %378 = vector.broadcast %cst_164 : f32 to vector<8x128xf32>
    %379 = arith.mulf %377, %378 : vector<8x128xf32>
    %c128_i32_165 = arith.constant 128 : i32
    %380 = arith.muli %arg1, %c128_i32_165 : i32
    %c0_i32_166 = arith.constant 0 : i32
    %381 = arith.addi %380, %c0_i32_166 : i32
    %382 = tpu.iota {dimensions = array<i32: 1>} : vector<8x128xi32>
    %383 = vector.broadcast %381 : i32 to vector<8x128xi32>
    %384 = arith.addi %383, %382 : vector<8x128xi32>
    %c0_i32_167 = arith.constant 0 : i32
    %385 = vector.broadcast %c0_i32_167 : i32 to vector<8x128xi32>
    %386 = arith.cmpi sge, %384, %385 : vector<8x128xi32>
    %c32_i32_168 = arith.constant 32 : i32
    %387 = vector.broadcast %c32_i32_168 : i32 to vector<8x128xi32>
    %388 = arith.cmpi slt, %384, %387 : vector<8x128xi32>
    %389 = arith.andi %386, %388 : vector<8x128xi1>
    %cst_169 = arith.constant 0.000000e+00 : f32
    %390 = vector.broadcast %cst_169 : f32 to vector<8x128xf32>
    %391 = arith.select %389, %379, %390 : vector<8x128xi1>, vector<8x128xf32>
    %c0_170 = arith.constant 0 : index
    %c0_171 = arith.constant 0 : index
    %c0_172 = arith.constant 0 : index
    %392 = vector.load %arg13[%c0_170, %c0_171, %c0_172] : memref<1x8x128xf32, #tpu.memory_space<vmem>>, vector<1x8x128xf32>
    %393 = vector.shape_cast %392 : vector<1x8x128xf32> to vector<8x128xf32>
    %394 = vector.shape_cast %391 : vector<8x128xf32> to vector<1x8x128xf32>
    tpu.vector_store %arg13[%c0_170, %c0_171, %c0_172], %394 {strides = array<i32>} : memref<1x8x128xf32, #tpu.memory_space<vmem>>, vector<1x8x128xf32>,
    return
  }
  func.func @transform_0(%arg0: i32, %arg1: i32) -> (i32, i32, i32) {
    %c0_i32 = arith.constant 0 : i32
    %c0_i32_0 = arith.constant 0 : i32
    return %arg0, %c0_i32, %arg1 : i32, i32, i32
  }
  func.func @transform_1(%arg0: i32, %arg1: i32) -> (i32, i32, i32) {
    %c1_i32 = arith.constant 1 : i32
    %0 = arith.muli %arg1, %c1_i32 : i32
    %c1_i32_0 = arith.constant 1 : i32
    %1 = arith.subi %0, %c1_i32_0 : i32
    %c0_i32 = arith.constant 0 : i32
    %2 = arith.maxsi %1, %c0_i32 : i32
    %c0_i32_1 = arith.constant 0 : i32
    %c0_i32_2 = arith.constant 0 : i32
    return %arg0, %c0_i32_1, %2 : i32, i32, i32
  }
  func.func @transform_2(%arg0: i32, %arg1: i32) -> (i32, i32, i32) {
    %c1_i32 = arith.constant 1 : i32
    %0 = arith.addi %arg1, %c1_i32 : i32
    %c1_i32_0 = arith.constant 1 : i32
    %1 = arith.muli %0, %c1_i32_0 : i32
    %c1_i32_1 = arith.constant 1 : i32
    %2 = arith.minsi %1, %c1_i32_1 : i32
    %c0_i32 = arith.constant 0 : i32
    %c0_i32_2 = arith.constant 0 : i32
    return %arg0, %c0_i32, %2 : i32, i32, i32
  }
  func.func @transform_3(%arg0: i32, %arg1: i32) -> (i32, i32, i32) {
    %c0_i32 = arith.constant 0 : i32
    %c0_i32_0 = arith.constant 0 : i32
    %c0_i32_1 = arith.constant 0 : i32
    %c0_i32_2 = arith.constant 0 : i32
    return %c0_i32, %c0_i32_0, %c0_i32_1 : i32, i32, i32
  }
  func.func @transform_4(%arg0: i32, %arg1: i32) -> (i32, i32, i32) {
    %c0_i32 = arith.constant 0 : i32
    %c0_i32_0 = arith.constant 0 : i32
    %c0_i32_1 = arith.constant 0 : i32
    %c0_i32_2 = arith.constant 0 : i32
    return %c0_i32, %c0_i32_0, %c0_i32_1 : i32, i32, i32
  }
  func.func @transform_5(%arg0: i32, %arg1: i32) -> (i32, i32, i32) {
    %c0_i32 = arith.constant 0 : i32
    %c0_i32_0 = arith.constant 0 : i32
    %c0_i32_1 = arith.constant 0 : i32
    %c0_i32_2 = arith.constant 0 : i32
    return %c0_i32, %c0_i32_0, %c0_i32_1 : i32, i32, i32
  }
  func.func @transform_6(%arg0: i32, %arg1: i32) -> (i32, i32, i32) {
    %c0_i32 = arith.constant 0 : i32
    %c0_i32_0 = arith.constant 0 : i32
    %c0_i32_1 = arith.constant 0 : i32
    %c0_i32_2 = arith.constant 0 : i32
    return %c0_i32, %c0_i32_0, %c0_i32_1 : i32, i32, i32
  }
  func.func @transform_7(%arg0: i32, %arg1: i32) -> (i32, i32, i32) {
    %c0_i32 = arith.constant 0 : i32
    %c0_i32_0 = arith.constant 0 : i32
    %c0_i32_1 = arith.constant 0 : i32
    %c0_i32_2 = arith.constant 0 : i32
    return %c0_i32, %c0_i32_0, %c0_i32_1 : i32, i32, i32
  }
  func.func @transform_8(%arg0: i32, %arg1: i32) -> (i32, i32, i32) {
    %c0_i32 = arith.constant 0 : i32
    %c0_i32_0 = arith.constant 0 : i32
    %c0_i32_1 = arith.constant 0 : i32
    %c0_i32_2 = arith.constant 0 : i32
    return %c0_i32, %c0_i32_0, %c0_i32_1 : i32, i32, i32
  }
  func.func @transform_9(%arg0: i32, %arg1: i32) -> (i32, i32, i32) {
    %c0_i32 = arith.constant 0 : i32
    %c0_i32_0 = arith.constant 0 : i32
    %c0_i32_1 = arith.constant 0 : i32
    %c0_i32_2 = arith.constant 0 : i32
    return %c0_i32, %c0_i32_0, %c0_i32_1 : i32, i32, i32
  }
  func.func @transform_10(%arg0: i32, %arg1: i32) -> (i32, i32, i32) {
    %c0_i32 = arith.constant 0 : i32
    %c0_i32_0 = arith.constant 0 : i32
    %c0_i32_1 = arith.constant 0 : i32
    %c0_i32_2 = arith.constant 0 : i32
    return %c0_i32, %c0_i32_0, %c0_i32_1 : i32, i32, i32
  }
  func.func @transform_11(%arg0: i32, %arg1: i32) -> (i32, i32, i32) {
    %c0_i32 = arith.constant 0 : i32
    %c0_i32_0 = arith.constant 0 : i32
    return %arg0, %c0_i32, %arg1 : i32, i32, i32
  }
}

module attributes {stable_mosaic.version = 11 : i64} {
  func.func @kernel(%arg0: i32, %arg1: i32, %arg2: memref<1x8x128xf32, #tpu.memory_space<vmem>>, %arg3: memref<1x8x128xf32, #tpu.memory_space<vmem>>, %arg4: memref<1x8x128xf32, #tpu.memory_space<vmem>>, %arg5: memref<3x8x24xf32, #tpu.memory_space<vmem>>, %arg6: memref<3x8x1xf32, #tpu.memory_space<vmem>>, %arg7: memref<3x8x24xf32, #tpu.memory_space<vmem>>, %arg8: memref<3x8x1xf32, #tpu.memory_space<vmem>>, %arg9: memref<3x8x40xf32, #tpu.memory_space<vmem>>, %arg10: memref<3x8x1xf32, #tpu.memory_space<vmem>>, %arg11: memref<3x8x40xf32, #tpu.memory_space<vmem>>, %arg12: memref<3x8x1xf32, #tpu.memory_space<vmem>>, %arg13: memref<8x56xf32, #tpu.memory_space<vmem>>, %arg14: memref<8x1xf32, #tpu.memory_space<vmem>>, %arg15: memref<1x8x128xf32, #tpu.memory_space<vmem>>) attributes {dimension_semantics = [#tpu.dimension_semantics<parallel>, #tpu.dimension_semantics<parallel>], iteration_bounds = array<i64: 2, 4>, scalar_prefetch = 0 : i64, scratch_operands = 0 : i64, tpu.core_type = #tpu.core_type<tc>, window_params = [{transform_indices = @transform_0, window_bounds = array<i64: 1, 8, 128>}, {transform_indices = @transform_1, window_bounds = array<i64: 1, 8, 128>}, {transform_indices = @transform_2, window_bounds = array<i64: 1, 8, 128>}, {pipeline_mode = #tpu.pipeline_mode<synchronous>, transform_indices = @transform_3, window_bounds = array<i64: 3, 8, 24>}, {pipeline_mode = #tpu.pipeline_mode<synchronous>, transform_indices = @transform_4, window_bounds = array<i64: 3, 8, 1>}, {pipeline_mode = #tpu.pipeline_mode<synchronous>, transform_indices = @transform_5, window_bounds = array<i64: 3, 8, 24>}, {pipeline_mode = #tpu.pipeline_mode<synchronous>, transform_indices = @transform_6, window_bounds = array<i64: 3, 8, 1>}, {pipeline_mode = #tpu.pipeline_mode<synchronous>, transform_indices = @transform_7, window_bounds = array<i64: 3, 8, 40>}, {pipeline_mode = #tpu.pipeline_mode<synchronous>, transform_indices = @transform_8, window_bounds = array<i64: 3, 8, 1>}, {pipeline_mode = #tpu.pipeline_mode<synchronous>, transform_indices = @transform_9, window_bounds = array<i64: 3, 8, 40>}, {pipeline_mode = #tpu.pipeline_mode<synchronous>, transform_indices = @transform_10, window_bounds = array<i64: 3, 8, 1>}, {pipeline_mode = #tpu.pipeline_mode<synchronous>, transform_indices = @transform_11, window_bounds = array<i64: 8, 56>}, {pipeline_mode = #tpu.pipeline_mode<synchronous>, transform_indices = @transform_12, window_bounds = array<i64: 8, 1>}, {transform_indices = @transform_13, window_bounds = array<i64: 1, 8, 128>}]} {
    %c0_i32 = arith.constant 0 : i32
    %0 = arith.cmpi sgt, %arg1, %c0_i32 : i32
    %c0 = arith.constant 0 : index
    %c0_0 = arith.constant 0 : index
    %c0_1 = arith.constant 0 : index
    %1 = vector.load %arg3[%c0, %c0_0, %c0_1] : memref<1x8x128xf32, #tpu.memory_space<vmem>>, vector<1x8x128xf32>
    %2 = vector.shape_cast %1 : vector<1x8x128xf32> to vector<8x128xf32>
    %cst = arith.constant 0.000000e+00 : f32
    %3 = vector.broadcast %cst : f32 to vector<8x128xf32>
    %4 = arith.select %0, %2, %3 : vector<8x128xf32>
    %c3_i32 = arith.constant 3 : i32
    %5 = arith.cmpi slt, %arg1, %c3_i32 : i32
    %c0_2 = arith.constant 0 : index
    %c0_3 = arith.constant 0 : index
    %c0_4 = arith.constant 0 : index
    %6 = vector.load %arg4[%c0_2, %c0_3, %c0_4] : memref<1x8x128xf32, #tpu.memory_space<vmem>>, vector<1x8x128xf32>
    %7 = vector.shape_cast %6 : vector<1x8x128xf32> to vector<8x128xf32>
    %cst_5 = arith.constant 0.000000e+00 : f32
    %8 = vector.broadcast %cst_5 : f32 to vector<8x128xf32>
    %9 = arith.select %5, %7, %8 : vector<8x128xf32>
    %c0_6 = arith.constant 0 : index
    %c0_7 = arith.constant 0 : index
    %c0_8 = arith.constant 0 : index
    %10 = vector.load %arg2[%c0_6, %c0_7, %c0_8] : memref<1x8x128xf32, #tpu.memory_space<vmem>>, vector<1x8x128xf32>
    %11 = vector.shape_cast %10 : vector<1x8x128xf32> to vector<8x128xf32>
    %12 = tpu.concatenate %4, %11, %9 in 1 : vector<8x128xf32>, vector<8x128xf32>, vector<8x128xf32> -> vector<8x384xf32>
    %cst_9 = arith.constant 0.000000e+00 : f32
    %13 = vector.broadcast %cst_9 : f32 to vector<8x134xf32>
    %14 = vector.extract_strided_slice %12 {offsets = [0, 113], sizes = [8, 158], strides = [1, 1]} : vector<8x384xf32> to vector<8x158xf32>
    %cst_10 = arith.constant 0.000000e+00 : f32
    %15 = vector.broadcast %cst_10 : f32 to vector<8x158xf32>
    %16 = arith.cmpf oge, %14, %15 : vector<8x158xf32>
    %cst_11 = arith.constant 1.000000e-01 : f32
    %17 = vector.broadcast %cst_11 : f32 to vector<8x158xf32>
    %18 = arith.mulf %17, %14 : vector<8x158xf32>
    %19 = arith.select %16, %14, %18 : vector<8x158xi1>, vector<8x158xf32>
    %c0_12 = arith.constant 0 : index
    %c0_13 = arith.constant 0 : index
    %c0_14 = arith.constant 0 : index
    %20 = vector.load %arg5[%c0_12, %c0_13, %c0_14] : memref<3x8x24xf32, #tpu.memory_space<vmem>>, vector<1x8x24xf32>
    %21 = vector.shape_cast %20 : vector<1x8x24xf32> to vector<8x24xf32>
    %c0_15 = arith.constant 0 : index
    %c0_16 = arith.constant 0 : index
    %c0_17 = arith.constant 0 : index
    %22 = vector.load %arg6[%c0_15, %c0_16, %c0_17] : memref<3x8x1xf32, #tpu.memory_space<vmem>>, vector<1x8x1xf32>
    %23 = vector.shape_cast %22 : vector<1x8x1xf32> to vector<8x1xf32>
    %24 = vector.extract_strided_slice %19 {offsets = [0, 0], sizes = [8, 156], strides = [1, 1]} : vector<8x158xf32> to vector<8x156xf32>
    %25 = vector.extract_strided_slice %19 {offsets = [0, 1], sizes = [8, 156], strides = [1, 1]} : vector<8x158xf32> to vector<8x156xf32>
    %26 = vector.extract_strided_slice %19 {offsets = [0, 2], sizes = [8, 156], strides = [1, 1]} : vector<8x158xf32> to vector<8x156xf32>
    %27 = tpu.concatenate %24, %25, %26 in 0 : vector<8x156xf32>, vector<8x156xf32>, vector<8x156xf32> -> vector<24x156xf32>
    %cst_18 = arith.constant dense<0.000000e+00> : vector<8x156xf32>
    %28 = tpu.matmul %21, %27, %cst_18 {dimension_numbers = #tpu.dot_dimension_numbers<[1], [0], [0], [1], [0, 0, 1, 1], [], []>} : vector<8x24xf32>, vector<24x156xf32>, vector<8x156xf32> -> vector<8x156xf32>
    %29 = vector.broadcast %23 : vector<8x1xf32> to vector<8x156xf32>
    %30 = arith.addf %28, %29 : vector<8x156xf32>
    %c128_i32 = arith.constant 128 : i32
    %31 = arith.muli %arg1, %c128_i32 : i32
    %c-14_i32 = arith.constant -14 : i32
    %32 = arith.addi %31, %c-14_i32 : i32
    %33 = tpu.iota {dimensions = array<i32: 1>} : vector<8x156xi32>
    %34 = vector.broadcast %32 : i32 to vector<8x156xi32>
    %35 = arith.addi %34, %33 : vector<8x156xi32>
    %c0_i32_19 = arith.constant 0 : i32
    %36 = vector.broadcast %c0_i32_19 : i32 to vector<8x156xi32>
    %37 = arith.cmpi sge, %35, %36 : vector<8x156xi32>
    %c64_i32 = arith.constant 64 : i32
    %38 = vector.broadcast %c64_i32 : i32 to vector<8x156xi32>
    %39 = arith.cmpi slt, %35, %38 : vector<8x156xi32>
    %40 = arith.andi %37, %39 : vector<8x156xi1>
    %cst_20 = arith.constant 0.000000e+00 : f32
    %41 = vector.broadcast %cst_20 : f32 to vector<8x156xf32>
    %42 = arith.select %40, %30, %41 : vector<8x156xi1>, vector<8x156xf32>
    %cst_21 = arith.constant 0.000000e+00 : f32
    %43 = vector.broadcast %cst_21 : f32 to vector<8x156xf32>
    %44 = arith.cmpf oge, %42, %43 : vector<8x156xf32>
    %cst_22 = arith.constant 1.000000e-01 : f32
    %45 = vector.broadcast %cst_22 : f32 to vector<8x156xf32>
    %46 = arith.mulf %45, %42 : vector<8x156xf32>
    %47 = arith.select %44, %42, %46 : vector<8x156xi1>, vector<8x156xf32>
    %c0_23 = arith.constant 0 : index
    %c0_24 = arith.constant 0 : index
    %c0_25 = arith.constant 0 : index
    %48 = vector.load %arg7[%c0_23, %c0_24, %c0_25] : memref<3x8x24xf32, #tpu.memory_space<vmem>>, vector<1x8x24xf32>
    %49 = vector.shape_cast %48 : vector<1x8x24xf32> to vector<8x24xf32>
    %c0_26 = arith.constant 0 : index
    %c0_27 = arith.constant 0 : index
    %c0_28 = arith.constant 0 : index
    %50 = vector.load %arg8[%c0_26, %c0_27, %c0_28] : memref<3x8x1xf32, #tpu.memory_space<vmem>>, vector<1x8x1xf32>
    %51 = vector.shape_cast %50 : vector<1x8x1xf32> to vector<8x1xf32>
    %52 = vector.extract_strided_slice %47 {offsets = [0, 0], sizes = [8, 154], strides = [1, 1]} : vector<8x156xf32> to vector<8x154xf32>
    %53 = vector.extract_strided_slice %47 {offsets = [0, 1], sizes = [8, 154], strides = [1, 1]} : vector<8x156xf32> to vector<8x154xf32>
    %54 = vector.extract_strided_slice %47 {offsets = [0, 2], sizes = [8, 154], strides = [1, 1]} : vector<8x156xf32> to vector<8x154xf32>
    %55 = tpu.concatenate %52, %53, %54 in 0 : vector<8x154xf32>, vector<8x154xf32>, vector<8x154xf32> -> vector<24x154xf32>
    %cst_29 = arith.constant dense<0.000000e+00> : vector<8x154xf32>
    %56 = tpu.matmul %49, %55, %cst_29 {dimension_numbers = #tpu.dot_dimension_numbers<[1], [0], [0], [1], [0, 0, 1, 1], [], []>} : vector<8x24xf32>, vector<24x154xf32>, vector<8x154xf32> -> vector<8x154xf32>
    %57 = vector.broadcast %51 : vector<8x1xf32> to vector<8x154xf32>
    %58 = arith.addf %56, %57 : vector<8x154xf32>
    %c128_i32_30 = arith.constant 128 : i32
    %59 = arith.muli %arg1, %c128_i32_30 : i32
    %c-13_i32 = arith.constant -13 : i32
    %60 = arith.addi %59, %c-13_i32 : i32
    %61 = tpu.iota {dimensions = array<i32: 1>} : vector<8x154xi32>
    %62 = vector.broadcast %60 : i32 to vector<8x154xi32>
    %63 = arith.addi %62, %61 : vector<8x154xi32>
    %c0_i32_31 = arith.constant 0 : i32
    %64 = vector.broadcast %c0_i32_31 : i32 to vector<8x154xi32>
    %65 = arith.cmpi sge, %63, %64 : vector<8x154xi32>
    %c64_i32_32 = arith.constant 64 : i32
    %66 = vector.broadcast %c64_i32_32 : i32 to vector<8x154xi32>
    %67 = arith.cmpi slt, %63, %66 : vector<8x154xi32>
    %68 = arith.andi %65, %67 : vector<8x154xi1>
    %cst_33 = arith.constant 0.000000e+00 : f32
    %69 = vector.broadcast %cst_33 : f32 to vector<8x154xf32>
    %70 = arith.select %68, %58, %69 : vector<8x154xi1>, vector<8x154xf32>
    %71 = vector.extract_strided_slice %14 {offsets = [0, 2], sizes = [8, 154], strides = [1, 1]} : vector<8x158xf32> to vector<8x154xf32>
    %72 = arith.addf %70, %71 : vector<8x154xf32>
    %cst_34 = arith.constant 0.000000e+00 : f32
    %73 = vector.broadcast %cst_34 : f32 to vector<8x154xf32>
    %74 = arith.cmpf oge, %72, %73 : vector<8x154xf32>
    %cst_35 = arith.constant 1.000000e-01 : f32
    %75 = vector.broadcast %cst_35 : f32 to vector<8x154xf32>
    %76 = arith.mulf %75, %72 : vector<8x154xf32>
    %77 = arith.select %74, %72, %76 : vector<8x154xi1>, vector<8x154xf32>
    %c1 = arith.constant 1 : index
    %c0_36 = arith.constant 0 : index
    %c0_37 = arith.constant 0 : index
    %78 = vector.load %arg5[%c1, %c0_36, %c0_37] : memref<3x8x24xf32, #tpu.memory_space<vmem>>, vector<1x8x24xf32>
    %79 = vector.shape_cast %78 : vector<1x8x24xf32> to vector<8x24xf32>
    %c1_38 = arith.constant 1 : index
    %c0_39 = arith.constant 0 : index
    %c0_40 = arith.constant 0 : index
    %80 = vector.load %arg6[%c1_38, %c0_39, %c0_40] : memref<3x8x1xf32, #tpu.memory_space<vmem>>, vector<1x8x1xf32>
    %81 = vector.shape_cast %80 : vector<1x8x1xf32> to vector<8x1xf32>
    %82 = vector.extract_strided_slice %77 {offsets = [0, 0], sizes = [8, 148], strides = [1, 1]} : vector<8x154xf32> to vector<8x148xf32>
    %83 = vector.extract_strided_slice %77 {offsets = [0, 3], sizes = [8, 148], strides = [1, 1]} : vector<8x154xf32> to vector<8x148xf32>
    %84 = vector.extract_strided_slice %77 {offsets = [0, 6], sizes = [8, 148], strides = [1, 1]} : vector<8x154xf32> to vector<8x148xf32>
    %85 = tpu.concatenate %82, %83, %84 in 0 : vector<8x148xf32>, vector<8x148xf32>, vector<8x148xf32> -> vector<24x148xf32>
    %cst_41 = arith.constant dense<0.000000e+00> : vector<8x148xf32>
    %86 = tpu.matmul %79, %85, %cst_41 {dimension_numbers = #tpu.dot_dimension_numbers<[1], [0], [0], [1], [0, 0, 1, 1], [], []>} : vector<8x24xf32>, vector<24x148xf32>, vector<8x148xf32> -> vector<8x148xf32>
    %87 = vector.broadcast %81 : vector<8x1xf32> to vector<8x148xf32>
    %88 = arith.addf %86, %87 : vector<8x148xf32>
    %c128_i32_42 = arith.constant 128 : i32
    %89 = arith.muli %arg1, %c128_i32_42 : i32
    %c-10_i32 = arith.constant -10 : i32
    %90 = arith.addi %89, %c-10_i32 : i32
    %91 = tpu.iota {dimensions = array<i32: 1>} : vector<8x148xi32>
    %92 = vector.broadcast %90 : i32 to vector<8x148xi32>
    %93 = arith.addi %92, %91 : vector<8x148xi32>
    %c0_i32_43 = arith.constant 0 : i32
    %94 = vector.broadcast %c0_i32_43 : i32 to vector<8x148xi32>
    %95 = arith.cmpi sge, %93, %94 : vector<8x148xi32>
    %c64_i32_44 = arith.constant 64 : i32
    %96 = vector.broadcast %c64_i32_44 : i32 to vector<8x148xi32>
    %97 = arith.cmpi slt, %93, %96 : vector<8x148xi32>
    %98 = arith.andi %95, %97 : vector<8x148xi1>
    %cst_45 = arith.constant 0.000000e+00 : f32
    %99 = vector.broadcast %cst_45 : f32 to vector<8x148xf32>
    %100 = arith.select %98, %88, %99 : vector<8x148xi1>, vector<8x148xf32>
    %cst_46 = arith.constant 0.000000e+00 : f32
    %101 = vector.broadcast %cst_46 : f32 to vector<8x148xf32>
    %102 = arith.cmpf oge, %100, %101 : vector<8x148xf32>
    %cst_47 = arith.constant 1.000000e-01 : f32
    %103 = vector.broadcast %cst_47 : f32 to vector<8x148xf32>
    %104 = arith.mulf %103, %100 : vector<8x148xf32>
    %105 = arith.select %102, %100, %104 : vector<8x148xi1>, vector<8x148xf32>
    %c1_48 = arith.constant 1 : index
    %c0_49 = arith.constant 0 : index
    %c0_50 = arith.constant 0 : index
    %106 = vector.load %arg7[%c1_48, %c0_49, %c0_50] : memref<3x8x24xf32, #tpu.memory_space<vmem>>, vector<1x8x24xf32>
    %107 = vector.shape_cast %106 : vector<1x8x24xf32> to vector<8x24xf32>
    %c1_51 = arith.constant 1 : index
    %c0_52 = arith.constant 0 : index
    %c0_53 = arith.constant 0 : index
    %108 = vector.load %arg8[%c1_51, %c0_52, %c0_53] : memref<3x8x1xf32, #tpu.memory_space<vmem>>, vector<1x8x1xf32>
    %109 = vector.shape_cast %108 : vector<1x8x1xf32> to vector<8x1xf32>
    %110 = vector.extract_strided_slice %105 {offsets = [0, 0], sizes = [8, 146], strides = [1, 1]} : vector<8x148xf32> to vector<8x146xf32>
    %111 = vector.extract_strided_slice %105 {offsets = [0, 1], sizes = [8, 146], strides = [1, 1]} : vector<8x148xf32> to vector<8x146xf32>
    %112 = vector.extract_strided_slice %105 {offsets = [0, 2], sizes = [8, 146], strides = [1, 1]} : vector<8x148xf32> to vector<8x146xf32>
    %113 = tpu.concatenate %110, %111, %112 in 0 : vector<8x146xf32>, vector<8x146xf32>, vector<8x146xf32> -> vector<24x146xf32>
    %cst_54 = arith.constant dense<0.000000e+00> : vector<8x146xf32>
    %114 = tpu.matmul %107, %113, %cst_54 {dimension_numbers = #tpu.dot_dimension_numbers<[1], [0], [0], [1], [0, 0, 1, 1], [], []>} : vector<8x24xf32>, vector<24x146xf32>, vector<8x146xf32> -> vector<8x146xf32>
    %115 = vector.broadcast %109 : vector<8x1xf32> to vector<8x146xf32>
    %116 = arith.addf %114, %115 : vector<8x146xf32>
    %c128_i32_55 = arith.constant 128 : i32
    %117 = arith.muli %arg1, %c128_i32_55 : i32
    %c-9_i32 = arith.constant -9 : i32
    %118 = arith.addi %117, %c-9_i32 : i32
    %119 = tpu.iota {dimensions = array<i32: 1>} : vector<8x146xi32>
    %120 = vector.broadcast %118 : i32 to vector<8x146xi32>
    %121 = arith.addi %120, %119 : vector<8x146xi32>
    %c0_i32_56 = arith.constant 0 : i32
    %122 = vector.broadcast %c0_i32_56 : i32 to vector<8x146xi32>
    %123 = arith.cmpi sge, %121, %122 : vector<8x146xi32>
    %c64_i32_57 = arith.constant 64 : i32
    %124 = vector.broadcast %c64_i32_57 : i32 to vector<8x146xi32>
    %125 = arith.cmpi slt, %121, %124 : vector<8x146xi32>
    %126 = arith.andi %123, %125 : vector<8x146xi1>
    %cst_58 = arith.constant 0.000000e+00 : f32
    %127 = vector.broadcast %cst_58 : f32 to vector<8x146xf32>
    %128 = arith.select %126, %116, %127 : vector<8x146xi1>, vector<8x146xf32>
    %129 = vector.extract_strided_slice %72 {offsets = [0, 4], sizes = [8, 146], strides = [1, 1]} : vector<8x154xf32> to vector<8x146xf32>
    %130 = arith.addf %128, %129 : vector<8x146xf32>
    %cst_59 = arith.constant 0.000000e+00 : f32
    %131 = vector.broadcast %cst_59 : f32 to vector<8x146xf32>
    %132 = arith.cmpf oge, %130, %131 : vector<8x146xf32>
    %cst_60 = arith.constant 1.000000e-01 : f32
    %133 = vector.broadcast %cst_60 : f32 to vector<8x146xf32>
    %134 = arith.mulf %133, %130 : vector<8x146xf32>
    %135 = arith.select %132, %130, %134 : vector<8x146xi1>, vector<8x146xf32>
    %c2 = arith.constant 2 : index
    %c0_61 = arith.constant 0 : index
    %c0_62 = arith.constant 0 : index
    %136 = vector.load %arg5[%c2, %c0_61, %c0_62] : memref<3x8x24xf32, #tpu.memory_space<vmem>>, vector<1x8x24xf32>
    %137 = vector.shape_cast %136 : vector<1x8x24xf32> to vector<8x24xf32>
    %c2_63 = arith.constant 2 : index
    %c0_64 = arith.constant 0 : index
    %c0_65 = arith.constant 0 : index
    %138 = vector.load %arg6[%c2_63, %c0_64, %c0_65] : memref<3x8x1xf32, #tpu.memory_space<vmem>>, vector<1x8x1xf32>
    %139 = vector.shape_cast %138 : vector<1x8x1xf32> to vector<8x1xf32>
    %140 = vector.extract_strided_slice %135 {offsets = [0, 0], sizes = [8, 136], strides = [1, 1]} : vector<8x146xf32> to vector<8x136xf32>
    %141 = vector.extract_strided_slice %135 {offsets = [0, 5], sizes = [8, 136], strides = [1, 1]} : vector<8x146xf32> to vector<8x136xf32>
    %142 = vector.extract_strided_slice %135 {offsets = [0, 10], sizes = [8, 136], strides = [1, 1]} : vector<8x146xf32> to vector<8x136xf32>
    %143 = tpu.concatenate %140, %141, %142 in 0 : vector<8x136xf32>, vector<8x136xf32>, vector<8x136xf32> -> vector<24x136xf32>
    %cst_66 = arith.constant dense<0.000000e+00> : vector<8x136xf32>
    %144 = tpu.matmul %137, %143, %cst_66 {dimension_numbers = #tpu.dot_dimension_numbers<[1], [0], [0], [1], [0, 0, 1, 1], [], []>} : vector<8x24xf32>, vector<24x136xf32>, vector<8x136xf32> -> vector<8x136xf32>
    %145 = vector.broadcast %139 : vector<8x1xf32> to vector<8x136xf32>
    %146 = arith.addf %144, %145 : vector<8x136xf32>
    %c128_i32_67 = arith.constant 128 : i32
    %147 = arith.muli %arg1, %c128_i32_67 : i32
    %c-4_i32 = arith.constant -4 : i32
    %148 = arith.addi %147, %c-4_i32 : i32
    %149 = tpu.iota {dimensions = array<i32: 1>} : vector<8x136xi32>
    %150 = vector.broadcast %148 : i32 to vector<8x136xi32>
    %151 = arith.addi %150, %149 : vector<8x136xi32>
    %c0_i32_68 = arith.constant 0 : i32
    %152 = vector.broadcast %c0_i32_68 : i32 to vector<8x136xi32>
    %153 = arith.cmpi sge, %151, %152 : vector<8x136xi32>
    %c64_i32_69 = arith.constant 64 : i32
    %154 = vector.broadcast %c64_i32_69 : i32 to vector<8x136xi32>
    %155 = arith.cmpi slt, %151, %154 : vector<8x136xi32>
    %156 = arith.andi %153, %155 : vector<8x136xi1>
    %cst_70 = arith.constant 0.000000e+00 : f32
    %157 = vector.broadcast %cst_70 : f32 to vector<8x136xf32>
    %158 = arith.select %156, %146, %157 : vector<8x136xi1>, vector<8x136xf32>
    %cst_71 = arith.constant 0.000000e+00 : f32
    %159 = vector.broadcast %cst_71 : f32 to vector<8x136xf32>
    %160 = arith.cmpf oge, %158, %159 : vector<8x136xf32>
    %cst_72 = arith.constant 1.000000e-01 : f32
    %161 = vector.broadcast %cst_72 : f32 to vector<8x136xf32>
    %162 = arith.mulf %161, %158 : vector<8x136xf32>
    %163 = arith.select %160, %158, %162 : vector<8x136xi1>, vector<8x136xf32>
    %c2_73 = arith.constant 2 : index
    %c0_74 = arith.constant 0 : index
    %c0_75 = arith.constant 0 : index
    %164 = vector.load %arg7[%c2_73, %c0_74, %c0_75] : memref<3x8x24xf32, #tpu.memory_space<vmem>>, vector<1x8x24xf32>
    %165 = vector.shape_cast %164 : vector<1x8x24xf32> to vector<8x24xf32>
    %c2_76 = arith.constant 2 : index
    %c0_77 = arith.constant 0 : index
    %c0_78 = arith.constant 0 : index
    %166 = vector.load %arg8[%c2_76, %c0_77, %c0_78] : memref<3x8x1xf32, #tpu.memory_space<vmem>>, vector<1x8x1xf32>
    %167 = vector.shape_cast %166 : vector<1x8x1xf32> to vector<8x1xf32>
    %168 = vector.extract_strided_slice %163 {offsets = [0, 0], sizes = [8, 134], strides = [1, 1]} : vector<8x136xf32> to vector<8x134xf32>
    %169 = vector.extract_strided_slice %163 {offsets = [0, 1], sizes = [8, 134], strides = [1, 1]} : vector<8x136xf32> to vector<8x134xf32>
    %170 = vector.extract_strided_slice %163 {offsets = [0, 2], sizes = [8, 134], strides = [1, 1]} : vector<8x136xf32> to vector<8x134xf32>
    %171 = tpu.concatenate %168, %169, %170 in 0 : vector<8x134xf32>, vector<8x134xf32>, vector<8x134xf32> -> vector<24x134xf32>
    %cst_79 = arith.constant dense<0.000000e+00> : vector<8x134xf32>
    %172 = tpu.matmul %165, %171, %cst_79 {dimension_numbers = #tpu.dot_dimension_numbers<[1], [0], [0], [1], [0, 0, 1, 1], [], []>} : vector<8x24xf32>, vector<24x134xf32>, vector<8x134xf32> -> vector<8x134xf32>
    %173 = vector.broadcast %167 : vector<8x1xf32> to vector<8x134xf32>
    %174 = arith.addf %172, %173 : vector<8x134xf32>
    %c128_i32_80 = arith.constant 128 : i32
    %175 = arith.muli %arg1, %c128_i32_80 : i32
    %c-3_i32 = arith.constant -3 : i32
    %176 = arith.addi %175, %c-3_i32 : i32
    %177 = tpu.iota {dimensions = array<i32: 1>} : vector<8x134xi32>
    %178 = vector.broadcast %176 : i32 to vector<8x134xi32>
    %179 = arith.addi %178, %177 : vector<8x134xi32>
    %c0_i32_81 = arith.constant 0 : i32
    %180 = vector.broadcast %c0_i32_81 : i32 to vector<8x134xi32>
    %181 = arith.cmpi sge, %179, %180 : vector<8x134xi32>
    %c64_i32_82 = arith.constant 64 : i32
    %182 = vector.broadcast %c64_i32_82 : i32 to vector<8x134xi32>
    %183 = arith.cmpi slt, %179, %182 : vector<8x134xi32>
    %184 = arith.andi %181, %183 : vector<8x134xi1>
    %cst_83 = arith.constant 0.000000e+00 : f32
    %185 = vector.broadcast %cst_83 : f32 to vector<8x134xf32>
    %186 = arith.select %184, %174, %185 : vector<8x134xi1>, vector<8x134xf32>
    %187 = vector.extract_strided_slice %130 {offsets = [0, 6], sizes = [8, 134], strides = [1, 1]} : vector<8x146xf32> to vector<8x134xf32>
    %188 = arith.addf %186, %187 : vector<8x134xf32>
    %189 = arith.addf %13, %188 : vector<8x134xf32>
    %190 = vector.extract_strided_slice %12 {offsets = [0, 101], sizes = [8, 182], strides = [1, 1]} : vector<8x384xf32> to vector<8x182xf32>
    %cst_84 = arith.constant 0.000000e+00 : f32
    %191 = vector.broadcast %cst_84 : f32 to vector<8x182xf32>
    %192 = arith.cmpf oge, %190, %191 : vector<8x182xf32>
    %cst_85 = arith.constant 1.000000e-01 : f32
    %193 = vector.broadcast %cst_85 : f32 to vector<8x182xf32>
    %194 = arith.mulf %193, %190 : vector<8x182xf32>
    %195 = arith.select %192, %190, %194 : vector<8x182xi1>, vector<8x182xf32>
    %c0_86 = arith.constant 0 : index
    %c0_87 = arith.constant 0 : index
    %c0_88 = arith.constant 0 : index
    %196 = vector.load %arg9[%c0_86, %c0_87, %c0_88] : memref<3x8x40xf32, #tpu.memory_space<vmem>>, vector<1x8x40xf32>
    %197 = vector.shape_cast %196 : vector<1x8x40xf32> to vector<8x40xf32>
    %c0_89 = arith.constant 0 : index
    %c0_90 = arith.constant 0 : index
    %c0_91 = arith.constant 0 : index
    %198 = vector.load %arg10[%c0_89, %c0_90, %c0_91] : memref<3x8x1xf32, #tpu.memory_space<vmem>>, vector<1x8x1xf32>
    %199 = vector.shape_cast %198 : vector<1x8x1xf32> to vector<8x1xf32>
    %200 = vector.extract_strided_slice %195 {offsets = [0, 0], sizes = [8, 178], strides = [1, 1]} : vector<8x182xf32> to vector<8x178xf32>
    %201 = vector.extract_strided_slice %195 {offsets = [0, 1], sizes = [8, 178], strides = [1, 1]} : vector<8x182xf32> to vector<8x178xf32>
    %202 = vector.extract_strided_slice %195 {offsets = [0, 2], sizes = [8, 178], strides = [1, 1]} : vector<8x182xf32> to vector<8x178xf32>
    %203 = vector.extract_strided_slice %195 {offsets = [0, 3], sizes = [8, 178], strides = [1, 1]} : vector<8x182xf32> to vector<8x178xf32>
    %204 = vector.extract_strided_slice %195 {offsets = [0, 4], sizes = [8, 178], strides = [1, 1]} : vector<8x182xf32> to vector<8x178xf32>
    %205 = tpu.concatenate %200, %201, %202, %203, %204 in 0 : vector<8x178xf32>, vector<8x178xf32>, vector<8x178xf32>, vector<8x178xf32>, vector<8x178xf32> -> vector<40x178xf32>
    %cst_92 = arith.constant dense<0.000000e+00> : vector<8x178xf32>
    %206 = tpu.matmul %197, %205, %cst_92 {dimension_numbers = #tpu.dot_dimension_numbers<[1], [0], [0], [1], [0, 0, 1, 1], [], []>} : vector<8x40xf32>, vector<40x178xf32>, vector<8x178xf32> -> vector<8x178xf32>
    %207 = vector.broadcast %199 : vector<8x1xf32> to vector<8x178xf32>
    %208 = arith.addf %206, %207 : vector<8x178xf32>
    %c128_i32_93 = arith.constant 128 : i32
    %209 = arith.muli %arg1, %c128_i32_93 : i32
    %c-25_i32 = arith.constant -25 : i32
    %210 = arith.addi %209, %c-25_i32 : i32
    %211 = tpu.iota {dimensions = array<i32: 1>} : vector<8x178xi32>
    %212 = vector.broadcast %210 : i32 to vector<8x178xi32>
    %213 = arith.addi %212, %211 : vector<8x178xi32>
    %c0_i32_94 = arith.constant 0 : i32
    %214 = vector.broadcast %c0_i32_94 : i32 to vector<8x178xi32>
    %215 = arith.cmpi sge, %213, %214 : vector<8x178xi32>
    %c64_i32_95 = arith.constant 64 : i32
    %216 = vector.broadcast %c64_i32_95 : i32 to vector<8x178xi32>
    %217 = arith.cmpi slt, %213, %216 : vector<8x178xi32>
    %218 = arith.andi %215, %217 : vector<8x178xi1>
    %cst_96 = arith.constant 0.000000e+00 : f32
    %219 = vector.broadcast %cst_96 : f32 to vector<8x178xf32>
    %220 = arith.select %218, %208, %219 : vector<8x178xi1>, vector<8x178xf32>
    %cst_97 = arith.constant 0.000000e+00 : f32
    %221 = vector.broadcast %cst_97 : f32 to vector<8x178xf32>
    %222 = arith.cmpf oge, %220, %221 : vector<8x178xf32>
    %cst_98 = arith.constant 1.000000e-01 : f32
    %223 = vector.broadcast %cst_98 : f32 to vector<8x178xf32>
    %224 = arith.mulf %223, %220 : vector<8x178xf32>
    %225 = arith.select %222, %220, %224 : vector<8x178xi1>, vector<8x178xf32>
    %c0_99 = arith.constant 0 : index
    %c0_100 = arith.constant 0 : index
    %c0_101 = arith.constant 0 : index
    %226 = vector.load %arg11[%c0_99, %c0_100, %c0_101] : memref<3x8x40xf32, #tpu.memory_space<vmem>>, vector<1x8x40xf32>
    %227 = vector.shape_cast %226 : vector<1x8x40xf32> to vector<8x40xf32>
    %c0_102 = arith.constant 0 : index
    %c0_103 = arith.constant 0 : index
    %c0_104 = arith.constant 0 : index
    %228 = vector.load %arg12[%c0_102, %c0_103, %c0_104] : memref<3x8x1xf32, #tpu.memory_space<vmem>>, vector<1x8x1xf32>
    %229 = vector.shape_cast %228 : vector<1x8x1xf32> to vector<8x1xf32>
    %230 = vector.extract_strided_slice %225 {offsets = [0, 0], sizes = [8, 174], strides = [1, 1]} : vector<8x178xf32> to vector<8x174xf32>
    %231 = vector.extract_strided_slice %225 {offsets = [0, 1], sizes = [8, 174], strides = [1, 1]} : vector<8x178xf32> to vector<8x174xf32>
    %232 = vector.extract_strided_slice %225 {offsets = [0, 2], sizes = [8, 174], strides = [1, 1]} : vector<8x178xf32> to vector<8x174xf32>
    %233 = vector.extract_strided_slice %225 {offsets = [0, 3], sizes = [8, 174], strides = [1, 1]} : vector<8x178xf32> to vector<8x174xf32>
    %234 = vector.extract_strided_slice %225 {offsets = [0, 4], sizes = [8, 174], strides = [1, 1]} : vector<8x178xf32> to vector<8x174xf32>
    %235 = tpu.concatenate %230, %231, %232, %233, %234 in 0 : vector<8x174xf32>, vector<8x174xf32>, vector<8x174xf32>, vector<8x174xf32>, vector<8x174xf32> -> vector<40x174xf32>
    %cst_105 = arith.constant dense<0.000000e+00> : vector<8x174xf32>
    %236 = tpu.matmul %227, %235, %cst_105 {dimension_numbers = #tpu.dot_dimension_numbers<[1], [0], [0], [1], [0, 0, 1, 1], [], []>} : vector<8x40xf32>, vector<40x174xf32>, vector<8x174xf32> -> vector<8x174xf32>
    %237 = vector.broadcast %229 : vector<8x1xf32> to vector<8x174xf32>
    %238 = arith.addf %236, %237 : vector<8x174xf32>
    %c128_i32_106 = arith.constant 128 : i32
    %239 = arith.muli %arg1, %c128_i32_106 : i32
    %c-23_i32 = arith.constant -23 : i32
    %240 = arith.addi %239, %c-23_i32 : i32
    %241 = tpu.iota {dimensions = array<i32: 1>} : vector<8x174xi32>
    %242 = vector.broadcast %240 : i32 to vector<8x174xi32>
    %243 = arith.addi %242, %241 : vector<8x174xi32>
    %c0_i32_107 = arith.constant 0 : i32
    %244 = vector.broadcast %c0_i32_107 : i32 to vector<8x174xi32>
    %245 = arith.cmpi sge, %243, %244 : vector<8x174xi32>
    %c64_i32_108 = arith.constant 64 : i32
    %246 = vector.broadcast %c64_i32_108 : i32 to vector<8x174xi32>
    %247 = arith.cmpi slt, %243, %246 : vector<8x174xi32>
    %248 = arith.andi %245, %247 : vector<8x174xi1>
    %cst_109 = arith.constant 0.000000e+00 : f32
    %249 = vector.broadcast %cst_109 : f32 to vector<8x174xf32>
    %250 = arith.select %248, %238, %249 : vector<8x174xi1>, vector<8x174xf32>
    %251 = vector.extract_strided_slice %190 {offsets = [0, 4], sizes = [8, 174], strides = [1, 1]} : vector<8x182xf32> to vector<8x174xf32>
    %252 = arith.addf %250, %251 : vector<8x174xf32>
    %cst_110 = arith.constant 0.000000e+00 : f32
    %253 = vector.broadcast %cst_110 : f32 to vector<8x174xf32>
    %254 = arith.cmpf oge, %252, %253 : vector<8x174xf32>
    %cst_111 = arith.constant 1.000000e-01 : f32
    %255 = vector.broadcast %cst_111 : f32 to vector<8x174xf32>
    %256 = arith.mulf %255, %252 : vector<8x174xf32>
    %257 = arith.select %254, %252, %256 : vector<8x174xi1>, vector<8x174xf32>
    %c1_112 = arith.constant 1 : index
    %c0_113 = arith.constant 0 : index
    %c0_114 = arith.constant 0 : index
    %258 = vector.load %arg9[%c1_112, %c0_113, %c0_114] : memref<3x8x40xf32, #tpu.memory_space<vmem>>, vector<1x8x40xf32>
    %259 = vector.shape_cast %258 : vector<1x8x40xf32> to vector<8x40xf32>
    %c1_115 = arith.constant 1 : index
    %c0_116 = arith.constant 0 : index
    %c0_117 = arith.constant 0 : index
    %260 = vector.load %arg10[%c1_115, %c0_116, %c0_117] : memref<3x8x1xf32, #tpu.memory_space<vmem>>, vector<1x8x1xf32>
    %261 = vector.shape_cast %260 : vector<1x8x1xf32> to vector<8x1xf32>
    %262 = vector.extract_strided_slice %257 {offsets = [0, 0], sizes = [8, 162], strides = [1, 1]} : vector<8x174xf32> to vector<8x162xf32>
    %263 = vector.extract_strided_slice %257 {offsets = [0, 3], sizes = [8, 162], strides = [1, 1]} : vector<8x174xf32> to vector<8x162xf32>
    %264 = vector.extract_strided_slice %257 {offsets = [0, 6], sizes = [8, 162], strides = [1, 1]} : vector<8x174xf32> to vector<8x162xf32>
    %265 = vector.extract_strided_slice %257 {offsets = [0, 9], sizes = [8, 162], strides = [1, 1]} : vector<8x174xf32> to vector<8x162xf32>
    %266 = vector.extract_strided_slice %257 {offsets = [0, 12], sizes = [8, 162], strides = [1, 1]} : vector<8x174xf32> to vector<8x162xf32>
    %267 = tpu.concatenate %262, %263, %264, %265, %266 in 0 : vector<8x162xf32>, vector<8x162xf32>, vector<8x162xf32>, vector<8x162xf32>, vector<8x162xf32> -> vector<40x162xf32>
    %cst_118 = arith.constant dense<0.000000e+00> : vector<8x162xf32>
    %268 = tpu.matmul %259, %267, %cst_118 {dimension_numbers = #tpu.dot_dimension_numbers<[1], [0], [0], [1], [0, 0, 1, 1], [], []>} : vector<8x40xf32>, vector<40x162xf32>, vector<8x162xf32> -> vector<8x162xf32>
    %269 = vector.broadcast %261 : vector<8x1xf32> to vector<8x162xf32>
    %270 = arith.addf %268, %269 : vector<8x162xf32>
    %c128_i32_119 = arith.constant 128 : i32
    %271 = arith.muli %arg1, %c128_i32_119 : i32
    %c-17_i32 = arith.constant -17 : i32
    %272 = arith.addi %271, %c-17_i32 : i32
    %273 = tpu.iota {dimensions = array<i32: 1>} : vector<8x162xi32>
    %274 = vector.broadcast %272 : i32 to vector<8x162xi32>
    %275 = arith.addi %274, %273 : vector<8x162xi32>
    %c0_i32_120 = arith.constant 0 : i32
    %276 = vector.broadcast %c0_i32_120 : i32 to vector<8x162xi32>
    %277 = arith.cmpi sge, %275, %276 : vector<8x162xi32>
    %c64_i32_121 = arith.constant 64 : i32
    %278 = vector.broadcast %c64_i32_121 : i32 to vector<8x162xi32>
    %279 = arith.cmpi slt, %275, %278 : vector<8x162xi32>
    %280 = arith.andi %277, %279 : vector<8x162xi1>
    %cst_122 = arith.constant 0.000000e+00 : f32
    %281 = vector.broadcast %cst_122 : f32 to vector<8x162xf32>
    %282 = arith.select %280, %270, %281 : vector<8x162xi1>, vector<8x162xf32>
    %cst_123 = arith.constant 0.000000e+00 : f32
    %283 = vector.broadcast %cst_123 : f32 to vector<8x162xf32>
    %284 = arith.cmpf oge, %282, %283 : vector<8x162xf32>
    %cst_124 = arith.constant 1.000000e-01 : f32
    %285 = vector.broadcast %cst_124 : f32 to vector<8x162xf32>
    %286 = arith.mulf %285, %282 : vector<8x162xf32>
    %287 = arith.select %284, %282, %286 : vector<8x162xi1>, vector<8x162xf32>
    %c1_125 = arith.constant 1 : index
    %c0_126 = arith.constant 0 : index
    %c0_127 = arith.constant 0 : index
    %288 = vector.load %arg11[%c1_125, %c0_126, %c0_127] : memref<3x8x40xf32, #tpu.memory_space<vmem>>, vector<1x8x40xf32>
    %289 = vector.shape_cast %288 : vector<1x8x40xf32> to vector<8x40xf32>
    %c1_128 = arith.constant 1 : index
    %c0_129 = arith.constant 0 : index
    %c0_130 = arith.constant 0 : index
    %290 = vector.load %arg12[%c1_128, %c0_129, %c0_130] : memref<3x8x1xf32, #tpu.memory_space<vmem>>, vector<1x8x1xf32>
    %291 = vector.shape_cast %290 : vector<1x8x1xf32> to vector<8x1xf32>
    %292 = vector.extract_strided_slice %287 {offsets = [0, 0], sizes = [8, 158], strides = [1, 1]} : vector<8x162xf32> to vector<8x158xf32>
    %293 = vector.extract_strided_slice %287 {offsets = [0, 1], sizes = [8, 158], strides = [1, 1]} : vector<8x162xf32> to vector<8x158xf32>
    %294 = vector.extract_strided_slice %287 {offsets = [0, 2], sizes = [8, 158], strides = [1, 1]} : vector<8x162xf32> to vector<8x158xf32>
    %295 = vector.extract_strided_slice %287 {offsets = [0, 3], sizes = [8, 158], strides = [1, 1]} : vector<8x162xf32> to vector<8x158xf32>
    %296 = vector.extract_strided_slice %287 {offsets = [0, 4], sizes = [8, 158], strides = [1, 1]} : vector<8x162xf32> to vector<8x158xf32>
    %297 = tpu.concatenate %292, %293, %294, %295, %296 in 0 : vector<8x158xf32>, vector<8x158xf32>, vector<8x158xf32>, vector<8x158xf32>, vector<8x158xf32> -> vector<40x158xf32>
    %cst_131 = arith.constant dense<0.000000e+00> : vector<8x158xf32>
    %298 = tpu.matmul %289, %297, %cst_131 {dimension_numbers = #tpu.dot_dimension_numbers<[1], [0], [0], [1], [0, 0, 1, 1], [], []>} : vector<8x40xf32>, vector<40x158xf32>, vector<8x158xf32> -> vector<8x158xf32>
    %299 = vector.broadcast %291 : vector<8x1xf32> to vector<8x158xf32>
    %300 = arith.addf %298, %299 : vector<8x158xf32>
    %c128_i32_132 = arith.constant 128 : i32
    %301 = arith.muli %arg1, %c128_i32_132 : i32
    %c-15_i32 = arith.constant -15 : i32
    %302 = arith.addi %301, %c-15_i32 : i32
    %303 = tpu.iota {dimensions = array<i32: 1>} : vector<8x158xi32>
    %304 = vector.broadcast %302 : i32 to vector<8x158xi32>
    %305 = arith.addi %304, %303 : vector<8x158xi32>
    %c0_i32_133 = arith.constant 0 : i32
    %306 = vector.broadcast %c0_i32_133 : i32 to vector<8x158xi32>
    %307 = arith.cmpi sge, %305, %306 : vector<8x158xi32>
    %c64_i32_134 = arith.constant 64 : i32
    %308 = vector.broadcast %c64_i32_134 : i32 to vector<8x158xi32>
    %309 = arith.cmpi slt, %305, %308 : vector<8x158xi32>
    %310 = arith.andi %307, %309 : vector<8x158xi1>
    %cst_135 = arith.constant 0.000000e+00 : f32
    %311 = vector.broadcast %cst_135 : f32 to vector<8x158xf32>
    %312 = arith.select %310, %300, %311 : vector<8x158xi1>, vector<8x158xf32>
    %313 = vector.extract_strided_slice %252 {offsets = [0, 8], sizes = [8, 158], strides = [1, 1]} : vector<8x174xf32> to vector<8x158xf32>
    %314 = arith.addf %312, %313 : vector<8x158xf32>
    %cst_136 = arith.constant 0.000000e+00 : f32
    %315 = vector.broadcast %cst_136 : f32 to vector<8x158xf32>
    %316 = arith.cmpf oge, %314, %315 : vector<8x158xf32>
    %cst_137 = arith.constant 1.000000e-01 : f32
    %317 = vector.broadcast %cst_137 : f32 to vector<8x158xf32>
    %318 = arith.mulf %317, %314 : vector<8x158xf32>
    %319 = arith.select %316, %314, %318 : vector<8x158xi1>, vector<8x158xf32>
    %c2_138 = arith.constant 2 : index
    %c0_139 = arith.constant 0 : index
    %c0_140 = arith.constant 0 : index
    %320 = vector.load %arg9[%c2_138, %c0_139, %c0_140] : memref<3x8x40xf32, #tpu.memory_space<vmem>>, vector<1x8x40xf32>
    %321 = vector.shape_cast %320 : vector<1x8x40xf32> to vector<8x40xf32>
    %c2_141 = arith.constant 2 : index
    %c0_142 = arith.constant 0 : index
    %c0_143 = arith.constant 0 : index
    %322 = vector.load %arg10[%c2_141, %c0_142, %c0_143] : memref<3x8x1xf32, #tpu.memory_space<vmem>>, vector<1x8x1xf32>
    %323 = vector.shape_cast %322 : vector<1x8x1xf32> to vector<8x1xf32>
    %324 = vector.extract_strided_slice %319 {offsets = [0, 0], sizes = [8, 138], strides = [1, 1]} : vector<8x158xf32> to vector<8x138xf32>
    %325 = vector.extract_strided_slice %319 {offsets = [0, 5], sizes = [8, 138], strides = [1, 1]} : vector<8x158xf32> to vector<8x138xf32>
    %326 = vector.extract_strided_slice %319 {offsets = [0, 10], sizes = [8, 138], strides = [1, 1]} : vector<8x158xf32> to vector<8x138xf32>
    %327 = vector.extract_strided_slice %319 {offsets = [0, 15], sizes = [8, 138], strides = [1, 1]} : vector<8x158xf32> to vector<8x138xf32>
    %328 = vector.extract_strided_slice %319 {offsets = [0, 20], sizes = [8, 138], strides = [1, 1]} : vector<8x158xf32> to vector<8x138xf32>
    %329 = tpu.concatenate %324, %325, %326, %327, %328 in 0 : vector<8x138xf32>, vector<8x138xf32>, vector<8x138xf32>, vector<8x138xf32>, vector<8x138xf32> -> vector<40x138xf32>
    %cst_144 = arith.constant dense<0.000000e+00> : vector<8x138xf32>
    %330 = tpu.matmul %321, %329, %cst_144 {dimension_numbers = #tpu.dot_dimension_numbers<[1], [0], [0], [1], [0, 0, 1, 1], [], []>} : vector<8x40xf32>, vector<40x138xf32>, vector<8x138xf32> -> vector<8x138xf32>
    %331 = vector.broadcast %323 : vector<8x1xf32> to vector<8x138xf32>
    %332 = arith.addf %330, %331 : vector<8x138xf32>
    %c128_i32_145 = arith.constant 128 : i32
    %333 = arith.muli %arg1, %c128_i32_145 : i32
    %c-5_i32 = arith.constant -5 : i32
    %334 = arith.addi %333, %c-5_i32 : i32
    %335 = tpu.iota {dimensions = array<i32: 1>} : vector<8x138xi32>
    %336 = vector.broadcast %334 : i32 to vector<8x138xi32>
    %337 = arith.addi %336, %335 : vector<8x138xi32>
    %c0_i32_146 = arith.constant 0 : i32
    %338 = vector.broadcast %c0_i32_146 : i32 to vector<8x138xi32>
    %339 = arith.cmpi sge, %337, %338 : vector<8x138xi32>
    %c64_i32_147 = arith.constant 64 : i32
    %340 = vector.broadcast %c64_i32_147 : i32 to vector<8x138xi32>
    %341 = arith.cmpi slt, %337, %340 : vector<8x138xi32>
    %342 = arith.andi %339, %341 : vector<8x138xi1>
    %cst_148 = arith.constant 0.000000e+00 : f32
    %343 = vector.broadcast %cst_148 : f32 to vector<8x138xf32>
    %344 = arith.select %342, %332, %343 : vector<8x138xi1>, vector<8x138xf32>
    %cst_149 = arith.constant 0.000000e+00 : f32
    %345 = vector.broadcast %cst_149 : f32 to vector<8x138xf32>
    %346 = arith.cmpf oge, %344, %345 : vector<8x138xf32>
    %cst_150 = arith.constant 1.000000e-01 : f32
    %347 = vector.broadcast %cst_150 : f32 to vector<8x138xf32>
    %348 = arith.mulf %347, %344 : vector<8x138xf32>
    %349 = arith.select %346, %344, %348 : vector<8x138xi1>, vector<8x138xf32>
    %c2_151 = arith.constant 2 : index
    %c0_152 = arith.constant 0 : index
    %c0_153 = arith.constant 0 : index
    %350 = vector.load %arg11[%c2_151, %c0_152, %c0_153] : memref<3x8x40xf32, #tpu.memory_space<vmem>>, vector<1x8x40xf32>
    %351 = vector.shape_cast %350 : vector<1x8x40xf32> to vector<8x40xf32>
    %c2_154 = arith.constant 2 : index
    %c0_155 = arith.constant 0 : index
    %c0_156 = arith.constant 0 : index
    %352 = vector.load %arg12[%c2_154, %c0_155, %c0_156] : memref<3x8x1xf32, #tpu.memory_space<vmem>>, vector<1x8x1xf32>
    %353 = vector.shape_cast %352 : vector<1x8x1xf32> to vector<8x1xf32>
    %354 = vector.extract_strided_slice %349 {offsets = [0, 0], sizes = [8, 134], strides = [1, 1]} : vector<8x138xf32> to vector<8x134xf32>
    %355 = vector.extract_strided_slice %349 {offsets = [0, 1], sizes = [8, 134], strides = [1, 1]} : vector<8x138xf32> to vector<8x134xf32>
    %356 = vector.extract_strided_slice %349 {offsets = [0, 2], sizes = [8, 134], strides = [1, 1]} : vector<8x138xf32> to vector<8x134xf32>
    %357 = vector.extract_strided_slice %349 {offsets = [0, 3], sizes = [8, 134], strides = [1, 1]} : vector<8x138xf32> to vector<8x134xf32>
    %358 = vector.extract_strided_slice %349 {offsets = [0, 4], sizes = [8, 134], strides = [1, 1]} : vector<8x138xf32> to vector<8x134xf32>
    %359 = tpu.concatenate %354, %355, %356, %357, %358 in 0 : vector<8x134xf32>, vector<8x134xf32>, vector<8x134xf32>, vector<8x134xf32>, vector<8x134xf32> -> vector<40x134xf32>
    %cst_157 = arith.constant dense<0.000000e+00> : vector<8x134xf32>
    %360 = tpu.matmul %351, %359, %cst_157 {dimension_numbers = #tpu.dot_dimension_numbers<[1], [0], [0], [1], [0, 0, 1, 1], [], []>} : vector<8x40xf32>, vector<40x134xf32>, vector<8x134xf32> -> vector<8x134xf32>
    %361 = vector.broadcast %353 : vector<8x1xf32> to vector<8x134xf32>
    %362 = arith.addf %360, %361 : vector<8x134xf32>
    %c128_i32_158 = arith.constant 128 : i32
    %363 = arith.muli %arg1, %c128_i32_158 : i32
    %c-3_i32_159 = arith.constant -3 : i32
    %364 = arith.addi %363, %c-3_i32_159 : i32
    %365 = tpu.iota {dimensions = array<i32: 1>} : vector<8x134xi32>
    %366 = vector.broadcast %364 : i32 to vector<8x134xi32>
    %367 = arith.addi %366, %365 : vector<8x134xi32>
    %c0_i32_160 = arith.constant 0 : i32
    %368 = vector.broadcast %c0_i32_160 : i32 to vector<8x134xi32>
    %369 = arith.cmpi sge, %367, %368 : vector<8x134xi32>
    %c64_i32_161 = arith.constant 64 : i32
    %370 = vector.broadcast %c64_i32_161 : i32 to vector<8x134xi32>
    %371 = arith.cmpi slt, %367, %370 : vector<8x134xi32>
    %372 = arith.andi %369, %371 : vector<8x134xi1>
    %cst_162 = arith.constant 0.000000e+00 : f32
    %373 = vector.broadcast %cst_162 : f32 to vector<8x134xf32>
    %374 = arith.select %372, %362, %373 : vector<8x134xi1>, vector<8x134xf32>
    %375 = vector.extract_strided_slice %314 {offsets = [0, 12], sizes = [8, 134], strides = [1, 1]} : vector<8x158xf32> to vector<8x134xf32>
    %376 = arith.addf %374, %375 : vector<8x134xf32>
    %377 = arith.addf %189, %376 : vector<8x134xf32>
    %cst_163 = arith.constant 5.000000e-01 : f32
    %378 = vector.broadcast %cst_163 : f32 to vector<8x134xf32>
    %379 = arith.mulf %377, %378 : vector<8x134xf32>
    %c128_i32_164 = arith.constant 128 : i32
    %380 = arith.muli %arg1, %c128_i32_164 : i32
    %c-3_i32_165 = arith.constant -3 : i32
    %381 = arith.addi %380, %c-3_i32_165 : i32
    %382 = tpu.iota {dimensions = array<i32: 1>} : vector<8x134xi32>
    %383 = vector.broadcast %381 : i32 to vector<8x134xi32>
    %384 = arith.addi %383, %382 : vector<8x134xi32>
    %c0_i32_166 = arith.constant 0 : i32
    %385 = vector.broadcast %c0_i32_166 : i32 to vector<8x134xi32>
    %386 = arith.cmpi sge, %384, %385 : vector<8x134xi32>
    %c64_i32_167 = arith.constant 64 : i32
    %387 = vector.broadcast %c64_i32_167 : i32 to vector<8x134xi32>
    %388 = arith.cmpi slt, %384, %387 : vector<8x134xi32>
    %389 = arith.andi %386, %388 : vector<8x134xi1>
    %cst_168 = arith.constant 0.000000e+00 : f32
    %390 = vector.broadcast %cst_168 : f32 to vector<8x134xf32>
    %391 = arith.select %389, %379, %390 : vector<8x134xi1>, vector<8x134xf32>
    %cst_169 = arith.constant 0.000000e+00 : f32
    %392 = vector.broadcast %cst_169 : f32 to vector<8x134xf32>
    %393 = arith.cmpf oge, %391, %392 : vector<8x134xf32>
    %cst_170 = arith.constant 0.00999999977 : f32
    %394 = vector.broadcast %cst_170 : f32 to vector<8x134xf32>
    %395 = arith.mulf %394, %391 : vector<8x134xf32>
    %396 = arith.select %393, %391, %395 : vector<8x134xi1>, vector<8x134xf32>
    %c0_171 = arith.constant 0 : index
    %c0_172 = arith.constant 0 : index
    %397 = vector.load %arg13[%c0_171, %c0_172] : memref<8x56xf32, #tpu.memory_space<vmem>>, vector<8x56xf32>
    %c0_173 = arith.constant 0 : index
    %c0_174 = arith.constant 0 : index
    %398 = vector.load %arg14[%c0_173, %c0_174] : memref<8x1xf32, #tpu.memory_space<vmem>>, vector<8x1xf32>
    %399 = vector.extract_strided_slice %396 {offsets = [0, 0], sizes = [8, 128], strides = [1, 1]} : vector<8x134xf32> to vector<8x128xf32>
    %400 = vector.extract_strided_slice %396 {offsets = [0, 1], sizes = [8, 128], strides = [1, 1]} : vector<8x134xf32> to vector<8x128xf32>
    %401 = vector.extract_strided_slice %396 {offsets = [0, 2], sizes = [8, 128], strides = [1, 1]} : vector<8x134xf32> to vector<8x128xf32>
    %402 = vector.extract_strided_slice %396 {offsets = [0, 3], sizes = [8, 128], strides = [1, 1]} : vector<8x134xf32> to vector<8x128xf32>
    %403 = vector.extract_strided_slice %396 {offsets = [0, 4], sizes = [8, 128], strides = [1, 1]} : vector<8x134xf32> to vector<8x128xf32>
    %404 = vector.extract_strided_slice %396 {offsets = [0, 5], sizes = [8, 128], strides = [1, 1]} : vector<8x134xf32> to vector<8x128xf32>
    %405 = vector.extract_strided_slice %396 {offsets = [0, 6], sizes = [8, 128], strides = [1, 1]} : vector<8x134xf32> to vector<8x128xf32>
    %406 = tpu.concatenate %399, %400, %401, %402, %403, %404, %405 in 0 : vector<8x128xf32>, vector<8x128xf32>, vector<8x128xf32>, vector<8x128xf32>, vector<8x128xf32>, vector<8x128xf32>, vector<8x128xf32> -> vector<56x128xf32>
    %cst_175 = arith.constant dense<0.000000e+00> : vector<8x128xf32>
    %407 = tpu.matmul %397, %406, %cst_175 {dimension_numbers = #tpu.dot_dimension_numbers<[1], [0], [0], [1], [0, 0, 1, 1], [], []>} : vector<8x56xf32>, vector<56x128xf32>, vector<8x128xf32> -> vector<8x128xf32>
    %408 = vector.broadcast %398 : vector<8x1xf32> to vector<8x128xf32>
    %409 = arith.addf %407, %408 : vector<8x128xf32>
    %410 = math.tanh %409 : vector<8x128xf32>
    %c128_i32_176 = arith.constant 128 : i32
    %411 = arith.muli %arg1, %c128_i32_176 : i32
    %c0_i32_177 = arith.constant 0 : i32
    %412 = arith.addi %411, %c0_i32_177 : i32
    %413 = tpu.iota {dimensions = array<i32: 1>} : vector<8x128xi32>
    %414 = vector.broadcast %412 : i32 to vector<8x128xi32>
    %415 = arith.addi %414, %413 : vector<8x128xi32>
    %c0_i32_178 = arith.constant 0 : i32
    %416 = vector.broadcast %c0_i32_178 : i32 to vector<8x128xi32>
    %417 = arith.cmpi sge, %415, %416 : vector<8x128xi32>
    %c64_i32_179 = arith.constant 64 : i32
    %418 = vector.broadcast %c64_i32_179 : i32 to vector<8x128xi32>
    %419 = arith.cmpi slt, %415, %418 : vector<8x128xi32>
    %420 = arith.andi %417, %419 : vector<8x128xi1>
    %cst_180 = arith.constant 0.000000e+00 : f32
    %421 = vector.broadcast %cst_180 : f32 to vector<8x128xf32>
    %422 = arith.select %420, %410, %421 : vector<8x128xi1>, vector<8x128xf32>
    %c0_181 = arith.constant 0 : index
    %c0_182 = arith.constant 0 : index
    %c0_183 = arith.constant 0 : index
    %423 = vector.load %arg15[%c0_181, %c0_182, %c0_183] : memref<1x8x128xf32, #tpu.memory_space<vmem>>, vector<1x8x128xf32>
    %424 = vector.shape_cast %423 : vector<1x8x128xf32> to vector<8x128xf32>
    %425 = vector.shape_cast %422 : vector<8x128xf32> to vector<1x8x128xf32>
    tpu.vector_store %arg15[%c0_181, %c0_182, %c0_183], %425 {strides = array<i32>} : memref<1x8x128xf32, #tpu.memory_space<vmem>>, vector<1x8x128xf32>,
    return
  }
  func.func @transform_0(%arg0: i32, %arg1: i32) -> (i32, i32, i32) {
    %c0_i32 = arith.constant 0 : i32
    %c0_i32_0 = arith.constant 0 : i32
    return %arg0, %c0_i32, %arg1 : i32, i32, i32
  }
  func.func @transform_1(%arg0: i32, %arg1: i32) -> (i32, i32, i32) {
    %c1_i32 = arith.constant 1 : i32
    %0 = arith.muli %arg1, %c1_i32 : i32
    %c1_i32_0 = arith.constant 1 : i32
    %1 = arith.subi %0, %c1_i32_0 : i32
    %c0_i32 = arith.constant 0 : i32
    %2 = arith.maxsi %1, %c0_i32 : i32
    %c0_i32_1 = arith.constant 0 : i32
    %c0_i32_2 = arith.constant 0 : i32
    return %arg0, %c0_i32_1, %2 : i32, i32, i32
  }
  func.func @transform_2(%arg0: i32, %arg1: i32) -> (i32, i32, i32) {
    %c1_i32 = arith.constant 1 : i32
    %0 = arith.addi %arg1, %c1_i32 : i32
    %c1_i32_0 = arith.constant 1 : i32
    %1 = arith.muli %0, %c1_i32_0 : i32
    %c3_i32 = arith.constant 3 : i32
    %2 = arith.minsi %1, %c3_i32 : i32
    %c0_i32 = arith.constant 0 : i32
    %c0_i32_1 = arith.constant 0 : i32
    return %arg0, %c0_i32, %2 : i32, i32, i32
  }
  func.func @transform_3(%arg0: i32, %arg1: i32) -> (i32, i32, i32) {
    %c0_i32 = arith.constant 0 : i32
    %c0_i32_0 = arith.constant 0 : i32
    %c0_i32_1 = arith.constant 0 : i32
    %c0_i32_2 = arith.constant 0 : i32
    return %c0_i32, %c0_i32_0, %c0_i32_1 : i32, i32, i32
  }
  func.func @transform_4(%arg0: i32, %arg1: i32) -> (i32, i32, i32) {
    %c0_i32 = arith.constant 0 : i32
    %c0_i32_0 = arith.constant 0 : i32
    %c0_i32_1 = arith.constant 0 : i32
    %c0_i32_2 = arith.constant 0 : i32
    return %c0_i32, %c0_i32_0, %c0_i32_1 : i32, i32, i32
  }
  func.func @transform_5(%arg0: i32, %arg1: i32) -> (i32, i32, i32) {
    %c0_i32 = arith.constant 0 : i32
    %c0_i32_0 = arith.constant 0 : i32
    %c0_i32_1 = arith.constant 0 : i32
    %c0_i32_2 = arith.constant 0 : i32
    return %c0_i32, %c0_i32_0, %c0_i32_1 : i32, i32, i32
  }
  func.func @transform_6(%arg0: i32, %arg1: i32) -> (i32, i32, i32) {
    %c0_i32 = arith.constant 0 : i32
    %c0_i32_0 = arith.constant 0 : i32
    %c0_i32_1 = arith.constant 0 : i32
    %c0_i32_2 = arith.constant 0 : i32
    return %c0_i32, %c0_i32_0, %c0_i32_1 : i32, i32, i32
  }
  func.func @transform_7(%arg0: i32, %arg1: i32) -> (i32, i32, i32) {
    %c0_i32 = arith.constant 0 : i32
    %c0_i32_0 = arith.constant 0 : i32
    %c0_i32_1 = arith.constant 0 : i32
    %c0_i32_2 = arith.constant 0 : i32
    return %c0_i32, %c0_i32_0, %c0_i32_1 : i32, i32, i32
  }
  func.func @transform_8(%arg0: i32, %arg1: i32) -> (i32, i32, i32) {
    %c0_i32 = arith.constant 0 : i32
    %c0_i32_0 = arith.constant 0 : i32
    %c0_i32_1 = arith.constant 0 : i32
    %c0_i32_2 = arith.constant 0 : i32
    return %c0_i32, %c0_i32_0, %c0_i32_1 : i32, i32, i32
  }
  func.func @transform_9(%arg0: i32, %arg1: i32) -> (i32, i32, i32) {
    %c0_i32 = arith.constant 0 : i32
    %c0_i32_0 = arith.constant 0 : i32
    %c0_i32_1 = arith.constant 0 : i32
    %c0_i32_2 = arith.constant 0 : i32
    return %c0_i32, %c0_i32_0, %c0_i32_1 : i32, i32, i32
  }
  func.func @transform_10(%arg0: i32, %arg1: i32) -> (i32, i32, i32) {
    %c0_i32 = arith.constant 0 : i32
    %c0_i32_0 = arith.constant 0 : i32
    %c0_i32_1 = arith.constant 0 : i32
    %c0_i32_2 = arith.constant 0 : i32
    return %c0_i32, %c0_i32_0, %c0_i32_1 : i32, i32, i32
  }
  func.func @transform_11(%arg0: i32, %arg1: i32) -> (i32, i32) {
    %c0_i32 = arith.constant 0 : i32
    %c0_i32_0 = arith.constant 0 : i32
    %c0_i32_1 = arith.constant 0 : i32
    return %c0_i32, %c0_i32_0 : i32, i32
  }
  func.func @transform_12(%arg0: i32, %arg1: i32) -> (i32, i32) {
    %c0_i32 = arith.constant 0 : i32
    %c0_i32_0 = arith.constant 0 : i32
    %c0_i32_1 = arith.constant 0 : i32
    return %c0_i32, %c0_i32_0 : i32, i32
  }
  func.func @transform_13(%arg0: i32, %arg1: i32) -> (i32, i32, i32) {
    %c0_i32 = arith.constant 0 : i32
    %c0_i32_0 = arith.constant 0 : i32
    return %arg0, %c0_i32, %arg1 : i32, i32, i32
  }
}

</mosaic_0001>

<bundles_post_ra>
// kernel: hifigan_forward.4
= control target key start
LH: loop header
LB: loop body
LE: loop exit
PB: predicated region body
PF: predicated region fallthrough
CT: control target
= control target key end

     0   :  { %s1020_s24 = smov 0   ;;  %s1022_s1 = smov 0   ;;  %s1111_s0 = inlined_call_operand.vmem [shape: f32[2,8,128], index: 0, kind: input, shape index: {}, may-alias: {0,1,2}]   ;;  %s1112_s1 = inlined_call_operand.vmem [shape: f32[2,8,128], index: 1, kind: input, shape index: {}, may-alias: {0,1,2}]   ;;  %s1113_s2 = inlined_call_operand.vmem [shape: f32[2,8,128], index: 2, kind: input, shape index: {}, may-alias: {0,1,2}]   ;;  %s1114_s3 = inlined_call_operand.vmem [shape: f32[16,56], index: 3, kind: input, shape index: {}]   ;;  %s1115_s4 = inlined_call_operand.vmem [shape: f32[16,1], index: 4, kind: input, shape index: {}]   ;;  %s1116_s5 = inlined_call_operand.vmem [shape: f32[16,48], index: 5, kind: input, shape index: {}]   ;;  %s1117_s6 = inlined_call_operand.vmem [shape: f32[16,1], index: 6, kind: input, shape index: {}]   ;;  %s1118_s7 = inlined_call_operand.vmem [shape: f32[2,2,8,128], index: 7, kind: output, shape index: {}]  }
   0x1   :  { %s1024_s2 = smov 0  }
   0x2 LB: > { %s29_s25 = sadd.s32 1, %s965_s1  ;;  %p803_p0 = scmp.ge.s32.totalorder %s969_s2, 1  ;;  %s969_s2 = sphi %s1024_s2, %s17_s2   ;;  %s965_s1 = sphi %s1022_s1, %s1120_s1   ;;  %s961_s24 = sphi %s1020_s24, %s1119_s24  }
   0x3   : > { %p31_p1 = scmp.ge.s32.totalorder %s29_s25, 2  ;;  %p307_p2 = scmp.lt.s32.totalorder %s969_s2, 3 }
   0x5   : > { %s1122_s25 = smov (%p31_p1, %s29_s25), 0  ;;  %p308_p3 = pnand %p803_p0, %p307_p2 }
   0x6   : > { %p364_p4 = scmp.lt.s32.totalorder (!%p308_p3), %s961_s24, 1  ;;  %s972_s27 = smov (!%p308_p3), 125  }
   0x7   : > { %311 = sbr.rel (%p308_p3) target bundleno = 692 (0x2b4), region = 48  ;;  %s973_s8 = smov (!%p308_p3), 122  }
   0x8   : > { %s974_s9 = smov (!%p308_p3), 124   ;;  %s975_s10 = smov (!%p308_p3), 126  }
   0x9   : > { %s976_s11 = smov (!%p308_p3), 123   ;;  %s977_s12 = smov (!%p308_p3), 127  }
   0xa   : > { %s978_s13 = smov (!%p308_p3), 4  }
   0xc   : > { %s1124_s24 = smov (!%p364_p4, %s961_s24), 1  ;;  %v971_v0 = vmov 0.0   ;;  %vm462_vm0 = vcmask 998400   ;;  %vm450_vm1 = vcmask 1014784   ;;  %vm456_vm2 = vcmask 1006592   ;;  %v420_v36 = vld [vmem:[%s1115_s4] sm:$0xff] }
   0xd   : > { %s804_s26 = sshll.u32 %s1124_s24, 3  ;;  %441 = vrot.lane.b32.xlu2 %v971_v0, %s972_s27  ;;  %vm443_vm3 = vcmask 1022976   ;;  %vm434_vm4 = vcmask 1031168   ;;  %vm428_vm5 = vcmask 1039360   ;;  %v421_v37 = vld [vmem:[%s1115_s4 + $0x8] sm:$0xff]  ;;  %v979_v38 = vmov 0  }
   0xe   : > { %s370_s30 = scalar_lea.vmem %s1111_s0, %s804_s26  ;;  %925 = vset.pattern.permute.xlu0 %v979_v38  ;;  %924 = vset.pattern.permute.xlu2 %v979_v38  ;;  %v637_v40 = vld [vmem:[%s1117_s6] sm:$0xff]  ;;  %vm502_vm6 = vcmask 31744   ;;  %vm524_vm7 = vcmask 457728   ;;  %vm649_vm13 = vcmask 392192  }
   0xf   : > { %v417_v1 = vld [vmem:[%s370_s30] sm:$0xff]  ;;  %946 = vset.pattern.permute.xlu1 %v979_v38 }
  0x10   : > { %v859_v2 = vpack.i.bf16 0.0, %v417_v1  ;;  %v879_v3 = vpack.i.bf16 %v417_v1, %v971_v0 }
  0x12   : > { %860 = vrot.lane.b32.xlu0 %v859_v2, %s973_s8  ;;  %870 = vrot.lane.b32.xlu1 %v859_v2, %s974_s9  ;;  %s818_s9 = sshll.u32 %s1124_s24, 4 }
  0x15   : > { %880 = vrot.lane.b32.xlu2 %v879_v3, %s975_s10 }
  0x1a   : > { %865 = vrot.lane.b32.xlu0 %v859_v2, %s976_s11  ;;  %875 = vrot.lane.b32.xlu1 %v879_v3, %s972_s27 }
  0x22   : > { %885 = vrot.lane.b32.xlu0 %v879_v3, %s977_s12 }
  0x67   : > { %v442_v10 = vpop.permute.xlu2 %441 }
  0x6f   : > { %v881_v21 = vpop.permute.xlu2 %880 }
  0x70   : > { %v883_v27 = vunpack.i.h.bf16 %v881_v21  ;;  %v882_v28 = vunpack.i.l.bf16 %v881_v21 }
  0x72   : > { %v435_v30 = vsel %vm434_vm4, %v882_v28, %v883_v27 }
  0x73   : > { %v909_v34 = vpack.i.bf16 %v883_v27, %v435_v30 }
  0x84   : > { %v861_v4 = vpop.permute.xlu0 %860  ;;  %v871_v5 = vpop.permute.xlu1 %870 }
  0x85   : > { %v863_v6 = vunpack.i.h.bf16 %v861_v4  ;;  %v862_v7 = vunpack.i.l.bf16 %v861_v4  ;;  %v873_v8 = vunpack.i.h.bf16 %v871_v5  ;;  %v872_v9 = vunpack.i.l.bf16 %v871_v5  ;;  %v419_v4 = vld [vmem:[%s1114_s3 + $0x8] sm:$0xff]  ;;  %v418_v5 = vld [vmem:[%s1114_s3] sm:$0xff] }
  0x87   : > { %v463_v11 = vsel %vm462_vm0, %v862_v7, %v863_v6  ;;  %v451_v12 = vsel %vm450_vm1, %v872_v9, %v873_v8  ;;  %v579_v6 = vlaneseq }
  0x88   : > { %v889_v13 = vpack.i.bf16 %v463_v11, %v862_v7  ;;  %v899_v14 = vpack.i.bf16 %v451_v12, %v872_v9 }
  0x89   : > { %v1077_v7 = vand.u32 127, %v579_v6 }
  0x8a   : > { %890 = vrot.lane.b32.xlu1 %v889_v13, %s978_s13  ;;  %900 = vrot.lane.b32.xlu0 %v899_v14, %s978_s13 }
  0x8b   : > { %v583_v8 = vadd.s32 4294967295, %v1077_v7  ;;  %vm682_vm14 = vcmp.lt.s32.totalorder %v1077_v7, 16 }
  0x8c   : > { %v866_v15 = vpop.permute.xlu0 %865  ;;  %v876_v16 = vpop.permute.xlu1 %875 }
  0x8d   : > { %v868_v17 = vunpack.i.h.bf16 %v866_v15  ;;  %v867_v18 = vunpack.i.l.bf16 %v866_v15  ;;  %v878_v19 = vunpack.i.h.bf16 %v876_v16  ;;  %v877_v20 = vunpack.i.l.bf16 %v876_v16 }
  0x8e   : > { %vm585_vm8 = vcmp.ge.s32.totalorder %v583_v8, 0  ;;  %vm587_vm9 = vcmp.lt.s32.totalorder %v583_v8, 16 }
  0x8f   : > { %v457_v22 = vsel %vm456_vm2, %v867_v18, %v868_v17  ;;  %v444_v23 = vsel %vm443_vm3, %v877_v20, %v878_v19  ;;  %v445_v24 = vsel %vm443_vm3, %v878_v19, %v442_v10  ;;  %vm589_vm10 = vmand %vm585_vm8, %vm587_vm9 }
  0x90   : > { %v894_v25 = vpack.i.bf16 %v457_v22, %v867_v18  ;;  %v904_v26 = vpack.i.bf16 %v445_v24, %v444_v23 }
  0x92   : > { %895 = vrot.lane.b32.xlu2 %v894_v25, %s978_s13  ;;  %905 = vrot.lane.b32.xlu1 %v904_v26, %s978_s13  ;;  %v638_v25 = vld [vmem:[%s1117_s6 + $0x8] sm:$0xff] }
  0x94   : > { %v886_v29 = vpop.permute.xlu0 %885 }
  0x95   : > { %v888_v31 = vunpack.i.h.bf16 %v886_v29  ;;  %v887_v32 = vunpack.i.l.bf16 %v886_v29 }
  0x97   : > { %v429_v33 = vsel %vm428_vm5, %v887_v32, %v888_v31 }
  0x98   : > { %v914_v35 = vpack.i.bf16 %v888_v31, %v429_v33 }
  0x9a   : > { %915 = vrot.lane.b32.xlu0 %v914_v35, %s978_s13  ;;  %920 = vrot.lane.b32.xlu1 %v879_v3, %s978_s13 }
  0x9b   : > { %910 = vrot.lane.b32.xlu2 %v909_v34, %s978_s13 }
  0xa2   : > { %466 = vperm.xlu0 %925, %v420_v36  }
  0xa3   : > { %471 = vperm.xlu2 %924, %v421_v37  }
  0xaa   : > { %641 = vperm.xlu0 %925, %v637_v40  }
  0xec   : > { %v896_v39 = vpop.permute.xlu2 %895 }
  0xed   : > { %v897_v43 = vunpack.i.l.bf16 %v896_v39  ;;  %v898_v46 = vunpack.i.h.bf16 %v896_v39 }
  0xef   : > { %v508_v51 = vsel %vm502_vm6, %v897_v43, %v898_v46  ;;  %v636_v43 = vld [vmem:[%s1116_s5 + $0x8] sm:$0xff] }
  0xf5   : > { %v911_v50 = vpop.permute.xlu2 %910 }
  0xf6   : > { %v912_v53 = vunpack.i.l.bf16 %v911_v50  ;;  %v913_v54 = vunpack.i.h.bf16 %v911_v50 }
  0xf8   : > { %v505_v59 = vsel %vm502_vm6, %v912_v53, %v913_v54 }
  0xfc   : > { %v891_v41 = vpop.permute.xlu1 %890  ;;  %v901_v42 = vpop.permute.xlu0 %900 }
  0xfd   : > { %v892_v44 = vunpack.i.l.bf16 %v891_v41  ;;  %v893_v45 = vunpack.i.h.bf16 %v891_v41  ;;  %v902_v47 = vunpack.i.l.bf16 %v901_v42  ;;  %v903_v49 = vunpack.i.h.bf16 %v901_v42  ;;  %v472_v14 = vpop.permute.xlu2 %471  ;;  %v635_v42 = vld [vmem:[%s1116_s5] sm:$0xff] }
  0xff   : > { %563 = vmatpush.msra.mxu1 %v893_v45  ;;  %v509_v48 = vsel %vm502_vm6, %v892_v44, %v893_v45  ;;  %v507_v52 = vsel %vm502_vm6, %v902_v47, %v903_v49 }
 0x100   : > { %540 = vmatpush.msra.mxu0 %v509_v48  ;;  %819 = vmatpush.msra.mxu3 %v509_v48 }
 0x101   : > { %564 = vmatpush.msra.mxu1 %v898_v46 }
 0x102   : > { %541 = vmatpush.msra.mxu0 %v508_v51  ;;  %820 = vmatpush.msra.mxu3 %v508_v51 }
 0x103   : > { %565 = vmatpush.msra.mxu1 %v903_v49 }
 0x104   : > { %542 = vmatpush.msra.mxu0 %v507_v52  ;;  %821 = vmatpush.msra.mxu3 %v507_v52  ;;  %v906_v55 = vpop.permute.xlu1 %905 }
 0x105   : > { %v907_v56 = vunpack.i.l.bf16 %v906_v55  ;;  %v908_v57 = vunpack.i.h.bf16 %v906_v55 }
 0x107   : > { %566 = vmatpush.msra.mxu1 %v908_v57  ;;  %v506_v58 = vsel %vm502_vm6, %v907_v56, %v908_v57 }
 0x108   : > { %543 = vmatpush.msra.mxu0 %v506_v58  ;;  %822 = vmatpush.msra.mxu3 %v506_v58 }
 0x109   : > { %567 = vmatpush.msra.mxu1 %v913_v54 }
 0x10a   : > { %544 = vmatpush.msra.mxu0 %v505_v59  ;;  %823 = vmatpush.msra.mxu3 %v505_v59 }
 0x10c   : > { %v916_v60 = vpop.permute.xlu0 %915  ;;  %v921_v61 = vpop.permute.xlu1 %920 }
 0x10d   : > { %v917_v62 = vunpack.i.l.bf16 %v916_v60  ;;  %v922_v63 = vunpack.i.l.bf16 %v921_v61  ;;  %v918_v0 = vunpack.i.h.bf16 %v916_v60  ;;  %v923_v1 = vunpack.i.h.bf16 %v921_v61 }
 0x10f   : > { %568 = vmatpush.msra.mxu1 %v918_v0  ;;  %v504_v2 = vsel %vm502_vm6, %v917_v62, %v918_v0  ;;  %v503_v3 = vsel %vm502_vm6, %v922_v63, %v923_v1 }
 0x110   : > { %545 = vmatpush.msra.mxu0 %v504_v2  ;;  %824 = vmatpush.msra.mxu3 %v504_v2 }
 0x111   : > { %569 = vmatpush.msra.mxu1 %v923_v1 }
 0x112   : > { %546 = vmatpush.msra.mxu0 %v503_v3  ;;  %825 = vmatpush.msra.mxu3 %v503_v3 }
 0x113   : > { %810 = vmatmul.msk.f32.vlgmr.msra.gmra.mxu3 %vm524_vm7, %v419_v4  ;;  %809 = vmatmul.msk.f32.vlgmr.msra.gmra.mxu0 %vm524_vm7, %v418_v5 }
 0x114   : > { %811 = vmatmul.msk.f32.vlgmr.msra.gmra.mxu1 %vm524_vm7, %v418_v5  ;;  %v467_v9 = vpop.permute.xlu0 %466 }
 0x11c   : > { %812 = vmatmul.msk.f32.gmra.mxu1 %vm524_vm7, %v419_v4  ;;  %v642_v44 = vpop.permute.xlu0 %641 }
 0x190   : > { %v548_v10 = vpop.f32.mrf.mxu0 }
 0x191   : > { %v549_v11 = vadd.f32 %v548_v10, %v467_v9  ;;  %v571_v12 = vpop.f32.mrf.mxu1 }
 0x193   : > { %v591_v13 = vsel %vm589_vm10, %v549_v11, 0.0 }
 0x194   : > { %vm595_vm11 = vcmp.ge.f32.partialorder %v591_v13, 0.0  ;;  %v599_v15 = vmul.f32 0.1, %v591_v13 }
 0x196   : > { %v551_v16 = vpop.f32.mrf.mxu3  ;;  %v603_v17 = vsel %vm595_vm11, %v591_v13, %v599_v15 }
 0x197   : > { %v552_v18 = vadd.f32 %v551_v16, %v472_v14  ;;  %v926_v19 = vpack.i.bf16 0.0, %v603_v17 }
 0x199   : > { %v593_v20 = vsel %vm589_vm10, %v552_v18, 0.0  ;;  %927 = vrot.lane.b32.xlu2 %v926_v19, %s975_s10  ;;  %v574_v21 = vpop.f32.mrf.mxu1 }
 0x19a   : > { %vm597_vm12 = vcmp.ge.f32.partialorder %v593_v20, 0.0  ;;  %v601_v22 = vmul.f32 0.1, %v593_v20 }
 0x19c   : > { %v605_v23 = vsel %vm597_vm12, %v593_v20, %v601_v22 }
 0x19d   : > { %v931_v24 = vpack.i.bf16 0.0, %v605_v23 }
 0x19f   : > { %932 = vrot.lane.b32.xlu1 %v931_v24, %s975_s10 }
 0x1a1   : > { %942 = vrot.lane.b32.xlu2 %v926_v19, %s977_s12 }
 0x1a7   : > { %937 = vrot.lane.b32.xlu1 %v931_v24, %s977_s12  ;;  %s404_s12 = scalar_lea.vmem %s1118_s7, %s818_s9 }
 0x1af   : > { %646 = vperm.xlu1 %946, %v638_v25  }
 0x1f3   : > { %v928_v26 = vpop.permute.xlu2 %927 }
 0x1f4   : > { %v930_v28 = vunpack.i.h.bf16 %v928_v26  ;;  %v929_v29 = vunpack.i.l.bf16 %v928_v26 }
 0x1f6   : > { %v631_v33 = vsel %vm434_vm4, %v929_v29, %v930_v28 }
 0x1fb   : > { %v943_v34 = vpop.permute.xlu2 %942 }
 0x1fc   : > { %v945_v36 = vunpack.i.h.bf16 %v943_v34  ;;  %v944_v37 = vunpack.i.l.bf16 %v943_v34 }
 0x1fe   : > { %v619_v41 = vsel %vm428_vm5, %v944_v37, %v945_v36 }
 0x211   : > { %v933_v27 = vpop.permute.xlu1 %932 }
 0x212   : > { %v935_v30 = vunpack.i.h.bf16 %v933_v27  ;;  %v934_v31 = vunpack.i.l.bf16 %v933_v27 }
 0x214   : > { %v632_v32 = vsel %vm434_vm4, %v934_v31, %v935_v30 }
 0x215   : > { %666 = vmatpush.msra.mxu2 %v632_v32 }
 0x217   : > { %667 = vmatpush.msra.mxu2 %v631_v33 }
 0x219   : > { %v938_v35 = vpop.permute.xlu1 %937 }
 0x21a   : > { %v940_v38 = vunpack.i.h.bf16 %v938_v35  ;;  %v939_v39 = vunpack.i.l.bf16 %v938_v35 }
 0x21c   : > { %v620_v40 = vsel %vm428_vm5, %v939_v39, %v940_v38 }
 0x21d   : > { %668 = vmatpush.msra.mxu2 %v620_v40 }
 0x21f   : > { %669 = vmatpush.msra.mxu2 %v619_v41 }
 0x221   : > { %670 = vmatpush.msra.mxu2 %v605_v23  ;;  %v647_v48 = vpop.permute.xlu1 %646 }
 0x223   : > { %671 = vmatpush.msra.mxu2 %v603_v17 }
 0x224   : > { %813 = vmatmul.msk.f32.vlgmr.msra.gmra.mxu2 %vm649_vm13, %v635_v42 }
 0x22c   : > { %814 = vmatmul.msk.f32.gmra.mxu2 %vm649_vm13, %v636_v43 }
 0x2a7   : > { %v673_v45 = vpop.f32.mrf.mxu2 }
 0x2a8   : > { %v674_v46 = vadd.f32 %v673_v45, %v642_v44 }
 0x2aa   : > { %v684_v47 = vsel %vm682_vm14, %v674_v46, 0.0 }
 0x2ab   : > { %685 = vst [vmem:[%s404_s12] sm:$0xff] %v684_v47 }
 0x2af   : > { %v676_v49 = vpop.f32.mrf.mxu2 }
 0x2b0   : > { %v677_v50 = vadd.f32 %v676_v49, %v647_v48 }
 0x2b2   : > { %v686_v51 = vsel %vm682_vm14, %v677_v50, 0.0 }
 0x2b3   : > { %815 = vst [vmem:[%s404_s12 + $0x8] sm:$0xff] %v686_v51 }
 0x2b4 PF: > { %s17_s2 = sadd.s32 1, %s969_s2   ;;  %s1119_s24 = smov %s965_s1 }
 0x2b5   : > { %p14_p5 = scmp.ge.s32.totalorder %s17_s2, 4   ;;  %s1120_s1 = smov %s1122_s25 }
 0x2b7   :  { %16 = sbr.rel (!%p14_p5) target bundleno = 2 (0x2), region = 85 }

// kernel: hifigan_forward.6
= control target key start
LH: loop header
LB: loop body
LE: loop exit
PB: predicated region body
PF: predicated region fallthrough
CT: control target
= control target key end

     0   :  { %s818_s18 = smov 0   ;;  %s820_s19 = smov 0   ;;  %s947_s0 = inlined_call_operand.vmem [shape: f32[2,8,256], index: 0, kind: input, shape index: {}, may-alias: {0,1,2}]   ;;  %s948_s1 = inlined_call_operand.vmem [shape: f32[2,8,256], index: 1, kind: input, shape index: {}, may-alias: {0,1,2}]   ;;  %s949_s2 = inlined_call_operand.vmem [shape: f32[2,8,256], index: 2, kind: input, shape index: {}, may-alias: {0,1,2}]   ;;  %s950_s3 = inlined_call_operand.vmem [shape: f32[16,24], index: 3, kind: input, shape index: {}]   ;;  %s951_s4 = inlined_call_operand.vmem [shape: f32[16,1], index: 4, kind: input, shape index: {}]   ;;  %s952_s5 = inlined_call_operand.vmem [shape: f32[2,2,8,256], index: 5, kind: output, shape index: {}]  }
   0x1   :  { %s822_s20 = smov 0   ;;  %s824_s21 = smov 0  }
   0x2   :  { %s826_s22 = smov 0   ;;  %s828_s23 = smov 0  }
   0x3   :  { %s830_s24 = smov 0  }
   0x4 LB: > { %s24_s25 = sadd.s32 1, %s774_s22  ;;  %s27_s26 = sadd.s32 1, %s778_s23  ;;  %s782_s24 = sphi %s830_s24, %s15_s24   ;;  %s778_s23 = sphi %s828_s23, %s959_s23   ;;  %s774_s22 = sphi %s826_s22, %s958_s22   ;;  %s770_s21 = sphi %s824_s21, %s957_s21   ;;  %s766_s20 = sphi %s822_s20, %s956_s20   ;;  %s762_s19 = sphi %s820_s19, %s955_s19   ;;  %s758_s18 = sphi %s818_s18, %s954_s18  }
   0x5   : > { %p25_p0 = scmp.ge.s32.totalorder %s24_s25, 2  ;;  %s608_s27 = sadd.s32 4294967295, %s782_s24  }
   0x6   : > { %p184_p1 = scmp.ne.s32.totalorder %s762_s19, %s758_s18  ;;  %p185_p2 = scmp.eq.s32.totalorder %s608_s27, 3 }
   0x7   : > { %s961_s25 = smov (%p25_p0, %s24_s25), 0  ;;  %s963_s26 = smov (!%p25_p0, %s27_s26), %s778_s23 }
   0x8   : > { %s170_s28 = ssub.s32 %s774_s22, %s961_s25  ;;  %p29_p3 = scmp.ge.s32.totalorder %s963_s26, 2 }
   0x9   : > { %p614_p4 = scmp.ge.s32.totalorder %s782_s24, 1  ;;  %p864_p5 = por %p185_p2, %p184_p1 }
   0xa   : > { %p260_p6 = scmp.lt.s32.totalorder %s782_s24, 5  ;;  %s965_s26 = smov (%p29_p3, %s963_s26), 0 }
   0xb   : > { %s169_s30 = ssub.s32 %s778_s23, %s965_s26  ;;  %s174_s7 = sadd.s32 1, %s762_s19 }
   0xc   : > { %p261_p7 = pnand %p614_p4, %p260_p6  ;;  %s171_s6 = sor.u32 %s170_s28, %s169_s30 }
   0xd   : > { %p172_p8 = scmp.eq.s32.totalorder %s171_s6, 0  ;;  %p312_p9 = scmp.lt.s32.totalorder (!%p261_p7), %s770_s21, 1 }
   0xe   : > { %264 = sbr.rel (%p261_p7) target bundleno = 421 (0x1a5), region = 40  ;;  %p314_p10 = scmp.lt.s32.totalorder (!%p261_p7), %s766_s20, 1 }
   0xf   : > { %s875_s8 = scalar_select %p172_p8, %s762_s19, %s174_s7  }
  0x10   : > { %s334_s9 = sadd.s32 (!%p261_p7), 1, %s766_s20  ;;  %s784_s30 = smov (!%p261_p7), 1  }
  0x11   : > { %p335_p11 = scmp.lt.s32.totalorder (!%p261_p7), %s334_s9, 1  ;;  %p348_p12 = scmp.gt.s32.totalorder (!%p261_p7), %s766_s20, 0 }
  0x13   : > { %s313_s10 = scalar_select %p312_p9, %s770_s21, 1  ;;  %vm378_vm2 = vcmask 1031168   ;;  %v383_v17 = vld [vmem:[%s951_s4 + $0x8] sm:$0xff]  ;;  %v382_v18 = vld [vmem:[%s951_s4] sm:$0xff]  ;;  %v787_v19 = vmov 0   ;;  %vm405_vm4 = vcmask 7168   ;;  %v442_v31 = vlaneseq }
  0x14   : > { %s315_s11 = scalar_select %p314_p10, %s766_s20, 1  ;;  %721 = vset.pattern.permute.xlu0 %v787_v19  ;;  %720 = vset.pattern.permute.xlu2 %v787_v19  ;;  %v380_v29 = vld [vmem:[%s950_s3] sm:$0xff]  ;;  %vm411_vm5 = vcmask 195584   ;;  %v381_v30 = vld [vmem:[%s950_s3 + $0x8] sm:$0xff] }
  0x15   : > { %s884_s12 = sshll.u32 %s313_s10, 1  ;;  %s967_s9 = smov (!%p335_p11, %s334_s9), 1  ;;  %v443_v32 = vand.u32 127, %v442_v31 }
  0x16   : > { %s317_s13 = sadd.s32 %s884_s12, %s315_s11  ;;  %s969_s9 = smov (!%p335_p11, %s967_s9), 1 }
  0x17   : > { %s617_s14 = sshll.u32 %s317_s13, 3  ;;  %s342_s27 = sadd.s32 %s884_s12, %s969_s9 }
  0x18   : > { %s319_s17 = scalar_lea.vmem %s947_s0, %s617_s14  ;;  %s630_s28 = sshll.u32 %s342_s27, 3 }
  0x19   : > { %v360_v0 = vld [vmem:[%s319_s17] sm:$0xff]  ;;  %s344_s10 = scalar_lea.vmem %s949_s2, %s630_s28  ;;  %s785_s9 = smov 126  }
  0x1a   : > { %vm362_vm0 = vcmp.ge.f32.partialorder %v360_v0, 0.0  ;;  %v365_v1 = vmul.f32 0.1, %v360_v0  ;;  %s723_s11 = scalar_select %p314_p10, 255, 0 }
  0x1b   : > { %s786_s13 = smov 127   ;;  %s618_s14 = sadd.s32 4294967295, %s766_s20 }
  0x1c   : > { %v368_v2 = vsel %vm362_vm0, %v360_v0, %v365_v1  ;;  %v724_v3 = vld [vmem:[%s344_s10] sm:%s723_s11]  ;;  %p321_p13 = scmp.gt.s32.totalorder %s618_s14, 0  ;;  %p619_p0 = scmp.lt.s32.totalorder %s618_s14, 1 }
  0x1d   : > { %397 = vrot.lane.b32.xlu2 %v368_v2, %s784_s30  ;;  %vm363_vm1 = vcmp.ge.f32.partialorder %v724_v3, 0.0  ;;  %v366_v4 = vmul.f32 0.1, %v724_v3  ;;  %s726_s17 = scalar_select %p348_p12, 255, 0 }
  0x1e   : > { %s971_s14 = smov (!%p321_p13, %s618_s14), 0 }
  0x1f   : > { %v369_v5 = vsel %vm363_vm1, %v724_v3, %v366_v4  ;;  %s973_s14 = smov (!%p619_p0, %s971_s14), 1 }
  0x20   : > { %v705_v6 = vpack.i.bf16 %v369_v5, %v368_v2  ;;  %s328_s15 = sadd.s32 %s973_s14, %s884_s12 }
  0x21   : > { %s625_s16 = sshll.u32 %s328_s15, 3  ;;  %s633_s15 = sshll.u32 %s766_s20, 7 }
  0x22   : > { %706 = vrot.lane.b32.xlu0 %v705_v6, %s785_s9  ;;  %s330_s6 = scalar_lea.vmem %s948_s1, %s625_s16  ;;  %v444_v33 = vstv %s633_s15  ;;  %s309_s16 = sand.u32 1, %s758_s18  }
  0x23   : > { %v727_v8 = vld [vmem:[%s330_s6] sm:%s726_s17]  ;;  %v445_v34 = vadd.s32 %v444_v33, %v443_v32  ;;  %s615_s17 = sshll.u32 %s309_s16, 4  ;;  %s636_s18 = sshll.u32 (%p864_p5), %s770_s21, 2 }
  0x24   : > { %v364_v12 = vmul.f32 0.1, %v727_v8  ;;  %vm361_vm3 = vcmp.ge.f32.partialorder %v727_v8, 0.0  ;;  %s311_s27 = scalar_lea.vmem [#allocation2], %s615_s17  ;;  %s462_s28 = sadd.s32 (%p864_p5), %s766_s20, %s636_s18 }
  0x25   : > { %386 = vperm.xlu2 %720, %v382_v18   ;;  %vm446_vm6 = vcmp.ge.s32.totalorder %v445_v34, 0  ;;  %vm447_vm7 = vcmp.lt.s32.totalorder %v445_v34, 32  ;;  %s637_s6 = sshll.u32 (%p864_p5), %s462_s28, 3 }
  0x26   : > { %v367_v14 = vsel %vm361_vm3, %v727_v8, %v364_v12  ;;  %vm448_vm8 = vmand %vm446_vm6, %vm447_vm7  ;;  %s464_s10 = scalar_lea.vmem (%p864_p5), %s952_s5, %s637_s6 }
  0x2a   : > { %371 = vrot.lane.b32.xlu0 %v368_v2, %s786_s13 }
  0x32   : > { %391 = vperm.xlu0 %721, %v383_v17  }
  0x77   : > { %v398_v25 = vpop.permute.xlu2 %397 }
  0x7f   : > { %v387_v35 = vpop.permute.xlu2 %386 }
  0x94   : > { %v707_v7 = vpop.permute.xlu0 %706 }
  0x95   : > { %v709_v9 = vunpack.i.h.bf16 %v707_v7  ;;  %v708_v10 = vunpack.i.l.bf16 %v707_v7 }
  0x97   : > { %v379_v11 = vsel %vm378_vm2, %v708_v10, %v709_v9 }
  0x98   : > { %v710_v13 = vpack.i.bf16 %v379_v11, %v708_v10 }
  0x9a   : > { %711 = vrot.lane.b32.xlu1 %v710_v13, %s784_s30 }
  0x9c   : > { %v372_v15 = vpop.permute.xlu0 %371 }
  0x9d   : > { %v715_v16 = vpack.i.bf16 %v367_v14, %v372_v15 }
  0xa2   : > { %716 = vrot.lane.b32.xlu1 %v715_v16, %s784_s30 }
  0xa4   : > { %v392_v36 = vpop.permute.xlu0 %391 }
 0x10c   : > { %v712_v20 = vpop.permute.xlu1 %711 }
 0x10d   : > { %v714_v21 = vunpack.i.h.bf16 %v712_v20  ;;  %v713_v22 = vunpack.i.l.bf16 %v712_v20 }
 0x10f   : > { %v407_v23 = vsel %vm405_vm4, %v713_v22, %v714_v21 }
 0x110   : > { %431 = vmatpush.msra.mxu0 %v407_v23  ;;  %642 = vmatpush.msra.mxu1 %v407_v23 }
 0x114   : > { %v717_v24 = vpop.permute.xlu1 %716 }
 0x115   : > { %v719_v26 = vunpack.i.h.bf16 %v717_v24  ;;  %v718_v27 = vunpack.i.l.bf16 %v717_v24 }
 0x117   : > { %432 = vmatpush.msra.mxu0 %v718_v27  ;;  %643 = vmatpush.msra.mxu1 %v718_v27  ;;  %v406_v28 = vsel %vm405_vm4, %v719_v26, %v398_v25 }
 0x119   : > { %433 = vmatpush.msra.mxu0 %v406_v28  ;;  %644 = vmatpush.msra.mxu1 %v406_v28 }
 0x11a   : > { %631 = vmatmul.msk.f32.vlgmr.msra.gmra.mxu0 %vm411_vm5, %v380_v29  ;;  %632 = vmatmul.msk.f32.vlgmr.msra.gmra.mxu1 %vm411_vm5, %v381_v30 }
 0x197   : > { %v435_v37 = vpop.f32.mrf.mxu0  ;;  %v438_v38 = vpop.f32.mrf.mxu1 }
 0x198   : > { %v436_v39 = vadd.f32 %v435_v37, %v387_v35  ;;  %v439_v40 = vadd.f32 %v438_v38, %v392_v36  ;;  %460 = sbr.rel (!%p864_p5) target bundleno = 421 (0x1a5), region = 44 }
 0x19a   : > { %v449_v41 = vsel %vm448_vm8, %v436_v39, 0.0  ;;  %v451_v42 = vsel %vm448_vm8, %v439_v40, 0.0 }
 0x19b   : > { %450 = vst [vmem:[%s311_s27] sm:$0xff] %v449_v41 }
 0x19c   : > { %634 = vst [vmem:[%s311_s27 + $0x8] sm:$0xff] %v451_v42 }
 0x1a2   : > { %v495_v43 = vld [vmem:[%s311_s27] sm:$0xff] }
 0x1a3   : > { %v497_v44 = vld [vmem:[%s311_s27 + $0x8] sm:$0xff]  ;;  %496 = vst [vmem:[%s464_s10] sm:$0xff] %v495_v43 }
 0x1a4   : > { %498 = vst [vmem:[%s464_s10 + $0x10] sm:$0xff] %v497_v44 }
 0x1a5 PF: > { %s15_s24 = sadd.s32 1, %s782_s24   ;;  %s954_s18 = smov %s762_s19 }
 0x1a6   : > { %p12_p1 = scmp.ge.s32.totalorder %s15_s24, 6   ;;  %s955_s19 = smov %s875_s8 }
 0x1a7   : > { %s956_s20 = smov %s774_s22  ;;  %s957_s21 = smov %s778_s23 }
 0x1a8   : > { %s958_s22 = smov %s961_s25  ;;  %s959_s23 = smov %s965_s26 }
 0x1a9   :  { %14 = sbr.rel (!%p12_p1) target bundleno = 4 (0x4), region = 115 }

// kernel: hifigan_forward.5
= control target key start
LH: loop header
LB: loop body
LE: loop exit
PB: predicated region body
PF: predicated region fallthrough
CT: control target
= control target key end

     0   :  { %s2306_s17 = smov 0   ;;  %s2308_s18 = smov 0   ;;  %s2754_s0 = inlined_call_operand.vmem [shape: f32[2,8,256], index: 0, kind: input, shape index: {}, may-alias: {0,1,2}]   ;;  %s2755_s1 = inlined_call_operand.vmem [shape: f32[2,8,256], index: 1, kind: input, shape index: {}, may-alias: {0,1,2}]   ;;  %s2756_s2 = inlined_call_operand.vmem [shape: f32[2,8,256], index: 2, kind: input, shape index: {}, may-alias: {0,1,2}]   ;;  %s2757_s3 = inlined_call_operand.vmem [shape: f32[3,8,24], index: 3, kind: input, shape index: {}]   ;;  %s2758_s4 = inlined_call_operand.vmem [shape: f32[3,8,1], index: 4, kind: input, shape index: {}]   ;;  %s2759_s5 = inlined_call_operand.vmem [shape: f32[3,8,24], index: 5, kind: input, shape index: {}]   ;;  %s2760_s6 = inlined_call_operand.vmem [shape: f32[3,8,1], index: 6, kind: input, shape index: {}]   ;;  %s2761_s7 = inlined_call_operand.vmem [shape: f32[3,8,40], index: 7, kind: input, shape index: {}]   ;;  %s2762_s8 = inlined_call_operand.vmem [shape: f32[3,8,1], index: 8, kind: input, shape index: {}]   ;;  %s2763_s9 = inlined_call_operand.vmem [shape: f32[3,8,40], index: 9, kind: input, shape index: {}]   ;;  %s2764_s10 = inlined_call_operand.vmem [shape: f32[3,8,1], index: 10, kind: input, shape index: {}]   ;;  %s2765_s11 = inlined_call_operand.vmem [shape: f32[2,8,256], index: 11, kind: output, shape index: {}]  }
   0x1   :  { %s2310_s19 = smov 0   ;;  %s2312_s20 = smov 0  }
   0x2   :  { %s2314_s21 = smov 0  }
   0x3 LB: > { %s30_s22 = sadd.s32 1, %s2219_s19  ;;  %s33_s23 = sadd.s32 1, %s2223_s20  ;;  %s2227_s21 = sphi %s2314_s21, %s21_s21   ;;  %s2223_s20 = sphi %s2312_s20, %s2776_s20   ;;  %s2219_s19 = sphi %s2310_s19, %s2775_s19   ;;  %s2215_s18 = sphi %s2308_s18, %s2774_s18   ;;  %s2211_s17 = sphi %s2306_s17, %s2773_s17  }
   0x4   : > { %p31_p0 = scmp.ge.s32.totalorder %s30_s22, 2  ;;  %p1867_p1 = scmp.ge.s32.totalorder %s2227_s21, 1 }
   0x5   : > { %p410_p2 = scmp.lt.s32.totalorder %s2227_s21, 5 }
   0x6   : > { %s2778_s22 = smov (%p31_p0, %s30_s22), 0  ;;  %s2780_s23 = smov (!%p31_p0, %s33_s23), %s2223_s20 }
   0x7   : > { %p411_p3 = pnand %p1867_p1, %p410_p2  ;;  %p35_p4 = scmp.ge.s32.totalorder %s2780_s23, 2 }
   0x8   : > { %p478_p5 = scmp.lt.s32.totalorder (!%p411_p3), %s2215_s18, 1  ;;  %p480_p6 = scmp.lt.s32.totalorder (!%p411_p3), %s2211_s17, 1 }
   0x9   : > { %s2782_s23 = smov (%p35_p4, %s2780_s23), 0  ;;  %414 = sbr.rel (%p411_p3) target bundleno = 2793 (0xae9), region = 64 }
   0xa   : > { %s1870_s24 = sadd.s32 (!%p411_p3), 4294967295, %s2211_s17  ;;  %p522_p8 = scmp.gt.s32.totalorder (!%p411_p3), %s2211_s17, 0 }
   0xb   : > { %p487_p7 = scmp.gt.s32.totalorder (!%p411_p3), %s1870_s24, 0  ;;  %p1871_p9 = scmp.lt.s32.totalorder (!%p411_p3), %s1870_s24, 1 }
   0xc   : > { %s500_s13 = sadd.s32 (!%p411_p3), 1, %s2211_s17  ;;  %s2230_s16 = smov (!%p411_p3), 126  }
   0xd   : > { %p501_p10 = scmp.lt.s32.totalorder (!%p411_p3), %s500_s13, 1 }
   0xe   : > { %s2784_s18 = smov (!%p478_p5, %s2215_s18), 1  ;;  %s2786_s24 = smov (!%p487_p7, %s1870_s24), 0  ;;  %vm564_vm3 = vcmask 1031168   ;;  %vm555_vm4 = vcmask 1039360   ;;  %vm590_vm5 = vcmask 97280   ;;  %v545_v26 = vld [vmem:[%s2758_s4] sm:$0xff]  ;;  %v649_v47 = vlaneseq }
   0xf   : > { %s481_s25 = scalar_select %p480_p6, %s2211_s17, 1  ;;  %v2232_v29 = vmov 0   ;;  %v544_v39 = vld [vmem:[%s2757_s3] sm:$0xff]  ;;  %vm603_vm6 = vcmask 195584  }
  0x10   : > { %s1868_s26 = sshll.u32 %s2784_s18, 1  ;;  %s2788_s24 = smov (!%p1871_p9, %s2786_s24), 1  ;;  %2015 = vset.pattern.permute.xlu0 %v2232_v29  ;;  %2026 = vset.pattern.permute.xlu1 %v2232_v29  ;;  %v2427_v48 = vand.u32 127, %v649_v47 }
  0x11   : > { %s483_s27 = sadd.s32 %s1868_s26, %s481_s25  ;;  %s494_s14 = sadd.s32 %s2788_s24, %s1868_s26  ;;  %2117 = vset.pattern.permute.xlu2 %v2232_v29 }
  0x12   : > { %s2344_s28 = sshll.u32 %s483_s27, 3  ;;  %s1877_s15 = sshll.u32 %s494_s14, 3  ;;  %v2431_v51 = vadd.s32 128, %v2427_v48 }
  0x13   : > { %s485_s12 = scalar_lea.vmem %s2754_s0, %s2344_s28  ;;  %s496_s25 = scalar_lea.vmem %s2755_s1, %s1877_s15 }
  0x14   : > { %v2350_v0 = vld [vmem:[%s485_s12] sm:$0xff]  ;;  %s2184_s27 = scalar_select %p522_p8, 255, 0 }
  0x15   : > { %v539_v1 = vmul.f32 0.1, %v2350_v0  ;;  %vm536_vm0 = vcmp.ge.f32.partialorder %v2350_v0, 0.0  ;;  %s2790_s13 = smov (!%p501_p10, %s500_s13), 1  ;;  %s2229_s15 = smov 127  }
  0x16   : > { %v2358_v2 = vld [vmem:[%s496_s25] sm:%s2184_s27]  ;;  %s2792_s13 = smov (!%p501_p10, %s2790_s13), 1  ;;  %s2235_s12 = smov 122  }
  0x17   : > { %vm535_vm1 = vcmp.ge.f32.partialorder %v2358_v2, 0.0  ;;  %v538_v3 = vmul.f32 0.1, %v2358_v2  ;;  %v542_v4 = vsel %vm536_vm0, %v2350_v0, %v539_v1  ;;  %s508_s24 = sadd.s32 %s1868_s26, %s2792_s13  ;;  %s2231_s26 = smov 12  }
  0x18   : > { %s1882_s29 = sshll.u32 %s508_s24, 3  ;;  %s2237_s25 = smov 24  }
  0x19   : > { %v541_v5 = vsel %vm535_vm1, %v2358_v2, %v538_v3  ;;  %s510_s14 = scalar_lea.vmem %s2756_s2, %s1882_s29  ;;  %s2424_s29 = sshll.u32 %s2211_s17, 7  ;;  %v670_v3 = vld [vmem:[%s2760_s6] sm:$0xff] }
  0x1a   : > { %v2364_v6 = vpack.i.bf16 %v542_v4, %v541_v5  ;;  %s2187_s18 = scalar_select %p480_p6, 255, 0  ;;  %v1891_v4 = vld [vmem:[%s2758_s4 + $0x8] sm:$0xff] }
  0x1b   : > { %s648_s30 = sadd.s32 4294967285, %s2424_s29  ;;  %s2233_s17 = smov 10   ;;  %v1895_v5 = vld [vmem:[%s2760_s6 + $0x8] sm:$0xff] }
  0x1c   : > { %1991 = vrot.lane.b32.xlu1 %v2364_v6, %s2229_s15  ;;  %1986 = vrot.lane.b32.xlu0 %v2364_v6, %s2230_s16  ;;  %v2375_v7 = vld [vmem:[%s510_s14] sm:%s2187_s18]  ;;  %s2236_s14 = smov 124   ;;  %s839_s13 = sadd.s32 4294967289, %s2424_s29 }
  0x1d   : > { %vm537_vm2 = vcmp.ge.f32.partialorder %v2375_v7, 0.0  ;;  %v540_v8 = vmul.f32 0.1, %v2375_v7  ;;  %v652_v49 = vstv %s648_s30  ;;  %s735_s30 = sadd.s32 4294967286, %s2424_s29  ;;  %s2239_s27 = smov 118  }
  0x1e   : > { %v653_v50 = vadd.s32 %v652_v49, %v2427_v48  ;;  %v654_v54 = vadd.s32 %v652_v49, %v2431_v51  ;;  %s1222_s18 = sadd.s32 4294967274, %s2424_s29  ;;  %s1320_s24 = sadd.s32 4294967276, %s2424_s29 }
  0x1f   : > { %v2380_v9 = vsel %vm537_vm2, %v2375_v7, %v540_v8 }
  0x20   : > { %vm655_vm7 = vcmp.ge.s32.totalorder %v653_v50, 0  ;;  %vm657_vm8 = vcmp.lt.s32.totalorder %v653_v50, 32  ;;  %vm656_vm10 = vcmp.ge.s32.totalorder %v654_v54, 0  ;;  %vm658_vm11 = vcmp.lt.s32.totalorder %v654_v54, 32 }
  0x21   : > { %vm659_vm9 = vmand %vm655_vm7, %vm657_vm8 }
  0x22   : > { %vm660_vm12 = vmand %vm656_vm10, %vm658_vm11  ;;  %vm2768_vm11 = vcmask 998400  }
  0x24   : > { %553 = vrot.lane.b32.xlu1 %v2380_v9, %s2229_s15  ;;  %562 = vrot.lane.b32.xlu0 %v2380_v9, %s2230_s16 }
  0x2c   : > { %1996 = vrot.lane.b32.xlu0 %v2364_v6, %s2231_s26 }
  0x34   : > { %569 = vperm.xlu0 %2015, %v545_v26  }
  0x3c   : > { %752 = vrot.lane.b32.xlu0 %v2350_v0, %s2233_s17 }
  0x8e   : > { %v1992_v10 = vpop.permute.xlu1 %1991  ;;  %v1987_v11 = vpop.permute.xlu0 %1986 }
  0x8f   : > { %v1989_v12 = vunpack.i.h.bf16 %v1987_v11  ;;  %v1988_v13 = vunpack.i.l.bf16 %v1987_v11  ;;  %v1994_v20 = vunpack.i.h.bf16 %v1992_v10  ;;  %v1993_v21 = vunpack.i.l.bf16 %v1992_v10 }
  0x91   : > { %v565_v17 = vsel %vm564_vm3, %v1988_v13, %v1989_v12  ;;  %v2404_v23 = vsel %vm555_vm4, %v1993_v21, %v1994_v20 }
  0x96   : > { %v2387_v14 = vpop.permute.xlu1 %553  ;;  %v2389_v15 = vpop.permute.xlu0 %562 }
  0x97   : > { %v2000_v16 = vpack.i.bf16 %v2387_v14, %v2389_v15  ;;  %v566_v18 = vsel %vm564_vm3, %v1989_v12, %v2389_v15  ;;  %v2401_v22 = vsel %vm555_vm4, %v1994_v20, %v2387_v14  ;;  %v669_v20 = vld [vmem:[%s2759_s5] sm:$0xff] }
  0x98   : > { %v2396_v19 = vpack.i.bf16 %v566_v18, %v565_v17  ;;  %v2010_v24 = vpack.i.bf16 %v2401_v22, %v2404_v23 }
  0x99   : > { %2001 = vrot.lane.b32.xlu1 %v2000_v16, %s2231_s26 }
  0x9a   : > { %2006 = vrot.lane.b32.xlu2 %v2396_v19, %s2231_s26 }
  0x9e   : > { %v1997_v31 = vpop.permute.xlu0 %1996 }
  0x9f   : > { %v1999_v32 = vunpack.i.h.bf16 %v1997_v31  ;;  %v1998_v33 = vunpack.i.l.bf16 %v1997_v31 }
  0xa1   : > { %v591_v38 = vsel %vm590_vm5, %v1998_v33, %v1999_v32 }
  0xa2   : > { %2011 = vrot.lane.b32.xlu2 %v2010_v24, %s2231_s26  ;;  %v736_v24 = vstv %s735_s30  ;;  %s1025_s30 = sadd.s32 4294967295, %s2424_s29 }
  0xa3   : > { %v737_v26 = vadd.s32 %v736_v24, %v2427_v48 }
  0xa5   : > { %vm739_vm1 = vcmp.ge.s32.totalorder %v737_v26, 0  ;;  %vm741_vm2 = vcmp.lt.s32.totalorder %v737_v26, 32 }
  0xa6   : > { %v570_v52 = vpop.permute.xlu0 %569  ;;  %vm743_vm8 = vmand %vm739_vm1, %vm741_vm2 }
  0xaa   : > { %576 = vrot.lane.b32.xlu2 %v2380_v9, %s2231_s26  ;;  %s925_s26 = sadd.s32 4294967290, %s2424_s29 }
  0xf4   : > { %v2007_v25 = vpop.permute.xlu2 %2006 }
  0xf5   : > { %v2009_v27 = vunpack.i.h.bf16 %v2007_v25  ;;  %v2008_v28 = vunpack.i.l.bf16 %v2007_v25  ;;  %v738_v25 = vadd.s32 %v736_v24, %v2431_v51 }
  0xf7   : > { %v595_v30 = vsel %vm590_vm5, %v2008_v28, %v2009_v27  ;;  %vm740_vm15 = vcmp.ge.s32.totalorder %v738_v25, 0  ;;  %vm742_vm0 = vcmp.lt.s32.totalorder %v738_v25, 32 }
  0xf8   : > { %620 = vmatpush.msra.mxu2 %v595_v30  ;;  %vm744_vm7 = vmand %vm740_vm15, %vm742_vm0 }
  0xfc   : > { %v2012_v34 = vpop.permute.xlu2 %2011 }
  0xfd   : > { %v2014_v35 = vunpack.i.h.bf16 %v2012_v34  ;;  %v2013_v36 = vunpack.i.l.bf16 %v2012_v34 }
  0xff   : > { %v593_v37 = vsel %vm590_vm5, %v2013_v36, %v2014_v35 }
 0x100   : > { %621 = vmatpush.msra.mxu2 %v593_v37 }
 0x102   : > { %622 = vmatpush.msra.mxu2 %v591_v38 }
 0x103   : > { %1885 = vmatmul.msk.f32.vlgmr.msra.gmra.mxu2 %vm603_vm6, %v544_v39 }
 0x104   : > { %v577_v44 = vpop.permute.xlu2 %576 }
 0x105   : > { %v592_v46 = vsel %vm590_vm5, %v1999_v32, %v577_v44 }
 0x10b   : > { %v2002_v40 = vpop.permute.xlu1 %2001 }
 0x10c   : > { %v2004_v41 = vunpack.i.h.bf16 %v2002_v40  ;;  %v2003_v42 = vunpack.i.l.bf16 %v2002_v40 }
 0x10e   : > { %v596_v43 = vsel %vm590_vm5, %v2009_v27, %v2003_v42  ;;  %v594_v45 = vsel %vm590_vm5, %v2014_v35, %v2004_v41  ;;  %vm756_vm5 = vcmask 80896   ;;  %v753_v27 = vpop.permute.xlu0 %752 }
 0x10f   : > { %640 = vmatpush.msra.mxu1 %v596_v43 }
 0x111   : > { %641 = vmatpush.msra.mxu1 %v594_v45 }
 0x113   : > { %642 = vmatpush.msra.mxu1 %v592_v46 }
 0x114   : > { %1886 = vmatmul.msk.f32.vlgmr.msra.gmra.mxu1 %vm603_vm6, %v544_v39 }
 0x186   : > { %v624_v53 = vpop.f32.mrf.mxu2 }
 0x187   : > { %v625_v55 = vadd.f32 %v624_v53, %v570_v52 }
 0x189   : > { %v661_v56 = vsel %vm659_vm9, %v625_v55, 0.0  ;;  %v1890_v55 = vld [vmem:[%s2757_s3 + $0x8] sm:$0xff] }
 0x18a   : > { %v665_v59 = vmul.f32 0.1, %v661_v56  ;;  %vm663_vm13 = vcmp.ge.f32.partialorder %v661_v56, 0.0 }
 0x18c   : > { %v667_v62 = vsel %vm663_vm13, %v661_v56, %v665_v59  ;;  %v840_v56 = vstv %s839_s13  ;;  %s2238_s13 = smov 123  }
 0x191   : > { %v644_v57 = vpop.f32.mrf.mxu1 }
 0x192   : > { %v645_v58 = vadd.f32 %v644_v57, %v570_v52  ;;  %v842_v57 = vadd.s32 %v840_v56, %v2431_v51 }
 0x194   : > { %v662_v60 = vsel %vm660_vm12, %v645_v58, 0.0  ;;  %vm779_vm12 = vcmask 1022976   ;;  %v841_v58 = vadd.s32 %v840_v56, %v2427_v48  ;;  %vm844_vm13 = vcmp.ge.s32.totalorder %v842_v57, 0 }
 0x195   : > { %vm664_vm14 = vcmp.ge.f32.partialorder %v662_v60, 0.0  ;;  %v666_v61 = vmul.f32 0.1, %v662_v60 }
 0x196   : > { %vm843_vm15 = vcmp.ge.s32.totalorder %v841_v58, 0  ;;  %vm845_vm0 = vcmp.lt.s32.totalorder %v841_v58, 32 }
 0x197   : > { %v668_v63 = vsel %vm664_vm14, %v662_v60, %v666_v61  ;;  %vm846_vm14 = vcmp.lt.s32.totalorder %v842_v57, 32  ;;  %vm847_vm2 = vmand %vm843_vm15, %vm845_vm0 }
 0x198   : > { %v2021_v1 = vpack.i.bf16 %v668_v63, %v667_v62  ;;  %vm848_vm1 = vmand %vm844_vm13, %vm846_vm14 }
 0x19a   : > { %2022 = vrot.lane.b32.xlu2 %v2021_v1, %s2229_s15  ;;  %2017 = vrot.lane.b32.xlu1 %v2021_v1, %s2230_s16 }
 0x1a2   : > { %750 = vrot.lane.b32.xlu2 %v2358_v2, %s2233_s17  ;;  %689 = vperm.xlu1 %2026, %v670_v3  }
 0x1aa   : > { %754 = vrot.lane.b32.xlu1 %v2375_v7, %s2233_s17  ;;  %s2234_s17 = smov 125  }
 0x1b2   : > { %793 = vperm.xlu1 %2026, %v1891_v4  }
 0x1ba   : > { %879 = vperm.xlu1 %2026, %v1895_v5  }
 0x1c2   : > { %2048 = vrot.lane.b32.xlu1 %v2364_v6, %s2236_s14 }
 0x1ca   : > { %1111 = vrot.lane.b32.xlu1 %v2380_v9, %s2234_s17 }
 0x1f4   : > { %v2023_v8 = vpop.permute.xlu2 %2022 }
 0x1f5   : > { %v2024_v11 = vunpack.i.l.bf16 %v2023_v8  ;;  %v2025_v16 = vunpack.i.h.bf16 %v2023_v8 }
 0x1f7   : > { %v677_v18 = vsel %vm555_vm4, %v2024_v11, %v2025_v16 }
 0x1fc   : > { %v751_v28 = vpop.permute.xlu2 %750 }
 0x1fd   : > { %v757_v35 = vsel %vm756_vm5, %v751_v28, %v753_v27 }
 0x20c   : > { %v2018_v10 = vpop.permute.xlu1 %2017 }
 0x20d   : > { %v2019_v12 = vunpack.i.l.bf16 %v2018_v10  ;;  %v2020_v13 = vunpack.i.h.bf16 %v2018_v10 }
 0x20f   : > { %728 = vmatpush.msra.mxu3 %v2020_v13  ;;  %v684_v17 = vsel %vm564_vm3, %v2019_v12, %v2020_v13 }
 0x210   : > { %708 = vmatpush.msrb.mxu2 %v684_v17 }
 0x211   : > { %729 = vmatpush.msra.mxu3 %v2025_v16 }
 0x212   : > { %709 = vmatpush.msrb.mxu2 %v677_v18 }
 0x213   : > { %730 = vmatpush.msra.mxu3 %v668_v63 }
 0x214   : > { %710 = vmatpush.msrb.mxu2 %v667_v62  ;;  %1889 = vmatmul.msk.f32.vlgmr.msra.gmra.mxu3 %vm603_vm6, %v669_v20  ;;  %v690_v21 = vpop.permute.xlu1 %689 }
 0x215   : > { %1888 = vmatmul.msk.f32.vlgmr.msrb.gmra.mxu2 %vm603_vm6, %v669_v20 }
 0x21c   : > { %v755_v29 = vpop.permute.xlu1 %754 }
 0x21d   : > { %v758_v33 = vsel %vm756_vm5, %v753_v27, %v755_v29 }
 0x224   : > { %v794_v59 = vpop.permute.xlu1 %793 }
 0x22c   : > { %v2482_v12 = vpop.permute.xlu1 %879 }
 0x297   : > { %v732_v30 = vpop.f32.mrf.mxu3 }
 0x298   : > { %v733_v31 = vadd.f32 %v732_v30, %v690_v21  ;;  %v712_v32 = vpop.f32.mrf.mxu2 }
 0x299   : > { %v713_v34 = vadd.f32 %v712_v32, %v690_v21  ;;  %v2049_v21 = vpop.permute.xlu1 %2048 }
 0x29a   : > { %v746_v36 = vsel %vm744_vm7, %v733_v31, 0.0  ;;  %v2051_v24 = vunpack.i.h.bf16 %v2049_v21  ;;  %v2050_v25 = vunpack.i.l.bf16 %v2049_v21  ;;  %v1899_v21 = vld [vmem:[%s2758_s4 + $0x10] sm:$0xff] }
 0x29b   : > { %v745_v37 = vsel %vm743_vm8, %v713_v34, 0.0  ;;  %v762_v38 = vadd.f32 %v758_v33, %v746_v36  ;;  %vm943_vm8 = vcmask 1014784   ;;  %v1894_v34 = vld [vmem:[%s2759_s5 + $0x8] sm:$0xff] }
 0x29c   : > { %v761_v39 = vadd.f32 %v757_v35, %v745_v37  ;;  %v1121_v26 = vsel %vm943_vm8, %v2050_v25, %v2051_v24 }
 0x29d   : > { %vm764_vm9 = vcmp.ge.f32.partialorder %v762_v38, 0.0  ;;  %v766_v40 = vmul.f32 0.1, %v762_v38 }
 0x29e   : > { %vm763_vm10 = vcmp.ge.f32.partialorder %v761_v39, 0.0  ;;  %v765_v41 = vmul.f32 0.1, %v761_v39 }
 0x29f   : > { %v768_v42 = vsel %vm764_vm9, %v762_v38, %v766_v40 }
 0x2a0   : > { %v767_v43 = vsel %vm763_vm10, %v761_v39, %v765_v41 }
 0x2a1   : > { %v2032_v44 = vpack.i.bf16 %v768_v42, %v767_v43  ;;  %v1112_v37 = vpop.permute.xlu1 %1111 }
 0x2a3   : > { %2033 = vrot.lane.b32.xlu0 %v2032_v44, %s2234_s17  ;;  %2028 = vrot.lane.b32.xlu2 %v2032_v44, %s2235_s12 }
 0x2fd   : > { %v2029_v45 = vpop.permute.xlu2 %2028 }
 0x2fe   : > { %v2030_v46 = vunpack.i.l.bf16 %v2029_v45  ;;  %v2031_v47 = vunpack.i.h.bf16 %v2029_v45 }
 0x300   : > { %832 = vmatpush.msrb.mxu1 %v2031_v47  ;;  %v788_v49 = vsel %vm2768_vm11, %v2030_v46, %v2031_v47  ;;  %v926_v47 = vstv %s925_s26 }
 0x301   : > { %812 = vmatpush.msra.mxu0 %v788_v49  ;;  %v928_v49 = vadd.s32 %v926_v47, %v2431_v51 }
 0x303   : > { %vm930_vm9 = vcmp.ge.s32.totalorder %v928_v49, 0  ;;  %vm932_vm10 = vcmp.lt.s32.totalorder %v928_v49, 32 }
 0x304   : > { %vm934_vm15 = vmand %vm930_vm9, %vm932_vm10  ;;  %vm1178_vm9 = vcmask 326656  }
 0x315   : > { %v2034_v50 = vpop.permute.xlu0 %2033 }
 0x316   : > { %v2035_v52 = vunpack.i.l.bf16 %v2034_v50  ;;  %v2036_v53 = vunpack.i.h.bf16 %v2034_v50  ;;  %v927_v50 = vadd.s32 %v926_v47, %v2427_v48 }
 0x318   : > { %833 = vmatpush.msrb.mxu1 %v2036_v53  ;;  %v780_v54 = vsel %vm779_vm12, %v2035_v52, %v2036_v53  ;;  %vm929_vm13 = vcmp.ge.s32.totalorder %v927_v50, 0  ;;  %vm931_vm14 = vcmp.lt.s32.totalorder %v927_v50, 32 }
 0x319   : > { %813 = vmatpush.msra.mxu0 %v780_v54  ;;  %vm933_vm0 = vmand %vm929_vm13, %vm931_vm14 }
 0x31a   : > { %834 = vmatpush.msrb.mxu1 %v768_v42 }
 0x31b   : > { %814 = vmatpush.msra.mxu0 %v767_v43  ;;  %1893 = vmatmul.msk.f32.vlgmr.msrb.gmra.mxu1 %vm603_vm6, %v1890_v55 }
 0x31c   : > { %1892 = vmatmul.msk.f32.vlgmr.msra.gmra.mxu0 %vm603_vm6, %v1890_v55 }
 0x398   : > { %v836_v60 = vpop.f32.mrf.mxu1 }
 0x399   : > { %v837_v61 = vadd.f32 %v836_v60, %v794_v59  ;;  %v816_v62 = vpop.f32.mrf.mxu0 }
 0x39a   : > { %v817_v63 = vadd.f32 %v816_v62, %v794_v59 }
 0x39b   : > { %v850_v1 = vsel %vm848_vm1, %v837_v61, 0.0 }
 0x39c   : > { %vm852_vm5 = vcmp.ge.f32.partialorder %v850_v1, 0.0  ;;  %v854_v3 = vmul.f32 0.1, %v850_v1  ;;  %v849_v4 = vsel %vm847_vm2, %v817_v63, 0.0 }
 0x39d   : > { %vm851_vm7 = vcmp.ge.f32.partialorder %v849_v4, 0.0  ;;  %v853_v5 = vmul.f32 0.1, %v849_v4 }
 0x39e   : > { %v856_v8 = vsel %vm852_vm5, %v850_v1, %v854_v3  ;;  %vm2767_vm5 = vcmask 965632  }
 0x39f   : > { %v855_v10 = vsel %vm851_vm7, %v849_v4, %v853_v5  ;;  %vm2766_vm7 = vcmask 1006592  }
 0x3a0   : > { %v2042_v11 = vpack.i.bf16 %v856_v8, %v855_v10 }
 0x3a2   : > { %2043 = vrot.lane.b32.xlu0 %v2042_v11, %s2229_s15  ;;  %2038 = vrot.lane.b32.xlu2 %v2042_v11, %s2230_s16 }
 0x3aa   : > { %941 = vrot.lane.b32.xlu0 %v762_v38, %s2236_s14  ;;  %939 = vrot.lane.b32.xlu2 %v761_v39, %s2236_s14 }
 0x3b2   : > { %2053 = vrot.lane.b32.xlu0 %v2364_v6, %s2234_s17  ;;  %1119 = vrot.lane.b32.xlu2 %v2380_v9, %s2236_s14 }
 0x3fc   : > { %v2039_v13 = vpop.permute.xlu2 %2038 }
 0x3fd   : > { %v2040_v16 = vunpack.i.l.bf16 %v2039_v13  ;;  %v2041_v17 = vunpack.i.h.bf16 %v2039_v13 }
 0x3ff   : > { %918 = vmatpush.msrb.mxu3 %v2041_v17  ;;  %v874_v18 = vsel %vm564_vm3, %v2040_v16, %v2041_v17 }
 0x400   : > { %898 = vmatpush.msra.mxu2 %v874_v18  ;;  %v2092_v18 = vpack.i.bf16 %v2387_v14, %v2401_v22 }
 0x404   : > { %v2485_v20 = vpop.permute.xlu2 %939 }
 0x40c   : > { %v1120_v27 = vpop.permute.xlu2 %1119 }
 0x40d   : > { %v1122_v28 = vsel %vm943_vm8, %v2051_v24, %v1120_v27 }
 0x40e   : > { %v2057_v29 = vpack.i.bf16 %v1122_v28, %v1121_v26 }
 0x410   : > { %2058 = vrot.lane.b32.xlu1 %v2057_v29, %s2237_s25 }
 0x414   : > { %v2044_v30 = vpop.permute.xlu0 %2043 }
 0x415   : > { %v2045_v31 = vunpack.i.l.bf16 %v2044_v30  ;;  %v2046_v32 = vunpack.i.h.bf16 %v2044_v30 }
 0x417   : > { %919 = vmatpush.msrb.mxu3 %v2046_v32  ;;  %v867_v33 = vsel %vm555_vm4, %v2045_v31, %v2046_v32 }
 0x418   : > { %2073 = vrot.lane.b32.xlu1 %v2396_v19, %s2237_s25  ;;  %899 = vmatpush.msra.mxu2 %v867_v33  ;;  %v1106_v19 = vld [vmem:[%s2762_s8] sm:$0xff] }
 0x419   : > { %920 = vmatpush.msrb.mxu3 %v856_v8 }
 0x41a   : > { %900 = vmatpush.msra.mxu2 %v855_v10  ;;  %1897 = vmatmul.msk.f32.vlgmr.msrb.gmra.mxu3 %vm603_vm6, %v1894_v34 }
 0x41b   : > { %1896 = vmatmul.msk.f32.vlgmr.msra.gmra.mxu2 %vm603_vm6, %v1894_v34 }
 0x41c   : > { %v942_v35 = vpop.permute.xlu0 %941 }
 0x41d   : > { %v944_v3 = vsel %vm943_vm8, %v2485_v20, %v942_v35  ;;  %v2082_v20 = vpack.i.bf16 %v2404_v23, %v2389_v15 }
 0x420   : > { %2098 = vrot.lane.b32.xlu1 %v2364_v6, %s2237_s25 }
 0x424   : > { %v2054_v36 = vpop.permute.xlu0 %2053 }
 0x425   : > { %v2056_v38 = vunpack.i.h.bf16 %v2054_v36  ;;  %v2055_v39 = vunpack.i.l.bf16 %v2054_v36 }
 0x427   : > { %v1114_v40 = vsel %vm779_vm12, %v2056_v38, %v1112_v37  ;;  %v1113_v41 = vsel %vm779_vm12, %v2055_v39, %v2056_v38 }
 0x428   : > { %v2067_v42 = vpack.i.bf16 %v1112_v37, %v1114_v40  ;;  %1125 = vperm.xlu1 %2026, %v1106_v19   ;;  %v2062_v43 = vpack.i.bf16 %v1113_v41, %v1120_v27 }
 0x42a   : > { %2068 = vrot.lane.b32.xlu0 %v2067_v42, %s2237_s25  ;;  %2063 = vrot.lane.b32.xlu2 %v2062_v43, %s2237_s25 }
 0x482   : > { %v2507_v6 = vpop.permute.xlu1 %2058 }
 0x483   : > { %v2061_v44 = vunpack.i.h.bf16 %v2507_v6  ;;  %v2060_v45 = vunpack.i.l.bf16 %v2507_v6 }
 0x484   : > { %v2517_v52 = vpop.permute.xlu2 %2063 }
 0x485   : > { %v1166_v46 = vsel %vm603_vm6, %v2060_v45, %v2061_v44  ;;  %v2066_v54 = vunpack.i.h.bf16 %v2517_v52  ;;  %v2065_v28 = vunpack.i.l.bf16 %v2517_v52 }
 0x486   : > { %1193 = vmatpush.msra.mxu3 %v1166_v46  ;;  %v1026_v46 = vstv %s1025_s30  ;;  %s2241_s30 = smov 119  }
 0x487   : > { %v1028_v47 = vadd.s32 %v1026_v46, %v2431_v51  ;;  %v1027_v49 = vadd.s32 %v1026_v46, %v2427_v48 }
 0x489   : > { %vm1030_vm10 = vcmp.ge.s32.totalorder %v1028_v47, 0  ;;  %vm1032_vm13 = vcmp.lt.s32.totalorder %v1028_v47, 32  ;;  %vm1029_vm14 = vcmp.ge.s32.totalorder %v1027_v49, 0 }
 0x48a   : > { %v2519_v53 = vpop.permute.xlu1 %2073 }
 0x48b   : > { %v2076_v56 = vunpack.i.h.bf16 %v2519_v53  ;;  %v2075_v57 = vunpack.i.l.bf16 %v2519_v53  ;;  %v1223_v53 = vstv %s1222_s18  ;;  %s2242_s18 = smov 116  }
 0x48d   : > { %v1162_v8 = vsel %vm603_vm6, %v2075_v57, %v2076_v56 }
 0x492   : > { %v2099_v31 = vpop.permute.xlu1 %2098 }
 0x493   : > { %v2101_v32 = vunpack.i.h.bf16 %v2099_v31  ;;  %v2100_v33 = vunpack.i.l.bf16 %v2099_v31 }
 0x495   : > { %v1158_v6 = vsel %vm603_vm6, %v2100_v33, %v2101_v32 }
 0x49c   : > { %v2522_v55 = vpop.permute.xlu0 %2068 }
 0x49d   : > { %v2070_v58 = vunpack.i.l.bf16 %v2522_v55  ;;  %v922_v59 = vpop.f32.mrf.mxu3  ;;  %v2071_v30 = vunpack.i.h.bf16 %v2522_v55 }
 0x49e   : > { %v923_v60 = vadd.f32 %v922_v59, %v2482_v12  ;;  %v902_v61 = vpop.f32.mrf.mxu2 }
 0x49f   : > { %v903_v62 = vadd.f32 %v902_v61, %v2482_v12  ;;  %v1164_v63 = vsel %vm603_vm6, %v2066_v54, %v2070_v58  ;;  %v1165_v19 = vsel %vm603_vm6, %v2070_v58, %v2071_v30  ;;  %v1225_v58 = vadd.s32 %v1223_v53, %v2431_v51 }
 0x4a0   : > { %v936_v1 = vsel %vm934_vm15, %v923_v60, 0.0  ;;  %1194 = vmatpush.msra.mxu3 %v1164_v63  ;;  %vm1031_vm15 = vcmp.lt.s32.totalorder %v1027_v49, 32 }
 0x4a1   : > { %v2534_v4 = vadd.f32 %v942_v35, %v936_v1  ;;  %v935_v5 = vsel %vm933_vm0, %v903_v62, 0.0  ;;  %v1167_v35 = vsel %vm603_vm6, %v2061_v44, %v2065_v28  ;;  %v1105_v44 = vld [vmem:[%s2761_s7] sm:$0xff]  ;;  %vm1034_vm0 = vmand %vm1030_vm10, %vm1032_vm13  ;;  %vm1229_vm11 = vcmp.lt.s32.totalorder %v1225_v58, 32 }
 0x4a2   : > { %v2539_v10 = vadd.f32 %v944_v3, %v935_v5  ;;  %1195 = vmatpush.msra.mxu3 %v1162_v8  ;;  %v1224_v3 = vadd.s32 %v1223_v53, %v2427_v48  ;;  %v1126_v5 = vpop.permute.xlu1 %1125 }
 0x4a3   : > { %vm950_vm1 = vcmp.ge.f32.partialorder %v2534_v4, 0.0  ;;  %v952_v11 = vmul.f32 0.1, %v2534_v4 }
 0x4a4   : > { %vm949_vm2 = vcmp.ge.f32.partialorder %v2539_v10, 0.0  ;;  %v951_v12 = vmul.f32 0.1, %v2539_v10  ;;  %vm1226_vm13 = vcmp.ge.s32.totalorder %v1224_v3, 0 }
 0x4a5   : > { %v954_v13 = vsel %vm950_vm1, %v2534_v4, %v952_v11  ;;  %vm1033_vm1 = vmand %vm1029_vm14, %vm1031_vm15  ;;  %vm1228_vm14 = vcmp.lt.s32.totalorder %v1224_v3, 32  ;;  %v1910_v3 = vld [vmem:[%s2762_s8 + $0x8] sm:$0xff] }
 0x4a6   : > { %v953_v16 = vsel %vm949_vm2, %v2539_v10, %v951_v12 }
 0x4a7   : > { %v2087_v17 = vpack.i.bf16 %v954_v13, %v953_v16 }
 0x4a9   : > { %2088 = vrot.lane.b32.xlu0 %v2087_v17, %s2238_s13  ;;  %2078 = vrot.lane.b32.xlu2 %v2087_v17, %s2239_s27 }
 0x4b1   : > { %2093 = vrot.lane.b32.xlu0 %v2092_v18, %s2237_s25  ;;  %2083 = vrot.lane.b32.xlu2 %v2082_v20, %s2237_s25 }
 0x4b9   : > { %979 = vperm.xlu0 %2015, %v1899_v21   ;;  %1132 = vrot.lane.b32.xlu2 %v2380_v9, %s2237_s25  ;;  %v1898_v9 = vld [vmem:[%s2757_s3 + $0x10] sm:$0xff]  ;;  %s2240_s25 = smov 20  }
 0x503   : > { %v2079_v24 = vpop.permute.xlu2 %2078 }
 0x504   : > { %v2081_v25 = vunpack.i.h.bf16 %v2079_v24  ;;  %v2080_v26 = vunpack.i.l.bf16 %v2079_v24 }
 0x506   : > { %1018 = vmatpush.msra.mxu1 %v2081_v25  ;;  %v974_v14 = vsel %vm2767_vm5, %v2080_v26, %v2081_v25  ;;  %vm1227_vm5 = vcmp.ge.s32.totalorder %v1225_v58, 0 }
 0x507   : > { %998 = vmatpush.msrb.mxu0 %v974_v14  ;;  %vm1231_vm10 = vmand %vm1227_vm5, %vm1229_vm11  ;;  %vm1338_vm5 = vcmask 162816  }
 0x50b   : > { %v2084_v27 = vpop.permute.xlu2 %2083 }
 0x50c   : > { %v2085_v34 = vunpack.i.l.bf16 %v2084_v27  ;;  %v2086_v37 = vunpack.i.h.bf16 %v2084_v27 }
 0x50e   : > { %v1163_v41 = vsel %vm603_vm6, %v2076_v56, %v2085_v34 }
 0x513   : > { %v1133_v40 = vpop.permute.xlu2 %1132 }
 0x514   : > { %v1159_v45 = vsel %vm603_vm6, %v2101_v32, %v1133_v40 }
 0x51b   : > { %v2089_v15 = vpop.permute.xlu0 %2088 }
 0x51c   : > { %v2091_v22 = vunpack.i.h.bf16 %v2089_v15  ;;  %v2090_v23 = vunpack.i.l.bf16 %v2089_v15 }
 0x51e   : > { %1019 = vmatpush.msra.mxu1 %v2091_v22  ;;  %v966_v29 = vsel %vm2766_vm7, %v2090_v23, %v2091_v22 }
 0x51f   : > { %999 = vmatpush.msrb.mxu0 %v966_v29 }
 0x520   : > { %1020 = vmatpush.msra.mxu1 %v954_v13 }
 0x521   : > { %1000 = vmatpush.msrb.mxu0 %v953_v16  ;;  %1901 = vmatmul.msk.f32.vlgmr.msra.gmra.mxu1 %vm603_vm6, %v1898_v9 }
 0x522   : > { %1900 = vmatmul.msk.f32.vlgmr.msrb.gmra.mxu0 %vm603_vm6, %v1898_v9  ;;  %v1241_v9 = vld [vmem:[%s2764_s10] sm:$0xff] }
 0x523   : > { %1213 = vmatpush.msra.mxu0 %v1167_v35  ;;  %v2094_v36 = vpop.permute.xlu0 %2093 }
 0x524   : > { %v2096_v38 = vunpack.i.h.bf16 %v2094_v36  ;;  %v2095_v39 = vunpack.i.l.bf16 %v2094_v36 }
 0x525   : > { %1214 = vmatpush.msra.mxu0 %v1165_v19 }
 0x526   : > { %v1160_v42 = vsel %vm603_vm6, %v2086_v37, %v2095_v39  ;;  %v1161_v43 = vsel %vm603_vm6, %v2095_v39, %v2096_v38 }
 0x527   : > { %1215 = vmatpush.msra.mxu0 %v1163_v41  ;;  %1196 = vmatpush.msra.mxu3 %v1160_v42 }
 0x529   : > { %1216 = vmatpush.msra.mxu0 %v1161_v43  ;;  %1197 = vmatpush.msra.mxu3 %v1158_v6  ;;  %v1321_v43 = vstv %s1320_s24  ;;  %s1535_s24 = sadd.s32 4294967284, %s2424_s29 }
 0x52a   : > { %1905 = vmatmul.msk.f32.vlgmr.msra.gmra.mxu3 %vm1178_vm9, %v1105_v44  ;;  %v1323_v6 = vadd.s32 %v1321_v43, %v2431_v51 }
 0x52b   : > { %1217 = vmatpush.msra.mxu0 %v1159_v45  ;;  %v980_v50 = vpop.permute.xlu0 %979 }
 0x52c   : > { %1906 = vmatmul.msk.f32.vlgmr.msra.gmra.mxu0 %vm1178_vm9, %v1105_v44  ;;  %v1322_v44 = vadd.s32 %v1321_v43, %v2427_v48  ;;  %vm1327_vm11 = vcmp.lt.s32.totalorder %v1323_v6, 32 }
 0x59e   : > { %v1022_v52 = vpop.f32.mrf.mxu1 }
 0x59f   : > { %v1023_v54 = vadd.f32 %v1022_v52, %v980_v50  ;;  %v1002_v55 = vpop.f32.mrf.mxu0 }
 0x5a0   : > { %v1003_v56 = vadd.f32 %v1002_v55, %v980_v50 }
 0x5a1   : > { %v1036_v57 = vsel %vm1034_vm0, %v1023_v54, 0.0 }
 0x5a2   : > { %vm1038_vm2 = vcmp.ge.f32.partialorder %v1036_v57, 0.0  ;;  %v1040_v59 = vmul.f32 0.1, %v1036_v57  ;;  %v1035_v60 = vsel %vm1033_vm1, %v1003_v56, 0.0 }
 0x5a3   : > { %vm1037_vm7 = vcmp.ge.f32.partialorder %v1035_v60, 0.0  ;;  %v1039_v61 = vmul.f32 0.1, %v1035_v60 }
 0x5a4   : > { %v1042_v62 = vsel %vm1038_vm2, %v1036_v57, %v1040_v59  ;;  %vm1324_vm2 = vcmp.ge.s32.totalorder %v1322_v44, 0 }
 0x5a5   : > { %v1041_v63 = vsel %vm1037_vm7, %v1035_v60, %v1039_v61  ;;  %vm1230_vm7 = vmand %vm1226_vm13, %vm1228_vm14 }
 0x5a6   : > { %v2107_v1 = vpack.i.bf16 %v1042_v62, %v1041_v63 }
 0x5a8   : > { %2108 = vrot.lane.b32.xlu0 %v2107_v1, %s2229_s15  ;;  %2103 = vrot.lane.b32.xlu2 %v2107_v1, %s2230_s16 }
 0x5a9   : > { %v1219_v8 = vpop.f32.mrf.mxu0 }
 0x5aa   : > { %v1220_v11 = vadd.f32 %v1219_v8, %v1126_v5 }
 0x5ac   : > { %v1233_v12 = vsel %vm1231_vm10, %v1220_v11, 0.0  ;;  %vm1326_vm10 = vcmp.lt.s32.totalorder %v1322_v44, 32 }
 0x5ad   : > { %vm1235_vm15 = vcmp.ge.f32.partialorder %v1233_v12, 0.0  ;;  %v1237_v13 = vmul.f32 0.1, %v1233_v12  ;;  %v1199_v16 = vpop.f32.mrf.mxu3  ;;  %vm1328_vm13 = vmand %vm1324_vm2, %vm1326_vm10 }
 0x5ae   : > { %v1200_v17 = vadd.f32 %v1199_v16, %v1126_v5 }
 0x5af   : > { %v1239_v18 = vsel %vm1235_vm15, %v1233_v12, %v1237_v13 }
 0x5b0   : > { %v1232_v20 = vsel %vm1230_vm7, %v1200_v17, 0.0  ;;  %1253 = vrot.lane.b32.xlu0 %v1239_v18, %s2230_s16  ;;  %1260 = vrot.lane.b32.xlu2 %v1239_v18, %s2234_s17  ;;  %vm1383_vm7 = vcmask 949248  }
 0x5b1   : > { %vm1234_vm0 = vcmp.ge.f32.partialorder %v1232_v20, 0.0  ;;  %v1236_v21 = vmul.f32 0.1, %v1232_v20 }
 0x5b3   : > { %v1238_v24 = vsel %vm1234_vm0, %v1232_v20, %v1236_v21  ;;  %vm1375_vm0 = vcmask 973824  }
 0x5b4   : > { %v2112_v25 = vpack.i.bf16 %v1238_v24, %v1239_v18 }
 0x5b6   : > { %2113 = vrot.lane.b32.xlu1 %v2112_v25, %s2236_s14 }
 0x5b8   : > { %1251 = vrot.lane.b32.xlu0 %v1238_v24, %s2230_s16  ;;  %1258 = vrot.lane.b32.xlu2 %v1238_v24, %s2234_s17 }
 0x5be   : > { %1246 = vrot.lane.b32.xlu1 %v1239_v18, %s2229_s15 }
 0x5c0   : > { %1332 = vrot.lane.b32.xlu0 %v2358_v2, %s2240_s25  ;;  %1274 = vperm.xlu2 %2117, %v1241_v9  }
 0x5c6   : > { %1244 = vrot.lane.b32.xlu1 %v1238_v24, %s2229_s15 }
 0x5c8   : > { %1336 = vrot.lane.b32.xlu2 %v2375_v7, %s2240_s25  ;;  %v1240_v7 = vld [vmem:[%s2763_s9] sm:$0xff] }
 0x5ce   : > { %1334 = vrot.lane.b32.xlu1 %v2350_v0, %s2240_s25  ;;  %v1902_v0 = vld [vmem:[%s2759_s5 + $0x10] sm:$0xff]  ;;  %s1435_s25 = sadd.s32 4294967282, %s2424_s29 }
 0x602   : > { %v2104_v26 = vpop.permute.xlu2 %2103 }
 0x603   : > { %v2106_v14 = vunpack.i.h.bf16 %v2104_v26  ;;  %v2105_v15 = vunpack.i.l.bf16 %v2104_v26 }
 0x605   : > { %v1059_v22 = vsel %vm564_vm3, %v2105_v15, %v2106_v14 }
 0x606   : > { %1082 = vmatpush.msrb.mxu2 %v1059_v22 }
 0x60a   : > { %v1261_v2 = vpop.permute.xlu2 %1260 }
 0x612   : > { %v1259_v34 = vpop.permute.xlu2 %1258 }
 0x613   : > { %v1262_v37 = vsel %vm779_vm12, %v1259_v34, %v1261_v2 }
 0x61a   : > { %v2109_v23 = vpop.permute.xlu0 %2108  ;;  %v1275_v41 = vpop.permute.xlu2 %1274 }
 0x61b   : > { %v2111_v27 = vunpack.i.h.bf16 %v2109_v23  ;;  %v2110_v28 = vunpack.i.l.bf16 %v2109_v23  ;;  %v1909_v23 = vld [vmem:[%s2761_s7 + $0x8] sm:$0xff] }
 0x61d   : > { %v1053_v29 = vsel %vm555_vm4, %v2110_v28, %v2111_v27  ;;  %v1436_v27 = vstv %s1435_s25  ;;  %s2245_s25 = smov 108  }
 0x61e   : > { %1083 = vmatpush.msrb.mxu2 %v1053_v29  ;;  %v1438_v28 = vadd.s32 %v1436_v27, %v2431_v51 }
 0x620   : > { %1084 = vmatpush.msrb.mxu2 %v1041_v63 }
 0x621   : > { %1904 = vmatmul.msk.f32.vlgmr.msrb.gmra.mxu2 %vm603_vm6, %v1902_v0  ;;  %vm1325_vm6 = vcmp.ge.s32.totalorder %v1323_v6, 0  ;;  %v1437_v0 = vadd.s32 %v1436_v27, %v2427_v48 }
 0x622   : > { %v1254_v30 = vpop.permute.xlu0 %1253  ;;  %v1337_v46 = vpop.permute.xlu2 %1336  ;;  %vm1329_vm1 = vmand %vm1325_vm6, %vm1327_vm11  ;;  %vm2769_vm6 = vcmask 998400   ;;  %vm1440_vm11 = vcmp.ge.s32.totalorder %v1438_v28, 0 }
 0x623   : > { %vm1439_vm10 = vcmp.ge.s32.totalorder %v1437_v0, 0 }
 0x628   : > { %v2114_v31 = vpop.permute.xlu1 %2113 }
 0x629   : > { %v2116_v32 = vunpack.i.h.bf16 %v2114_v31  ;;  %v2115_v33 = vunpack.i.l.bf16 %v2114_v31 }
 0x62a   : > { %v1252_v36 = vpop.permute.xlu0 %1251 }
 0x62b   : > { %1311 = vmatpush.msra.mxu2 %v2115_v33  ;;  %v1269_v35 = vsel %vm943_vm8, %v2116_v32, %v2115_v33  ;;  %v1255_v38 = vsel %vm564_vm3, %v1252_v36, %v1254_v30 }
 0x62c   : > { %1291 = vmatpush.msrb.mxu1 %v1269_v35 }
 0x62d   : > { %1312 = vmatpush.msra.mxu2 %v1261_v2 }
 0x62e   : > { %1292 = vmatpush.msrb.mxu1 %v1262_v37 }
 0x62f   : > { %1313 = vmatpush.msra.mxu2 %v1254_v30 }
 0x630   : > { %v1247_v39 = vpop.permute.xlu1 %1246  ;;  %1293 = vmatpush.msrb.mxu1 %v1255_v38 }
 0x631   : > { %1314 = vmatpush.msra.mxu2 %v1247_v39 }
 0x632   : > { %v1333_v52 = vpop.permute.xlu0 %1332 }
 0x633   : > { %1315 = vmatpush.msra.mxu2 %v1239_v18 }
 0x634   : > { %1908 = vmatmul.msk.f32.vlgmr.msra.gmra.mxu2 %vm1178_vm9, %v1240_v7 }
 0x638   : > { %v1245_v19 = vpop.permute.xlu1 %1244 }
 0x639   : > { %v1248_v40 = vsel %vm555_vm4, %v1245_v19, %v1247_v39  ;;  %v1914_v39 = vld [vmem:[%s2764_s10 + $0x8] sm:$0xff] }
 0x63a   : > { %1294 = vmatpush.msrb.mxu1 %v1248_v40 }
 0x63c   : > { %1295 = vmatpush.msrb.mxu1 %v1238_v24 }
 0x63d   : > { %1907 = vmatmul.msk.f32.vlgmr.msrb.gmra.mxu1 %vm1178_vm9, %v1240_v7 }
 0x640   : > { %v1335_v45 = vpop.permute.xlu1 %1334 }
 0x641   : > { %v1340_v50 = vsel %vm1338_vm5, %v1335_v45, %v1337_v46  ;;  %v1339_v57 = vsel %vm1338_vm5, %v1333_v52, %v1335_v45  ;;  %vm1442_vm5 = vcmp.lt.s32.totalorder %v1438_v28, 32  ;;  %v1913_v45 = vld [vmem:[%s2763_s9 + $0x8] sm:$0xff] }
 0x6a4   : > { %v2624_v42 = vpop.f32.mrf.mxu2 }
 0x6b7   : > { %v1317_v47 = vpop.f32.mrf.mxu2 }
 0x6b8   : > { %v1318_v49 = vadd.f32 %v1317_v47, %v1275_v41 }
 0x6ba   : > { %v1331_v53 = vsel %vm1329_vm1, %v1318_v49, 0.0  ;;  %v1297_v54 = vpop.f32.mrf.mxu1  ;;  %vm1444_vm1 = vmand %vm1440_vm11, %vm1442_vm5 }
 0x6bb   : > { %v2628_v55 = vadd.f32 %v1340_v50, %v1331_v53  ;;  %v1298_v56 = vadd.f32 %v1297_v54, %v1275_v41  ;;  %v1536_v54 = vstv %s1535_s24 }
 0x6bd   : > { %v1330_v58 = vsel %vm1328_vm13, %v1298_v56, 0.0  ;;  %v1348_v59 = vmul.f32 0.1, %v2628_v55  ;;  %vm1346_vm14 = vcmp.ge.f32.partialorder %v2628_v55, 0.0  ;;  %vm1441_vm13 = vcmp.lt.s32.totalorder %v1437_v0, 32 }
 0x6be   : > { %v2631_v60 = vadd.f32 %v1339_v57, %v1330_v58  ;;  %v1537_v56 = vadd.s32 %v1536_v54, %v2427_v48 }
 0x6bf   : > { %v1350_v63 = vsel %vm1346_vm14, %v2628_v55, %v1348_v59  ;;  %vm1443_vm14 = vmand %vm1439_vm10, %vm1441_vm13 }
 0x6c0   : > { %vm1345_vm15 = vcmp.ge.f32.partialorder %v2631_v60, 0.0  ;;  %v1347_v61 = vmul.f32 0.1, %v2631_v60  ;;  %vm1539_vm5 = vcmp.ge.s32.totalorder %v1537_v56, 0 }
 0x6c2   : > { %v1349_v62 = vsel %vm1345_vm15, %v2631_v60, %v1347_v61 }
 0x6c3   : > { %v2128_v1 = vpack.i.bf16 %v1350_v63, %v1349_v62 }
 0x6c5   : > { %2129 = vrot.lane.b32.xlu2 %v2128_v1, %s2235_s12  ;;  %2124 = vrot.lane.b32.xlu1 %v2128_v1, %s2241_s30  ;;  %s2243_s30 = smov 120  }
 0x6c6   : > { %2119 = vrot.lane.b32.xlu0 %v2128_v1, %s2242_s18 }
 0x6cd   : > { %1389 = vperm.xlu1 %2026, %v1910_v3  }
 0x6ce   : > { %2134 = vrot.lane.b32.xlu0 %v2128_v1, %s2234_s17 }
 0x71f   : > { %v2130_v8 = vpop.permute.xlu2 %2129 }
 0x720   : > { %v2132_v18 = vunpack.i.h.bf16 %v2130_v8  ;;  %v2131_v20 = vunpack.i.l.bf16 %v2130_v8 }
 0x722   : > { %v1368_v25 = vsel %vm2769_vm6, %v2131_v20, %v2132_v18  ;;  %v1918_v20 = vld [vmem:[%s2762_s8 + $0x10] sm:$0xff] }
 0x737   : > { %v2125_v5 = vpop.permute.xlu1 %2124 }
 0x738   : > { %v2120_v11 = vpop.permute.xlu0 %2119  ;;  %v2127_v12 = vunpack.i.h.bf16 %v2125_v5  ;;  %v2126_v13 = vunpack.i.l.bf16 %v2125_v5 }
 0x739   : > { %v2122_v16 = vunpack.i.h.bf16 %v2120_v11  ;;  %v2121_v17 = vunpack.i.l.bf16 %v2120_v11 }
 0x73a   : > { %v1376_v24 = vsel %vm1375_vm0, %v2126_v13, %v2127_v12 }
 0x73b   : > { %1426 = vmatpush.msrb.mxu0 %v2122_v16  ;;  %v1384_v21 = vsel %vm1383_vm7, %v2121_v17, %v2122_v16 }
 0x73c   : > { %1406 = vmatpush.msrb.mxu3 %v1384_v21 }
 0x73d   : > { %1427 = vmatpush.msrb.mxu0 %v2127_v12 }
 0x73e   : > { %1407 = vmatpush.msrb.mxu3 %v1376_v24 }
 0x73f   : > { %1428 = vmatpush.msrb.mxu0 %v2132_v18  ;;  %v1390_v29 = vpop.permute.xlu1 %1389 }
 0x740   : > { %v2135_v26 = vpop.permute.xlu0 %2134  ;;  %1408 = vmatpush.msrb.mxu3 %v1368_v25 }
 0x741   : > { %v2137_v14 = vunpack.i.h.bf16 %v2135_v26  ;;  %v2136_v15 = vunpack.i.l.bf16 %v2135_v26 }
 0x743   : > { %1429 = vmatpush.msrb.mxu0 %v2137_v14  ;;  %v1361_v22 = vsel %vm779_vm12, %v2136_v15, %v2137_v14 }
 0x744   : > { %1409 = vmatpush.msrb.mxu3 %v1361_v22 }
 0x745   : > { %1430 = vmatpush.msrb.mxu0 %v1350_v63 }
 0x746   : > { %1410 = vmatpush.msrb.mxu3 %v1349_v62  ;;  %1912 = vmatmul.msk.f32.vlgmr.msrb.gmra.mxu0 %vm1178_vm9, %v1909_v23 }
 0x747   : > { %1911 = vmatmul.msk.f32.vlgmr.msrb.gmra.mxu3 %vm1178_vm9, %v1909_v23 }
 0x7c3   : > { %v1432_v9 = vpop.f32.mrf.mxu0 }
 0x7c4   : > { %v1433_v2 = vadd.f32 %v1432_v9, %v1390_v29 }
 0x7c6   : > { %v1446_v30 = vsel %vm1444_vm1, %v1433_v2, 0.0  ;;  %vm1541_vm1 = vcmp.lt.s32.totalorder %v1537_v56, 32 }
 0x7c7   : > { %vm1448_vm2 = vcmp.ge.f32.partialorder %v1446_v30, 0.0  ;;  %v1450_v31 = vmul.f32 0.1, %v1446_v30  ;;  %vm1543_vm10 = vmand %vm1539_vm5, %vm1541_vm1 }
 0x7c9   : > { %v1452_v32 = vsel %vm1448_vm2, %v1446_v30, %v1450_v31  ;;  %vm1553_vm2 = vcmask 982016  }
 0x7ca   : > { %1468 = vrot.lane.b32.xlu1 %v1452_v32, %s2230_s16  ;;  %1475 = vrot.lane.b32.xlu0 %v1452_v32, %s2234_s17  ;;  %v1412_v33 = vpop.f32.mrf.mxu3 }
 0x7cb   : > { %v1413_v34 = vadd.f32 %v1412_v33, %v1390_v29 }
 0x7cd   : > { %v1445_v35 = vsel %vm1443_vm14, %v1413_v34, 0.0 }
 0x7ce   : > { %vm1447_vm15 = vcmp.ge.f32.partialorder %v1445_v35, 0.0  ;;  %v1449_v36 = vmul.f32 0.1, %v1445_v35 }
 0x7d0   : > { %v1451_v37 = vsel %vm1447_vm15, %v1445_v35, %v1449_v36  ;;  %vm1597_vm15 = vcmask 883712  }
 0x7d1   : > { %v2138_v38 = vpack.i.bf16 %v1451_v37, %v1452_v32 }
 0x7d2   : > { %1466 = vrot.lane.b32.xlu1 %v1451_v37, %s2230_s16  ;;  %1473 = vrot.lane.b32.xlu0 %v1451_v37, %s2234_s17 }
 0x7d3   : > { %2139 = vrot.lane.b32.xlu2 %v2138_v38, %s2236_s14 }
 0x7da   : > { %1549 = vrot.lane.b32.xlu1 %v2631_v60, %s2243_s30  ;;  %1489 = vperm.xlu0 %2015, %v1914_v39  }
 0x7db   : > { %1461 = vrot.lane.b32.xlu2 %v1452_v32, %s2229_s15 }
 0x7e3   : > { %1459 = vrot.lane.b32.xlu2 %v1451_v37, %s2229_s15 }
 0x7eb   : > { %1551 = vrot.lane.b32.xlu2 %v2628_v55, %s2243_s30  ;;  %v1538_v55 = vadd.s32 %v1536_v54, %v2431_v51  ;;  %s2244_s30 = smov 113  }
 0x7ed   : > { %vm1540_vm0 = vcmp.ge.s32.totalorder %v1538_v55, 0  ;;  %vm1542_vm6 = vcmp.lt.s32.totalorder %v1538_v55, 32 }
 0x7ee   : > { %vm1544_vm11 = vmand %vm1540_vm0, %vm1542_vm6  ;;  %vm1589_vm0 = vcmask 924672   ;;  %vm2770_vm6 = vcmask 965632  }
 0x82d   : > { %v2140_v7 = vpop.permute.xlu2 %2139 }
 0x82e   : > { %v2142_v19 = vunpack.i.h.bf16 %v2140_v7  ;;  %v2141_v40 = vunpack.i.l.bf16 %v2140_v7 }
 0x830   : > { %1526 = vmatpush.msrb.mxu2 %v2141_v40  ;;  %v1484_v41 = vsel %vm943_vm8, %v2142_v19, %v2141_v40 }
 0x831   : > { %1506 = vmatpush.msra.mxu1 %v1484_v41 }
 0x835   : > { %v1462_v43 = vpop.permute.xlu2 %1461 }
 0x83c   : > { %v1469_v6 = vpop.permute.xlu1 %1468  ;;  %v1476_v44 = vpop.permute.xlu0 %1475 }
 0x83d   : > { %1527 = vmatpush.msrb.mxu2 %v1476_v44  ;;  %v1460_v50 = vpop.permute.xlu2 %1459 }
 0x83e   : > { %v1463_v53 = vsel %vm555_vm4, %v1460_v50, %v1462_v43 }
 0x83f   : > { %1528 = vmatpush.msrb.mxu2 %v1469_v6 }
 0x841   : > { %1529 = vmatpush.msrb.mxu2 %v1462_v43 }
 0x843   : > { %1530 = vmatpush.msrb.mxu2 %v1452_v32  ;;  %v1917_v32 = vld [vmem:[%s2761_s7 + $0x10] sm:$0xff] }
 0x844   : > { %v1467_v46 = vpop.permute.xlu1 %1466  ;;  %v1474_v47 = vpop.permute.xlu0 %1473  ;;  %1916 = vmatmul.msk.f32.vlgmr.msrb.gmra.mxu2 %vm1178_vm9, %v1913_v45 }
 0x845   : > { %v1477_v49 = vsel %vm779_vm12, %v1474_v47, %v1476_v44  ;;  %v1470_v52 = vsel %vm564_vm3, %v1467_v46, %v1469_v6  ;;  %v1552_v60 = vpop.permute.xlu2 %1551  ;;  %v1903_v46 = vld [vmem:[%s2760_s6 + $0x10] sm:$0xff] }
 0x846   : > { %1507 = vmatpush.msra.mxu1 %v1477_v49 }
 0x848   : > { %1508 = vmatpush.msra.mxu1 %v1470_v52 }
 0x84a   : > { %1509 = vmatpush.msra.mxu1 %v1463_v53 }
 0x84c   : > { %1510 = vmatpush.msra.mxu1 %v1451_v37  ;;  %v1490_v57 = vpop.permute.xlu0 %1489  ;;  %v1550_v61 = vpop.permute.xlu1 %1549 }
 0x84d   : > { %1915 = vmatmul.msk.f32.vlgmr.msra.gmra.mxu1 %vm1178_vm9, %v1913_v45  ;;  %v1554_v5 = vsel %vm1553_vm2, %v1550_v61, %v1552_v60  ;;  %v1922_v45 = vld [vmem:[%s2764_s10 + $0x10] sm:$0xff] }
 0x8c7   : > { %v1532_v58 = vpop.f32.mrf.mxu2 }
 0x8c8   : > { %v1533_v59 = vadd.f32 %v1532_v58, %v1490_v57 }
 0x8ca   : > { %v1546_v62 = vsel %vm1544_vm11, %v1533_v59, 0.0  ;;  %v1512_v63 = vpop.f32.mrf.mxu1  ;;  %vm2771_vm11 = vcmask 1006592  }
 0x8cb   : > { %v2679_v1 = vadd.f32 %v1552_v60, %v1546_v62  ;;  %v1513_v3 = vadd.f32 %v1512_v63, %v1490_v57  ;;  %v1921_v63 = vld [vmem:[%s2763_s9 + $0x10] sm:$0xff] }
 0x8cd   : > { %v1545_v8 = vsel %vm1543_vm10, %v1513_v3, 0.0  ;;  %v1562_v11 = vmul.f32 0.1, %v2679_v1  ;;  %vm1560_vm13 = vcmp.ge.f32.partialorder %v2679_v1, 0.0 }
 0x8ce   : > { %v2682_v12 = vadd.f32 %v1554_v5, %v1545_v8  ;;  %v1089_v5 = vstv %s2424_s29 }
 0x8cf   : > { %v1564_v17 = vsel %vm1560_vm13, %v2679_v1, %v1562_v11  ;;  %v1090_v11 = vadd.s32 %v1089_v5, %v2427_v48 }
 0x8d0   : > { %vm1559_vm14 = vcmp.ge.f32.partialorder %v2682_v12, 0.0  ;;  %v1561_v13 = vmul.f32 0.1, %v2682_v12 }
 0x8d2   : > { %v1563_v16 = vsel %vm1559_vm14, %v2682_v12, %v1561_v13 }
 0x8d3   : > { %v2153_v18 = vpack.i.bf16 %v1564_v17, %v1563_v16 }
 0x8d5   : > { %2154 = vrot.lane.b32.xlu2 %v2153_v18, %s2239_s27  ;;  %2149 = vrot.lane.b32.xlu1 %v2153_v18, %s2244_s30  ;;  %s1649_s30 = sadd.s32 4294967294, %s2424_s29 }
 0x8d6   : > { %2144 = vrot.lane.b32.xlu0 %v2153_v18, %s2245_s25  ;;  %v1650_v33 = vstv %s1649_s30 }
 0x8d7   : > { %v1652_v34 = vadd.s32 %v1650_v33, %v2431_v51  ;;  %v1651_v36 = vadd.s32 %v1650_v33, %v2427_v48 }
 0x8d9   : > { %vm1654_vm5 = vcmp.ge.s32.totalorder %v1652_v34, 0  ;;  %vm1656_vm1 = vcmp.lt.s32.totalorder %v1652_v34, 32  ;;  %vm1653_vm10 = vcmp.ge.s32.totalorder %v1651_v36, 0  ;;  %vm1655_vm13 = vcmp.lt.s32.totalorder %v1651_v36, 32 }
 0x8da   : > { %vm1658_vm2 = vmand %vm1654_vm5, %vm1656_vm1 }
 0x8db   : > { %vm1657_vm14 = vmand %vm1653_vm10, %vm1655_vm13 }
 0x8dd   : > { %1603 = vperm.xlu1 %2026, %v1918_v20  }
 0x8de   : > { %2159 = vrot.lane.b32.xlu0 %v2153_v18, %s2238_s13 }
 0x92f   : > { %v2155_v24 = vpop.permute.xlu2 %2154 }
 0x930   : > { %v2157_v23 = vunpack.i.h.bf16 %v2155_v24  ;;  %v2156_v27 = vunpack.i.l.bf16 %v2155_v24 }
 0x932   : > { %v1582_v9 = vsel %vm2770_vm6, %v2156_v27, %v2157_v23 }
 0x947   : > { %v2150_v21 = vpop.permute.xlu1 %2149 }
 0x948   : > { %v2145_v25 = vpop.permute.xlu0 %2144  ;;  %v2152_v26 = vunpack.i.h.bf16 %v2150_v21  ;;  %v2151_v14 = vunpack.i.l.bf16 %v2150_v21 }
 0x949   : > { %v2147_v15 = vunpack.i.h.bf16 %v2145_v25  ;;  %v2146_v22 = vunpack.i.l.bf16 %v2145_v25 }
 0x94a   : > { %v1590_v29 = vsel %vm1589_vm0, %v2151_v14, %v2152_v26 }
 0x94b   : > { %1640 = vmatpush.msra.mxu0 %v2147_v15  ;;  %v1598_v28 = vsel %vm1597_vm15, %v2146_v22, %v2147_v15 }
 0x94c   : > { %1620 = vmatpush.msra.mxu3 %v1598_v28 }
 0x94d   : > { %1641 = vmatpush.msra.mxu0 %v2152_v26 }
 0x94e   : > { %1621 = vmatpush.msra.mxu3 %v1590_v29 }
 0x94f   : > { %1642 = vmatpush.msra.mxu0 %v2157_v23  ;;  %v1604_v37 = vpop.permute.xlu1 %1603 }
 0x950   : > { %v2160_v0 = vpop.permute.xlu0 %2159  ;;  %1622 = vmatpush.msra.mxu3 %v1582_v9 }
 0x951   : > { %v2162_v2 = vunpack.i.h.bf16 %v2160_v0  ;;  %v2161_v30 = vunpack.i.l.bf16 %v2160_v0 }
 0x953   : > { %1643 = vmatpush.msra.mxu0 %v2162_v2  ;;  %v1575_v31 = vsel %vm2771_vm11, %v2161_v30, %v2162_v2 }
 0x954   : > { %1623 = vmatpush.msra.mxu3 %v1575_v31 }
 0x955   : > { %1644 = vmatpush.msra.mxu0 %v1564_v17 }
 0x956   : > { %1624 = vmatpush.msra.mxu3 %v1563_v16  ;;  %1920 = vmatmul.msk.f32.vlgmr.msra.gmra.mxu0 %vm1178_vm9, %v1917_v32 }
 0x957   : > { %1919 = vmatmul.msk.f32.vlgmr.msra.gmra.mxu3 %vm1178_vm9, %v1917_v32 }
 0x9d3   : > { %v1646_v35 = vpop.f32.mrf.mxu0 }
 0x9d4   : > { %v1647_v38 = vadd.f32 %v1646_v35, %v1604_v37 }
 0x9d6   : > { %v1660_v39 = vsel %vm1658_vm2, %v1647_v38, 0.0 }
 0x9d7   : > { %v1664_v40 = vmul.f32 0.1, %v1660_v39  ;;  %vm1662_vm15 = vcmp.ge.f32.partialorder %v1660_v39, 0.0 }
 0x9d9   : > { %v1666_v51 = vsel %vm1662_vm15, %v1660_v39, %v1664_v40 }
 0x9da   : > { %v1626_v7 = vpop.f32.mrf.mxu3 }
 0x9db   : > { %v1627_v19 = vadd.f32 %v1626_v7, %v1604_v37 }
 0x9dd   : > { %v1659_v41 = vsel %vm1657_vm14, %v1627_v19, 0.0 }
 0x9de   : > { %vm1661_vm0 = vcmp.ge.f32.partialorder %v1659_v41, 0.0  ;;  %v1663_v43 = vmul.f32 0.1, %v1659_v41 }
 0x9e0   : > { %v1665_v6 = vsel %vm1661_vm0, %v1659_v41, %v1663_v43 }
 0x9e1   : > { %v2173_v44 = vpack.i.bf16 %v1666_v51, %v1665_v6 }
 0x9e3   : > { %2174 = vrot.lane.b32.xlu1 %v2173_v44, %s2230_s16  ;;  %2169 = vrot.lane.b32.xlu0 %v2173_v44, %s2234_s17 }
 0x9e4   : > { %2164 = vrot.lane.b32.xlu2 %v2173_v44, %s2236_s14 }
 0x9eb   : > { %1699 = vperm.xlu1 %2026, %v1922_v45   ;;  %1063 = vperm.xlu0 %2015, %v1903_v46  }
 0x9ec   : > { %2179 = vrot.lane.b32.xlu2 %v2173_v44, %s2229_s15 }
 0x9f3   : > { %1728 = vrot.lane.b32.xlu1 %v2682_v12, %s2242_s18  ;;  %1099 = vrot.lane.b32.xlu0 %v2534_v4, %s2235_s12 }
 0x9f4   : > { %1097 = vrot.lane.b32.xlu2 %v2539_v10, %s2235_s12  ;;  %s521_s12 = scalar_lea.vmem %s2765_s11, %s2344_s28 }
 0x9fc   : > { %1730 = vrot.lane.b32.xlu2 %v2679_v1, %s2242_s18 }
 0xa3e   : > { %v2165_v47 = vpop.permute.xlu2 %2164 }
 0xa3f   : > { %v2167_v49 = vunpack.i.h.bf16 %v2165_v47  ;;  %v2166_v50 = vunpack.i.l.bf16 %v2165_v47 }
 0xa41   : > { %v1695_v52 = vsel %vm943_vm8, %v2166_v50, %v2167_v49  ;;  %vm2772_vm8 = vcmask 998400  }
 0xa42   : > { %1716 = vmatpush.msrb.mxu1 %v1695_v52 }
 0xa46   : > { %v2180_v53 = vpop.permute.xlu2 %2179 }
 0xa47   : > { %v2182_v59 = vunpack.i.h.bf16 %v2180_v53  ;;  %v2181_v60 = vunpack.i.l.bf16 %v2180_v53 }
 0xa49   : > { %v1677_v62 = vsel %vm555_vm4, %v2181_v60, %v2182_v59 }
 0xa4e   : > { %v1098_v8 = vpop.permute.xlu2 %1097 }
 0xa55   : > { %v2175_v54 = vpop.permute.xlu1 %2174  ;;  %v2170_v55 = vpop.permute.xlu0 %2169 }
 0xa56   : > { %v2177_v56 = vunpack.i.h.bf16 %v2175_v54  ;;  %v2176_v57 = vunpack.i.l.bf16 %v2175_v54  ;;  %v2172_v58 = vunpack.i.h.bf16 %v2170_v55  ;;  %v2171_v4 = vunpack.i.l.bf16 %v2170_v55  ;;  %v1731_v21 = vpop.permute.xlu2 %1730 }
 0xa58   : > { %v1689_v10 = vsel %vm779_vm12, %v2171_v4, %v2172_v58  ;;  %v1683_v61 = vsel %vm564_vm3, %v2176_v57, %v2177_v56  ;;  %vm1091_vm12 = vcmp.ge.s32.totalorder %v1090_v11, 0  ;;  %vm1092_vm3 = vcmp.lt.s32.totalorder %v1090_v11, 32 }
 0xa59   : > { %1717 = vmatpush.msrb.mxu1 %v1689_v10  ;;  %vm1093_vm4 = vmand %vm1091_vm12, %vm1092_vm3 }
 0xa5b   : > { %1718 = vmatpush.msrb.mxu1 %v1683_v61 }
 0xa5d   : > { %1719 = vmatpush.msrb.mxu1 %v1677_v62  ;;  %v1064_v1 = vpop.permute.xlu0 %1063  ;;  %v1700_v3 = vpop.permute.xlu1 %1699 }
 0xa5e   : > { %v1087_v13 = vadd.f32 %v2624_v42, %v1064_v1 }
 0xa5f   : > { %1720 = vmatpush.msrb.mxu1 %v1665_v6 }
 0xa60   : > { %1923 = vmatmul.msk.f32.vlgmr.msrb.gmra.mxu1 %vm1178_vm9, %v1921_v63  ;;  %v1094_v24 = vsel %vm1093_vm4, %v1087_v13, 0.0 }
 0xa65   : > { %v1100_v12 = vpop.permute.xlu0 %1099  ;;  %v1729_v16 = vpop.permute.xlu1 %1728 }
 0xa66   : > { %v1101_v18 = vsel %vm2772_vm8, %v1098_v8, %v1100_v12  ;;  %v1732_v25 = vsel %vm1383_vm7, %v1729_v16, %v1731_v21 }
 0xa67   : > { %v1103_v14 = vadd.f32 %v1101_v18, %v1094_v24 }
 0xadd   : > { %v1722_v17 = vpop.f32.mrf.mxu1 }
 0xade   : > { %v1723_v20 = vadd.f32 %v1722_v17, %v1700_v3 }
 0xae0   : > { %v1725_v26 = vsel %vm1093_vm4, %v1723_v20, 0.0 }
 0xae1   : > { %v1734_v15 = vadd.f32 %v1732_v25, %v1725_v26 }
 0xae3   : > { %v1735_v48 = vadd.f32 %v1734_v15, %v1103_v14 }
 0xae5   : > { %v1736_v22 = vmul.f32 0.5, %v1735_v48 }
 0xae7   : > { %v1737_v42 = vsel %vm1093_vm4, %v1736_v22, 0.0 }
 0xae8   : > { %1738 = vst [vmem:[%s521_s12] sm:$0xff] %v1737_v42 }
 0xae9 PF: > { %s21_s21 = sadd.s32 1, %s2227_s21   ;;  %s2773_s17 = smov %s2219_s19 }
 0xaea   : > { %p18_p11 = scmp.ge.s32.totalorder %s21_s21, 6   ;;  %s2774_s18 = smov %s2223_s20 }
 0xaeb   : > { %s2775_s19 = smov %s2778_s22  ;;  %s2776_s20 = smov %s2782_s23 }
 0xaec   :  { %20 = sbr.rel (!%p18_p11) target bundleno = 3 (0x3), region = 116 }

// kernel: hifigan_forward.7
= control target key start
LH: loop header
LB: loop body
LE: loop exit
PB: predicated region body
PF: predicated region fallthrough
CT: control target
= control target key end

     0   :  { %s2579_s25 = smov 0   ;;  %s2581_s26 = smov 0   ;;  %s3032_s0 = inlined_call_operand.vmem [shape: f32[2,8,512], index: 0, kind: input, shape index: {}, may-alias: {0,1,2}]   ;;  %s3033_s1 = inlined_call_operand.vmem [shape: f32[2,8,512], index: 1, kind: input, shape index: {}, may-alias: {0,1,2}]   ;;  %s3034_s2 = inlined_call_operand.vmem [shape: f32[2,8,512], index: 2, kind: input, shape index: {}, may-alias: {0,1,2}]   ;;  %s3035_s3 = inlined_call_operand.vmem [shape: f32[3,8,24], index: 3, kind: input, shape index: {}]   ;;  %s3036_s4 = inlined_call_operand.vmem [shape: f32[3,8,1], index: 4, kind: input, shape index: {}]   ;;  %s3037_s5 = inlined_call_operand.vmem [shape: f32[3,8,24], index: 5, kind: input, shape index: {}]   ;;  %s3038_s6 = inlined_call_operand.vmem [shape: f32[3,8,1], index: 6, kind: input, shape index: {}]   ;;  %s3039_s7 = inlined_call_operand.vmem [shape: f32[3,8,40], index: 7, kind: input, shape index: {}]   ;;  %s3040_s8 = inlined_call_operand.vmem [shape: f32[3,8,1], index: 8, kind: input, shape index: {}]   ;;  %s3041_s9 = inlined_call_operand.vmem [shape: f32[3,8,40], index: 9, kind: input, shape index: {}]   ;;  %s3042_s10 = inlined_call_operand.vmem [shape: f32[3,8,1], index: 10, kind: input, shape index: {}]   ;;  %s3043_s11 = inlined_call_operand.vmem [shape: f32[8,56], index: 11, kind: input, shape index: {}]   ;;  %s3044_s12 = inlined_call_operand.vmem [shape: f32[8,1], index: 12, kind: input, shape index: {}]   ;;  %s3045_s13 = inlined_call_operand.vmem [shape: f32[2,8,512], index: 13, kind: output, shape index: {}]  }
   0x1   :  { %s2583_s27 = smov 0   ;;  %s2585_s28 = smov 0  }
   0x2   :  { %s2587_s29 = smov 0  }
   0x3 LB: > { %s32_s30 = sadd.s32 1, %s2482_s27  ;;  %s35_s14 = sadd.s32 1, %s2486_s28  ;;  %s2490_s29 = sphi %s2587_s29, %s23_s29   ;;  %s2486_s28 = sphi %s2585_s28, %s3066_s28   ;;  %s2482_s27 = sphi %s2583_s27, %s3065_s27   ;;  %s2478_s26 = sphi %s2581_s26, %s3064_s26   ;;  %s2474_s25 = sphi %s2579_s25, %s3063_s25  }
   0x4   : > { %p33_p0 = scmp.ge.s32.totalorder %s32_s30, 4  ;;  %p2065_p1 = scmp.ge.s32.totalorder %s2490_s29, 1 }
   0x5   : > { %p460_p2 = scmp.lt.s32.totalorder %s2490_s29, 9 }
   0x6   : > { %s3068_s30 = smov (%p33_p0, %s32_s30), 0  ;;  %s3070_s14 = smov (!%p33_p0, %s35_s14), %s2486_s28 }
   0x7   : > { %3049 = sst [smem:[#allocation2_spill]] %s3068_s30  ;;  %p461_p3 = pnand %p2065_p1, %p460_p2 }
   0x8   : > { %p37_p4 = scmp.ge.s32.totalorder %s3070_s14, 2  ;;  %p532_p5 = scmp.lt.s32.totalorder (!%p461_p3), %s2478_s26, 1 }
   0x9   : > { %464 = sbr.rel (%p461_p3) target bundleno = 3068 (0xbfc), region = 72  ;;  %p534_p6 = scmp.lt.s32.totalorder (!%p461_p3), %s2474_s25, 3 }
   0xa   : > { %s3072_s14 = smov (%p37_p4, %s3070_s14), 0  ;;  %s2068_s15 = sadd.s32 (!%p461_p3), 4294967295, %s2474_s25 }
   0xb   : > { %3050 = sst [smem:[#allocation3_spill]] %s3072_s14  ;;  %p541_p7 = scmp.gt.s32.totalorder (!%p461_p3), %s2068_s15, 0 }
   0xc   : > { %p576_p8 = scmp.gt.s32.totalorder (!%p461_p3), %s2474_s25, 0  ;;  %p2069_p9 = scmp.lt.s32.totalorder (!%p461_p3), %s2068_s15, 3 }
   0xd   : > { %s554_s23 = sadd.s32 (!%p461_p3), 1, %s2474_s25  ;;  %s2498_s20 = smov (!%p461_p3), 122  }
   0xe   : > { %s3074_s26 = smov (!%p532_p5, %s2478_s26), 1  ;;  %s3076_s15 = smov (!%p541_p7, %s2068_s15), 0  ;;  %vm618_vm3 = vcmask 1031168   ;;  %vm609_vm4 = vcmask 1039360   ;;  %vm644_vm5 = vcmask 121856   ;;  %v2495_v26 = vmov 0  }
   0xf   : > { %s535_s16 = scalar_select %p534_p6, %s2474_s25, 3  ;;  %2216 = vset.pattern.permute.xlu0 %v2495_v26  ;;  %v599_v27 = vld [vmem:[%s3036_s4] sm:$0xff]  ;;  %2227 = vset.pattern.permute.xlu1 %v2495_v26  ;;  %vm657_vm6 = vcmask 195584   ;;  %v703_v47 = vlaneseq }
  0x10   : > { %s2066_s17 = sshll.u32 %s3074_s26, 2  ;;  %s3078_s15 = smov (!%p2069_p9, %s3076_s15), 3  ;;  %2333 = vset.pattern.permute.xlu2 %v2495_v26  ;;  %v598_v39 = vld [vmem:[%s3035_s3] sm:$0xff] }
  0x11   : > { %s537_s18 = sadd.s32 %s2066_s17, %s535_s16  ;;  %s548_s24 = sadd.s32 %s3078_s15, %s2066_s17  ;;  %v2700_v48 = vand.u32 127, %v703_v47 }
  0x12   : > { %s2617_s19 = sshll.u32 %s537_s18, 3  ;;  %p555_p10 = scmp.lt.s32.totalorder %s554_s23, 3 }
  0x13   : > { %s539_s22 = scalar_lea.vmem %s3032_s0, %s2617_s19  ;;  %s2075_s14 = sshll.u32 %s548_s24, 3  ;;  %v2704_v51 = vadd.s32 128, %v2700_v48 }
  0x14   : > { %v2623_v0 = vld [vmem:[%s539_s22] sm:$0xff]  ;;  %s550_s16 = scalar_lea.vmem %s3033_s1, %s2075_s14  ;;  %s3080_s23 = smov (!%p555_p10, %s554_s23), 3 }
  0x15   : > { %v593_v1 = vmul.f32 0.1, %v2623_v0  ;;  %s2445_s18 = scalar_select %p576_p8, 255, 0  ;;  %vm590_vm0 = vcmp.ge.f32.partialorder %v2623_v0, 0.0 }
  0x16   : > { %s3082_s23 = smov (!%p555_p10, %s3080_s23), 3  ;;  %s2492_s22 = smov 127  }
  0x17   : > { %v2631_v2 = vld [vmem:[%s550_s16] sm:%s2445_s18]  ;;  %v596_v4 = vsel %vm590_vm0, %v2623_v0, %v593_v1  ;;  %s562_s30 = sadd.s32 %s2066_s17, %s3082_s23  ;;  %s2493_s24 = smov 126  }
  0x18   : > { %vm589_vm1 = vcmp.ge.f32.partialorder %v2631_v2, 0.0  ;;  %v592_v3 = vmul.f32 0.1, %v2631_v2  ;;  %s2080_s14 = sshll.u32 %s562_s30, 3  ;;  %s2494_s17 = smov 15  }
  0x19   : > { %s564_s21 = scalar_lea.vmem %s3034_s2, %s2080_s14  ;;  %s2697_s14 = sshll.u32 %s2474_s25, 7 }
  0x1a   : > { %v595_v5 = vsel %vm589_vm1, %v2631_v2, %v592_v3  ;;  %s2448_s26 = scalar_select %p534_p6, 255, 0  ;;  %v724_v3 = vld [vmem:[%s3038_s6] sm:$0xff] }
  0x1b   : > { %v2637_v6 = vpack.i.bf16 %v596_v4, %v595_v5  ;;  %s702_s15 = sadd.s32 4294967282, %s2697_s14  ;;  %s2496_s25 = smov 13   ;;  %v2089_v4 = vld [vmem:[%s3036_s4 + $0x8] sm:$0xff] }
  0x1c   : > { %v2648_v7 = vld [vmem:[%s564_s21] sm:%s2448_s26]  ;;  %v706_v49 = vstv %s702_s15  ;;  %v2093_v5 = vld [vmem:[%s3038_s6 + $0x8] sm:$0xff]  ;;  %s789_s15 = sadd.s32 4294967283, %s2697_s14  ;;  %s2499_s21 = smov 124  }
  0x1d   : > { %2192 = vrot.lane.b32.xlu1 %v2637_v6, %s2492_s22  ;;  %2187 = vrot.lane.b32.xlu0 %v2637_v6, %s2493_s24  ;;  %vm591_vm2 = vcmp.ge.f32.partialorder %v2648_v7, 0.0  ;;  %v594_v8 = vmul.f32 0.1, %v2648_v7  ;;  %v707_v50 = vadd.s32 %v706_v49, %v2700_v48  ;;  %v708_v54 = vadd.s32 %v706_v49, %v2704_v51  ;;  %s893_s23 = sadd.s32 4294967286, %s2697_s14  ;;  %s2500_s16 = smov 27  }
  0x1e   : > { %s2502_s18 = smov 118   ;;  %s2503_s26 = smov 23  }
  0x1f   : > { %v2653_v9 = vsel %vm591_vm2, %v2648_v7, %v594_v8  ;;  %vm709_vm7 = vcmp.ge.s32.totalorder %v707_v50, 0  ;;  %vm711_vm8 = vcmp.lt.s32.totalorder %v707_v50, 64  ;;  %vm710_vm10 = vcmp.ge.s32.totalorder %v708_v54, 0  ;;  %s1406_s30 = sadd.s32 4294967273, %s2697_s14 }
  0x20   : > { %vm713_vm9 = vmand %vm709_vm7, %vm711_vm8  ;;  %vm712_vm11 = vcmp.lt.s32.totalorder %v708_v54, 64 }
  0x21   : > { %vm714_vm12 = vmand %vm710_vm10, %vm712_vm11  ;;  %vm3048_vm11 = vcmask 998400  }
  0x25   : > { %607 = vrot.lane.b32.xlu1 %v2653_v9, %s2492_s22  ;;  %616 = vrot.lane.b32.xlu0 %v2653_v9, %s2493_s24 }
  0x2d   : > { %2207 = vrot.lane.b32.xlu0 %v2637_v6, %s2494_s17 }
  0x35   : > { %623 = vperm.xlu0 %2216, %v599_v27  }
  0x3d   : > { %806 = vrot.lane.b32.xlu0 %v2623_v0, %s2496_s25 }
  0x8f   : > { %v2193_v10 = vpop.permute.xlu1 %2192  ;;  %v2188_v11 = vpop.permute.xlu0 %2187 }
  0x90   : > { %v2190_v12 = vunpack.i.h.bf16 %v2188_v11  ;;  %v2189_v13 = vunpack.i.l.bf16 %v2188_v11  ;;  %v2195_v20 = vunpack.i.h.bf16 %v2193_v10  ;;  %v2194_v21 = vunpack.i.l.bf16 %v2193_v10 }
  0x92   : > { %v619_v17 = vsel %vm618_vm3, %v2189_v13, %v2190_v12  ;;  %v2677_v23 = vsel %vm609_vm4, %v2194_v21, %v2195_v20 }
  0x97   : > { %v2660_v14 = vpop.permute.xlu1 %607  ;;  %v2662_v15 = vpop.permute.xlu0 %616 }
  0x98   : > { %v2211_v16 = vpack.i.bf16 %v2660_v14, %v2662_v15  ;;  %v620_v18 = vsel %vm618_vm3, %v2190_v12, %v2662_v15  ;;  %v2674_v22 = vsel %vm609_vm4, %v2195_v20, %v2660_v14  ;;  %v723_v20 = vld [vmem:[%s3037_s5] sm:$0xff] }
  0x99   : > { %v2669_v19 = vpack.i.bf16 %v620_v18, %v619_v17  ;;  %v2201_v24 = vpack.i.bf16 %v2674_v22, %v2677_v23 }
  0x9a   : > { %2212 = vrot.lane.b32.xlu1 %v2211_v16, %s2494_s17 }
  0x9b   : > { %2197 = vrot.lane.b32.xlu2 %v2669_v19, %s2494_s17 }
  0x9f   : > { %v2208_v31 = vpop.permute.xlu0 %2207 }
  0xa0   : > { %v2210_v32 = vunpack.i.h.bf16 %v2208_v31  ;;  %v2209_v33 = vunpack.i.l.bf16 %v2208_v31 }
  0xa2   : > { %v645_v38 = vsel %vm644_vm5, %v2209_v33, %v2210_v32 }
  0xa3   : > { %2202 = vrot.lane.b32.xlu2 %v2201_v24, %s2494_s17  ;;  %v790_v24 = vstv %s789_s15  ;;  %s1079_s15 = sadd.s32 4294967292, %s2697_s14 }
  0xa4   : > { %v791_v26 = vadd.s32 %v790_v24, %v2700_v48 }
  0xa6   : > { %vm793_vm1 = vcmp.ge.s32.totalorder %v791_v26, 0  ;;  %vm795_vm2 = vcmp.lt.s32.totalorder %v791_v26, 64 }
  0xa7   : > { %v624_v52 = vpop.permute.xlu0 %623  ;;  %vm797_vm8 = vmand %vm793_vm1, %vm795_vm2 }
  0xab   : > { %630 = vrot.lane.b32.xlu2 %v2653_v9, %s2494_s17  ;;  %s979_s17 = sadd.s32 4294967287, %s2697_s14 }
  0xaf   : > { %v807_v27 = vpop.permute.xlu0 %806 }
  0xf5   : > { %v2198_v25 = vpop.permute.xlu2 %2197 }
  0xf6   : > { %v2200_v28 = vunpack.i.h.bf16 %v2198_v25  ;;  %v2199_v29 = vunpack.i.l.bf16 %v2198_v25  ;;  %v792_v25 = vadd.s32 %v790_v24, %v2704_v51 }
  0xf8   : > { %v649_v30 = vsel %vm644_vm5, %v2199_v29, %v2200_v28  ;;  %vm794_vm15 = vcmp.ge.s32.totalorder %v792_v25, 0  ;;  %vm796_vm0 = vcmp.lt.s32.totalorder %v792_v25, 64 }
  0xf9   : > { %674 = vmatpush.msra.mxu1 %v649_v30  ;;  %vm798_vm7 = vmand %vm794_vm15, %vm796_vm0 }
  0xfd   : > { %v2203_v34 = vpop.permute.xlu2 %2202 }
  0xfe   : > { %v2205_v35 = vunpack.i.h.bf16 %v2203_v34  ;;  %v2204_v36 = vunpack.i.l.bf16 %v2203_v34 }
 0x100   : > { %v647_v37 = vsel %vm644_vm5, %v2204_v36, %v2205_v35 }
 0x101   : > { %675 = vmatpush.msra.mxu1 %v647_v37 }
 0x103   : > { %676 = vmatpush.msra.mxu1 %v645_v38 }
 0x104   : > { %2083 = vmatmul.msk.f32.vlgmr.msra.gmra.mxu1 %vm657_vm6, %v598_v39 }
 0x105   : > { %v631_v44 = vpop.permute.xlu2 %630 }
 0x106   : > { %v646_v46 = vsel %vm644_vm5, %v2210_v32, %v631_v44 }
 0x10c   : > { %v2213_v40 = vpop.permute.xlu1 %2212 }
 0x10d   : > { %v2215_v41 = vunpack.i.h.bf16 %v2213_v40  ;;  %v2214_v42 = vunpack.i.l.bf16 %v2213_v40 }
 0x10f   : > { %v650_v43 = vsel %vm644_vm5, %v2200_v28, %v2214_v42  ;;  %v648_v45 = vsel %vm644_vm5, %v2205_v35, %v2215_v41  ;;  %vm810_vm5 = vcmask 105472  }
 0x110   : > { %694 = vmatpush.msrb.mxu1 %v650_v43 }
 0x112   : > { %695 = vmatpush.msrb.mxu1 %v648_v45 }
 0x114   : > { %696 = vmatpush.msrb.mxu1 %v646_v46 }
 0x115   : > { %2084 = vmatmul.msk.f32.vlgmr.msrb.gmra.mxu1 %vm657_vm6, %v598_v39 }
 0x181   : > { %v678_v53 = vpop.f32.mrf.mxu1 }
 0x182   : > { %v679_v55 = vadd.f32 %v678_v53, %v624_v52 }
 0x184   : > { %v715_v56 = vsel %vm713_vm9, %v679_v55, 0.0  ;;  %v2088_v55 = vld [vmem:[%s3035_s3 + $0x8] sm:$0xff] }
 0x185   : > { %v719_v59 = vmul.f32 0.1, %v715_v56  ;;  %vm717_vm13 = vcmp.ge.f32.partialorder %v715_v56, 0.0 }
 0x187   : > { %v721_v62 = vsel %vm717_vm13, %v715_v56, %v719_v59  ;;  %v894_v56 = vstv %s893_s23  ;;  %s2501_s23 = smov 123  }
 0x192   : > { %v698_v57 = vpop.f32.mrf.mxu1 }
 0x193   : > { %v699_v58 = vadd.f32 %v698_v57, %v624_v52  ;;  %v896_v57 = vadd.s32 %v894_v56, %v2704_v51 }
 0x195   : > { %v716_v60 = vsel %vm714_vm12, %v699_v58, 0.0  ;;  %vm833_vm12 = vcmask 1022976   ;;  %v895_v58 = vadd.s32 %v894_v56, %v2700_v48  ;;  %vm898_vm13 = vcmp.ge.s32.totalorder %v896_v57, 0 }
 0x196   : > { %vm718_vm14 = vcmp.ge.f32.partialorder %v716_v60, 0.0  ;;  %v720_v61 = vmul.f32 0.1, %v716_v60 }
 0x197   : > { %vm897_vm15 = vcmp.ge.s32.totalorder %v895_v58, 0  ;;  %vm899_vm0 = vcmp.lt.s32.totalorder %v895_v58, 64 }
 0x198   : > { %v722_v63 = vsel %vm718_vm14, %v716_v60, %v720_v61  ;;  %vm900_vm14 = vcmp.lt.s32.totalorder %v896_v57, 64  ;;  %vm901_vm2 = vmand %vm897_vm15, %vm899_vm0 }
 0x199   : > { %v2222_v1 = vpack.i.bf16 %v722_v63, %v721_v62  ;;  %vm902_vm1 = vmand %vm898_vm13, %vm900_vm14 }
 0x19b   : > { %2223 = vrot.lane.b32.xlu2 %v2222_v1, %s2492_s22  ;;  %2218 = vrot.lane.b32.xlu1 %v2222_v1, %s2493_s24 }
 0x1a3   : > { %804 = vrot.lane.b32.xlu2 %v2631_v2, %s2496_s25  ;;  %743 = vperm.xlu1 %2227, %v724_v3  }
 0x1ab   : > { %808 = vrot.lane.b32.xlu1 %v2648_v7, %s2496_s25  ;;  %s2497_s25 = smov 125  }
 0x1b3   : > { %847 = vperm.xlu1 %2227, %v2089_v4  }
 0x1bb   : > { %933 = vperm.xlu1 %2227, %v2093_v5  }
 0x1c3   : > { %2249 = vrot.lane.b32.xlu1 %v2637_v6, %s2499_s21 }
 0x1cb   : > { %1196 = vrot.lane.b32.xlu1 %v2653_v9, %s2497_s25 }
 0x1f5   : > { %v2224_v8 = vpop.permute.xlu2 %2223 }
 0x1f6   : > { %v2225_v11 = vunpack.i.l.bf16 %v2224_v8  ;;  %v2226_v16 = vunpack.i.h.bf16 %v2224_v8 }
 0x1f8   : > { %v731_v18 = vsel %vm609_vm4, %v2225_v11, %v2226_v16 }
 0x1fd   : > { %v805_v28 = vpop.permute.xlu2 %804 }
 0x1fe   : > { %v811_v35 = vsel %vm810_vm5, %v805_v28, %v807_v27 }
 0x20d   : > { %v2219_v10 = vpop.permute.xlu1 %2218 }
 0x20e   : > { %v2220_v12 = vunpack.i.l.bf16 %v2219_v10  ;;  %v2221_v13 = vunpack.i.h.bf16 %v2219_v10 }
 0x210   : > { %782 = vmatpush.msra.mxu3 %v2221_v13  ;;  %v738_v17 = vsel %vm618_vm3, %v2220_v12, %v2221_v13 }
 0x211   : > { %762 = vmatpush.msra.mxu2 %v738_v17 }
 0x212   : > { %783 = vmatpush.msra.mxu3 %v2226_v16 }
 0x213   : > { %763 = vmatpush.msra.mxu2 %v731_v18 }
 0x214   : > { %784 = vmatpush.msra.mxu3 %v722_v63 }
 0x215   : > { %764 = vmatpush.msra.mxu2 %v721_v62  ;;  %2087 = vmatmul.msk.f32.vlgmr.msra.gmra.mxu3 %vm657_vm6, %v723_v20  ;;  %v744_v21 = vpop.permute.xlu1 %743 }
 0x216   : > { %2086 = vmatmul.msk.f32.vlgmr.msra.gmra.mxu2 %vm657_vm6, %v723_v20 }
 0x21d   : > { %v809_v29 = vpop.permute.xlu1 %808 }
 0x21e   : > { %v812_v33 = vsel %vm810_vm5, %v807_v27, %v809_v29 }
 0x225   : > { %v848_v59 = vpop.permute.xlu1 %847 }
 0x22d   : > { %v934_v12 = vpop.permute.xlu1 %933 }
 0x298   : > { %v786_v30 = vpop.f32.mrf.mxu3 }
 0x299   : > { %v787_v31 = vadd.f32 %v786_v30, %v744_v21  ;;  %v766_v32 = vpop.f32.mrf.mxu2 }
 0x29a   : > { %v767_v34 = vadd.f32 %v766_v32, %v744_v21  ;;  %v2250_v21 = vpop.permute.xlu1 %2249 }
 0x29b   : > { %v800_v36 = vsel %vm798_vm7, %v787_v31, 0.0  ;;  %v2252_v24 = vunpack.i.h.bf16 %v2250_v21  ;;  %v2251_v25 = vunpack.i.l.bf16 %v2250_v21 }
 0x29c   : > { %v799_v37 = vsel %vm797_vm8, %v767_v34, 0.0  ;;  %v816_v38 = vadd.f32 %v812_v33, %v800_v36  ;;  %vm997_vm8 = vcmask 1014784   ;;  %v2092_v34 = vld [vmem:[%s3037_s5 + $0x8] sm:$0xff] }
 0x29d   : > { %v815_v39 = vadd.f32 %v811_v35, %v799_v37  ;;  %v1206_v26 = vsel %vm997_vm8, %v2251_v25, %v2252_v24  ;;  %v1191_v37 = vld [vmem:[%s3040_s8] sm:$0xff] }
 0x29e   : > { %vm818_vm9 = vcmp.ge.f32.partialorder %v816_v38, 0.0  ;;  %v820_v40 = vmul.f32 0.1, %v816_v38 }
 0x29f   : > { %vm817_vm10 = vcmp.ge.f32.partialorder %v815_v39, 0.0  ;;  %v819_v41 = vmul.f32 0.1, %v815_v39 }
 0x2a0   : > { %v822_v42 = vsel %vm818_vm9, %v816_v38, %v820_v40 }
 0x2a1   : > { %v821_v43 = vsel %vm817_vm10, %v815_v39, %v819_v41 }
 0x2a2   : > { %v2233_v44 = vpack.i.bf16 %v822_v42, %v821_v43 }
 0x2a4   : > { %2234 = vrot.lane.b32.xlu0 %v2233_v44, %s2497_s25  ;;  %2229 = vrot.lane.b32.xlu2 %v2233_v44, %s2498_s20 }
 0x2fe   : > { %v2230_v45 = vpop.permute.xlu2 %2229 }
 0x2ff   : > { %v2232_v46 = vunpack.i.h.bf16 %v2230_v45  ;;  %v2231_v47 = vunpack.i.l.bf16 %v2230_v45 }
 0x301   : > { %886 = vmatpush.msra.mxu1 %v2232_v46  ;;  %v842_v49 = vsel %vm3048_vm11, %v2231_v47, %v2232_v46 }
 0x302   : > { %866 = vmatpush.msra.mxu0 %v842_v49 }
 0x316   : > { %v2235_v50 = vpop.permute.xlu0 %2234 }
 0x317   : > { %v2237_v52 = vunpack.i.h.bf16 %v2235_v50  ;;  %v2236_v53 = vunpack.i.l.bf16 %v2235_v50 }
 0x319   : > { %887 = vmatpush.msra.mxu1 %v2237_v52  ;;  %v834_v54 = vsel %vm833_vm12, %v2236_v53, %v2237_v52 }
 0x31a   : > { %867 = vmatpush.msra.mxu0 %v834_v54 }
 0x31b   : > { %888 = vmatpush.msra.mxu1 %v822_v42 }
 0x31c   : > { %868 = vmatpush.msra.mxu0 %v821_v43  ;;  %2091 = vmatmul.msk.f32.vlgmr.msra.gmra.mxu1 %vm657_vm6, %v2088_v55 }
 0x31d   : > { %2090 = vmatmul.msk.f32.vlgmr.msra.gmra.mxu0 %vm657_vm6, %v2088_v55 }
 0x399   : > { %v890_v60 = vpop.f32.mrf.mxu1 }
 0x39a   : > { %v891_v61 = vadd.f32 %v890_v60, %v848_v59  ;;  %v870_v62 = vpop.f32.mrf.mxu0 }
 0x39b   : > { %v871_v63 = vadd.f32 %v870_v62, %v848_v59  ;;  %v2293_v62 = vpack.i.bf16 %v2660_v14, %v2674_v22 }
 0x39c   : > { %v904_v1 = vsel %vm902_vm1, %v891_v61, 0.0 }
 0x39d   : > { %vm906_vm5 = vcmp.ge.f32.partialorder %v904_v1, 0.0  ;;  %v908_v3 = vmul.f32 0.1, %v904_v1  ;;  %v903_v4 = vsel %vm901_vm2, %v871_v63, 0.0  ;;  %v2283_v63 = vpack.i.bf16 %v2677_v23, %v2662_v15 }
 0x39e   : > { %vm905_vm7 = vcmp.ge.f32.partialorder %v903_v4, 0.0  ;;  %v907_v5 = vmul.f32 0.1, %v903_v4 }
 0x39f   : > { %v910_v8 = vsel %vm906_vm5, %v904_v1, %v908_v3  ;;  %v2097_v1 = vld [vmem:[%s3036_s4 + $0x10] sm:$0xff]  ;;  %vm3047_vm5 = vcmask 965632  }
 0x3a0   : > { %v909_v10 = vsel %vm905_vm7, %v903_v4, %v907_v5  ;;  %vm3046_vm7 = vcmask 1006592  }
 0x3a1   : > { %v2243_v11 = vpack.i.bf16 %v910_v8, %v909_v10 }
 0x3a3   : > { %2244 = vrot.lane.b32.xlu0 %v2243_v11, %s2492_s22  ;;  %2239 = vrot.lane.b32.xlu2 %v2243_v11, %s2493_s24 }
 0x3ab   : > { %995 = vrot.lane.b32.xlu0 %v816_v38, %s2499_s21  ;;  %993 = vrot.lane.b32.xlu2 %v815_v39, %s2499_s21  ;;  %v1197_v39 = vpop.permute.xlu1 %1196 }
 0x3b3   : > { %1204 = vrot.lane.b32.xlu2 %v2653_v9, %s2499_s21  ;;  %2254 = vrot.lane.b32.xlu0 %v2637_v6, %s2497_s25 }
 0x3fd   : > { %v2240_v13 = vpop.permute.xlu2 %2239 }
 0x3fe   : > { %v2241_v16 = vunpack.i.l.bf16 %v2240_v13  ;;  %v2242_v17 = vunpack.i.h.bf16 %v2240_v13 }
 0x400   : > { %972 = vmatpush.msrb.mxu3 %v2242_v17  ;;  %v928_v18 = vsel %vm618_vm3, %v2241_v16, %v2242_v17 }
 0x401   : > { %952 = vmatpush.msrb.mxu2 %v928_v18 }
 0x405   : > { %v994_v20 = vpop.permute.xlu2 %993 }
 0x40d   : > { %v1205_v27 = vpop.permute.xlu2 %1204 }
 0x40e   : > { %v1207_v28 = vsel %vm997_vm8, %v2252_v24, %v1205_v27 }
 0x40f   : > { %v2258_v29 = vpack.i.bf16 %v1207_v28, %v1206_v26 }
 0x411   : > { %2259 = vrot.lane.b32.xlu1 %v2258_v29, %s2500_s16 }
 0x415   : > { %v2245_v30 = vpop.permute.xlu0 %2244 }
 0x416   : > { %v2246_v31 = vunpack.i.l.bf16 %v2245_v30  ;;  %v2247_v32 = vunpack.i.h.bf16 %v2245_v30 }
 0x418   : > { %973 = vmatpush.msrb.mxu3 %v2247_v32  ;;  %v921_v33 = vsel %vm609_vm4, %v2246_v31, %v2247_v32 }
 0x419   : > { %2274 = vrot.lane.b32.xlu1 %v2669_v19, %s2500_s16  ;;  %953 = vmatpush.msrb.mxu2 %v921_v33 }
 0x41a   : > { %974 = vmatpush.msrb.mxu3 %v910_v8 }
 0x41b   : > { %954 = vmatpush.msrb.mxu2 %v909_v10  ;;  %2095 = vmatmul.msk.f32.vlgmr.msrb.gmra.mxu3 %vm657_vm6, %v2092_v34 }
 0x41c   : > { %2094 = vmatmul.msk.f32.vlgmr.msrb.gmra.mxu2 %vm657_vm6, %v2092_v34 }
 0x41d   : > { %v996_v35 = vpop.permute.xlu0 %995 }
 0x41e   : > { %v998_v36 = vsel %vm997_vm8, %v994_v20, %v996_v35  ;;  %v2096_v20 = vld [vmem:[%s3035_s3 + $0x10] sm:$0xff] }
 0x421   : > { %2299 = vrot.lane.b32.xlu1 %v2637_v6, %s2500_s16  ;;  %v980_v6 = vstv %s979_s17  ;;  %s1165_s17 = sadd.s32 4294967293, %s2697_s14 }
 0x422   : > { %v982_v45 = vadd.s32 %v980_v6, %v2704_v51  ;;  %v981_v46 = vadd.s32 %v980_v6, %v2700_v48 }
 0x424   : > { %vm984_vm9 = vcmp.ge.s32.totalorder %v982_v45, 0  ;;  %vm986_vm10 = vcmp.lt.s32.totalorder %v982_v45, 64  ;;  %vm983_vm13 = vcmp.ge.s32.totalorder %v981_v46, 0  ;;  %vm985_vm14 = vcmp.lt.s32.totalorder %v981_v46, 64  ;;  %v1190_v45 = vld [vmem:[%s3039_s7] sm:$0xff] }
 0x425   : > { %v2255_v19 = vpop.permute.xlu0 %2254  ;;  %vm988_vm15 = vmand %vm984_vm9, %vm986_vm10  ;;  %vm1243_vm9 = vcmask 220160   ;;  %vm1264_vm10 = vcmask 326656   ;;  %v1080_v46 = vstv %s1079_s15  ;;  %s2504_s15 = smov 119  }
 0x426   : > { %v2257_v38 = vunpack.i.h.bf16 %v2255_v19  ;;  %v2256_v42 = vunpack.i.l.bf16 %v2255_v19  ;;  %vm987_vm0 = vmand %vm983_vm13, %vm985_vm14 }
 0x428   : > { %v1199_v40 = vsel %vm833_vm12, %v2257_v38, %v1197_v39  ;;  %v1198_v43 = vsel %vm833_vm12, %v2256_v42, %v2257_v38 }
 0x429   : > { %1210 = vperm.xlu1 %2227, %v1191_v37   ;;  %v2268_v41 = vpack.i.bf16 %v1197_v39, %v1199_v40  ;;  %v2263_v44 = vpack.i.bf16 %v1198_v43, %v1205_v27 }
 0x42b   : > { %2269 = vrot.lane.b32.xlu0 %v2268_v41, %s2500_s16  ;;  %2264 = vrot.lane.b32.xlu2 %v2263_v44, %s2500_s16 }
 0x483   : > { %v2260_v22 = vpop.permute.xlu1 %2259 }
 0x484   : > { %v2262_v16 = vunpack.i.h.bf16 %v2260_v22 }
 0x485   : > { %v2265_v3 = vpop.permute.xlu2 %2264 }
 0x486   : > { %v2266_v17 = vunpack.i.l.bf16 %v2265_v3  ;;  %v2267_v24 = vunpack.i.h.bf16 %v2265_v3 }
 0x488   : > { %v1253_v27 = vsel %vm1243_vm9, %v2262_v16, %v2266_v17 }
 0x48b   : > { %v2275_v8 = vpop.permute.xlu1 %2274 }
 0x48c   : > { %v2277_v28 = vunpack.i.h.bf16 %v2275_v8  ;;  %v2276_v29 = vunpack.i.l.bf16 %v2275_v8 }
 0x48e   : > { %v1248_v41 = vsel %vm1243_vm9, %v2276_v29, %v2277_v28 }
 0x493   : > { %v2300_v30 = vpop.permute.xlu1 %2299 }
 0x494   : > { %v2302_v32 = vunpack.i.h.bf16 %v2300_v30  ;;  %v2301_v33 = vunpack.i.l.bf16 %v2300_v30 }
 0x496   : > { %v1244_v6 = vsel %vm1243_vm9, %v2301_v33, %v2302_v32 }
 0x49d   : > { %v2270_v23 = vpop.permute.xlu0 %2269 }
 0x49e   : > { %v976_v47 = vpop.f32.mrf.mxu3  ;;  %v2272_v21 = vunpack.i.h.bf16 %v2270_v23  ;;  %v2271_v25 = vunpack.i.l.bf16 %v2270_v23 }
 0x49f   : > { %v977_v49 = vadd.f32 %v976_v47, %v934_v12  ;;  %v956_v50 = vpop.f32.mrf.mxu2  ;;  %v1082_v47 = vadd.s32 %v1080_v46, %v2704_v51 }
 0x4a0   : > { %v957_v52 = vadd.f32 %v956_v50, %v934_v12  ;;  %v1250_v38 = vsel %vm1243_vm9, %v2267_v24, %v2271_v25 }
 0x4a1   : > { %v990_v53 = vsel %vm988_vm15, %v977_v49, 0.0  ;;  %v1081_v49 = vadd.s32 %v1080_v46, %v2700_v48  ;;  %vm1084_vm13 = vcmp.ge.s32.totalorder %v1082_v47, 0  ;;  %vm1086_vm14 = vcmp.lt.s32.totalorder %v1082_v47, 64 }
 0x4a2   : > { %v2780_v54 = vadd.f32 %v996_v35, %v990_v53  ;;  %v989_v55 = vsel %vm987_vm0, %v957_v52, 0.0  ;;  %v1251_v35 = vsel %vm1243_vm9, %v2271_v25, %v2272_v21  ;;  %v1327_v25 = vld [vmem:[%s3042_s10] sm:$0xff] }
 0x4a3   : > { %v2782_v56 = vadd.f32 %v998_v36, %v989_v55  ;;  %vm1083_vm15 = vcmp.ge.s32.totalorder %v1081_v49, 0  ;;  %vm1085_vm0 = vcmp.lt.s32.totalorder %v1081_v49, 64 }
 0x4a4   : > { %vm1004_vm1 = vcmp.ge.f32.partialorder %v2780_v54, 0.0  ;;  %v1006_v57 = vmul.f32 0.1, %v2780_v54 }
 0x4a5   : > { %vm1003_vm2 = vcmp.ge.f32.partialorder %v2782_v56, 0.0  ;;  %v1005_v58 = vmul.f32 0.1, %v2782_v56 }
 0x4a6   : > { %v1008_v59 = vsel %vm1004_vm1, %v2780_v54, %v1006_v57  ;;  %vm1088_vm1 = vmand %vm1084_vm13, %vm1086_vm14 }
 0x4a7   : > { %v1007_v60 = vsel %vm1003_vm2, %v2782_v56, %v1005_v58  ;;  %vm1087_vm2 = vmand %vm1083_vm15, %vm1085_vm0 }
 0x4a8   : > { %v2288_v61 = vpack.i.bf16 %v1008_v59, %v1007_v60 }
 0x4aa   : > { %2289 = vrot.lane.b32.xlu0 %v2288_v61, %s2501_s23  ;;  %2279 = vrot.lane.b32.xlu2 %v2288_v61, %s2502_s18 }
 0x4b2   : > { %2294 = vrot.lane.b32.xlu0 %v2293_v62, %s2500_s16  ;;  %2284 = vrot.lane.b32.xlu2 %v2283_v63, %s2500_s16 }
 0x4ba   : > { %1033 = vperm.xlu0 %2216, %v2097_v1   ;;  %1217 = vrot.lane.b32.xlu2 %v2653_v9, %s2500_s16  ;;  %v2261_v9 = vunpack.i.l.bf16 %v2260_v22  ;;  %s1308_s16 = sadd.s32 4294967271, %s2697_s14 }
 0x4bb   : > { %v1309_v53 = vstv %s1308_s16  ;;  %s2505_s16 = smov 116  }
 0x4bc   : > { %v1252_v31 = vsel %vm1243_vm9, %v2261_v9, %v2262_v16  ;;  %v1310_v63 = vadd.s32 %v1309_v53, %v2700_v48 }
 0x4be   : > { %vm1312_vm13 = vcmp.ge.s32.totalorder %v1310_v63, 0  ;;  %vm1314_vm14 = vcmp.lt.s32.totalorder %v1310_v63, 64 }
 0x4bf   : > { %vm1316_vm0 = vmand %vm1312_vm13, %vm1314_vm14 }
 0x504   : > { %v2280_v4 = vpop.permute.xlu2 %2279 }
 0x505   : > { %v2282_v5 = vunpack.i.h.bf16 %v2280_v4  ;;  %v2281_v14 = vunpack.i.l.bf16 %v2280_v4 }
 0x507   : > { %1072 = vmatpush.msrb.mxu1 %v2282_v5  ;;  %v1028_v15 = vsel %vm3047_vm5, %v2281_v14, %v2282_v5  ;;  %v1211_v14 = vpop.permute.xlu1 %1210 }
 0x508   : > { %1052 = vmatpush.msrb.mxu0 %v1028_v15 }
 0x50c   : > { %v2285_v11 = vpop.permute.xlu2 %2284 }
 0x50d   : > { %v2286_v26 = vunpack.i.l.bf16 %v2285_v11  ;;  %v2287_v36 = vunpack.i.h.bf16 %v2285_v11 }
 0x50f   : > { %v1249_v40 = vsel %vm1243_vm9, %v2277_v28, %v2286_v26 }
 0x514   : > { %v1218_v39 = vpop.permute.xlu2 %1217 }
 0x515   : > { %v1245_v44 = vsel %vm1243_vm9, %v2302_v32, %v1218_v39 }
 0x51c   : > { %v2290_v10 = vpop.permute.xlu0 %2289 }
 0x51d   : > { %v2292_v12 = vunpack.i.h.bf16 %v2290_v10  ;;  %v2291_v13 = vunpack.i.l.bf16 %v2290_v10 }
 0x51f   : > { %1073 = vmatpush.msrb.mxu1 %v2292_v12  ;;  %v1020_v18 = vsel %vm3046_vm7, %v2291_v13, %v2292_v12 }
 0x520   : > { %1053 = vmatpush.msrb.mxu0 %v1020_v18 }
 0x521   : > { %1074 = vmatpush.msrb.mxu1 %v1008_v59 }
 0x522   : > { %1054 = vmatpush.msrb.mxu0 %v1007_v60  ;;  %2099 = vmatmul.msk.f32.vlgmr.msrb.gmra.mxu1 %vm657_vm6, %v2096_v20  ;;  %v1311_v60 = vadd.s32 %v1309_v53, %v2704_v51 }
 0x523   : > { %1299 = vmatpush.msra.mxu1 %v1253_v27  ;;  %2098 = vmatmul.msk.f32.vlgmr.msrb.gmra.mxu0 %vm657_vm6, %v2096_v20 }
 0x524   : > { %1279 = vmatpush.msra.mxu0 %v1252_v31  ;;  %v2295_v34 = vpop.permute.xlu0 %2294  ;;  %vm1313_vm5 = vcmp.ge.s32.totalorder %v1311_v60, 0  ;;  %vm1315_vm11 = vcmp.lt.s32.totalorder %v1311_v60, 64 }
 0x525   : > { %v2297_v37 = vunpack.i.h.bf16 %v2295_v34  ;;  %v2296_v19 = vunpack.i.l.bf16 %v2295_v34  ;;  %1300 = vmatpush.msra.mxu1 %v1251_v35  ;;  %vm1317_vm15 = vmand %vm1313_vm5, %vm1315_vm11 }
 0x526   : > { %1280 = vmatpush.msra.mxu0 %v1250_v38 }
 0x527   : > { %1301 = vmatpush.msra.mxu1 %v1249_v40  ;;  %v1247_v42 = vsel %vm1243_vm9, %v2296_v19, %v2297_v37  ;;  %v1246_v43 = vsel %vm1243_vm9, %v2287_v36, %v2296_v19 }
 0x528   : > { %1281 = vmatpush.msra.mxu0 %v1248_v41 }
 0x529   : > { %1302 = vmatpush.msra.mxu1 %v1247_v42 }
 0x52a   : > { %1282 = vmatpush.msra.mxu0 %v1246_v43  ;;  %v1326_v43 = vld [vmem:[%s3041_s9] sm:$0xff] }
 0x52b   : > { %1303 = vmatpush.msra.mxu1 %v1245_v44 }
 0x52c   : > { %1283 = vmatpush.msra.mxu0 %v1244_v6  ;;  %2105 = vmatmul.msk.f32.vlgmr.msra.gmra.mxu1 %vm1264_vm10, %v1190_v45  ;;  %v1034_v50 = vpop.permute.xlu0 %1033 }
 0x52d   : > { %2104 = vmatmul.msk.f32.vlgmr.msra.gmra.mxu0 %vm1264_vm10, %v1190_v45  ;;  %v1407_v45 = vstv %s1406_s30  ;;  %s1621_s30 = sadd.s32 4294967281, %s2697_s14 }
 0x52e   : > { %v1409_v47 = vadd.s32 %v1407_v45, %v2704_v51  ;;  %v1408_v49 = vadd.s32 %v1407_v45, %v2700_v48 }
 0x530   : > { %vm1413_vm11 = vcmp.lt.s32.totalorder %v1409_v47, 64  ;;  %vm1410_vm5 = vcmp.ge.s32.totalorder %v1408_v49, 0 }
 0x59f   : > { %v1076_v52 = vpop.f32.mrf.mxu1 }
 0x5a0   : > { %v1077_v55 = vadd.f32 %v1076_v52, %v1034_v50  ;;  %v1056_v57 = vpop.f32.mrf.mxu0 }
 0x5a1   : > { %v1057_v58 = vadd.f32 %v1056_v57, %v1034_v50 }
 0x5a2   : > { %v1090_v59 = vsel %vm1088_vm1, %v1077_v55, 0.0 }
 0x5a3   : > { %vm1092_vm9 = vcmp.ge.f32.partialorder %v1090_v59, 0.0  ;;  %v1094_v61 = vmul.f32 0.1, %v1090_v59  ;;  %v1089_v62 = vsel %vm1087_vm2, %v1057_v58, 0.0  ;;  %vm1412_vm2 = vcmp.lt.s32.totalorder %v1408_v49, 64 }
 0x5a4   : > { %vm1091_vm7 = vcmp.ge.f32.partialorder %v1089_v62, 0.0  ;;  %v1093_v1 = vmul.f32 0.1, %v1089_v62  ;;  %vm1414_vm14 = vmand %vm1410_vm5, %vm1412_vm2 }
 0x5a5   : > { %v1096_v3 = vsel %vm1092_vm9, %v1090_v59, %v1094_v61  ;;  %vm1424_vm9 = vcmask 187392  }
 0x5a6   : > { %v1095_v4 = vsel %vm1091_vm7, %v1089_v62, %v1093_v1 }
 0x5a7   : > { %v2308_v5 = vpack.i.bf16 %v1096_v3, %v1095_v4 }
 0x5a9   : > { %v1305_v15 = vpop.f32.mrf.mxu1  ;;  %2309 = vrot.lane.b32.xlu0 %v2308_v5, %s2492_s22  ;;  %2304 = vrot.lane.b32.xlu2 %v2308_v5, %s2493_s24 }
 0x5aa   : > { %v1306_v22 = vadd.f32 %v1305_v15, %v1211_v14  ;;  %v1285_v23 = vpop.f32.mrf.mxu0 }
 0x5ab   : > { %v1286_v8 = vadd.f32 %v1285_v23, %v1211_v14  ;;  %v2109_v23 = vld [vmem:[%s3040_s8 + $0x8] sm:$0xff] }
 0x5ac   : > { %v1319_v10 = vsel %vm1317_vm15, %v1306_v22, 0.0 }
 0x5ad   : > { %vm1321_vm1 = vcmp.ge.f32.partialorder %v1319_v10, 0.0  ;;  %v1323_v11 = vmul.f32 0.1, %v1319_v10  ;;  %v1318_v12 = vsel %vm1316_vm0, %v1286_v8, 0.0 }
 0x5ae   : > { %vm1320_vm7 = vcmp.ge.f32.partialorder %v1318_v12, 0.0  ;;  %v1322_v13 = vmul.f32 0.1, %v1318_v12 }
 0x5af   : > { %v1325_v16 = vsel %vm1321_vm1, %v1319_v10, %v1323_v11  ;;  %vm1469_vm1 = vcmask 949248  }
 0x5b0   : > { %v1324_v17 = vsel %vm1320_vm7, %v1318_v12, %v1322_v13  ;;  %vm1461_vm7 = vcmask 973824  }
 0x5b1   : > { %v2313_v9 = vpack.i.bf16 %v1325_v16, %v1324_v17 }
 0x5b3   : > { %2314 = vrot.lane.b32.xlu1 %v2313_v9, %s2499_s21  ;;  %2324 = vrot.lane.b32.xlu0 %v2313_v9, %s2493_s24 }
 0x5b4   : > { %2319 = vrot.lane.b32.xlu2 %v2313_v9, %s2497_s25 }
 0x5bb   : > { %2329 = vrot.lane.b32.xlu1 %v2313_v9, %s2492_s22  ;;  %1418 = vrot.lane.b32.xlu0 %v2631_v2, %s2503_s26  ;;  %v2100_v2 = vld [vmem:[%s3037_s5 + $0x10] sm:$0xff] }
 0x5bc   : > { %1360 = vperm.xlu2 %2333, %v1327_v25  }
 0x5c3   : > { %1420 = vrot.lane.b32.xlu1 %v2623_v0, %s2503_s26 }
 0x5c4   : > { %1422 = vrot.lane.b32.xlu2 %v2648_v7, %s2503_s26  ;;  %s1521_s26 = sadd.s32 4294967279, %s2697_s14 }
 0x603   : > { %v2305_v18 = vpop.permute.xlu2 %2304 }
 0x604   : > { %v2307_v20 = vunpack.i.h.bf16 %v2305_v18  ;;  %v2306_v21 = vunpack.i.l.bf16 %v2305_v18 }
 0x606   : > { %1158 = vmatpush.msra.mxu3 %v2307_v20  ;;  %v1114_v24 = vsel %vm618_vm3, %v2306_v21, %v2307_v20 }
 0x607   : > { %1138 = vmatpush.msra.mxu2 %v1114_v24 }
 0x60e   : > { %v2320_v29 = vpop.permute.xlu2 %2319 }
 0x60f   : > { %v2322_v32 = vunpack.i.h.bf16 %v2320_v29  ;;  %v2321_v33 = vunpack.i.l.bf16 %v2320_v29 }
 0x611   : > { %v1348_v19 = vsel %vm833_vm12, %v2321_v33, %v2322_v32 }
 0x616   : > { %v1361_v44 = vpop.permute.xlu2 %1360 }
 0x61b   : > { %v2310_v26 = vpop.permute.xlu0 %2309 }
 0x61c   : > { %v2312_v27 = vunpack.i.h.bf16 %v2310_v26  ;;  %v2311_v28 = vunpack.i.l.bf16 %v2310_v26 }
 0x61e   : > { %1159 = vmatpush.msra.mxu3 %v2312_v27  ;;  %v1107_v0 = vsel %vm609_vm4, %v2311_v28, %v2312_v27  ;;  %v1423_v52 = vpop.permute.xlu2 %1422 }
 0x61f   : > { %1139 = vmatpush.msra.mxu2 %v1107_v0  ;;  %v2108_v0 = vld [vmem:[%s3039_s7 + $0x8] sm:$0xff] }
 0x620   : > { %1160 = vmatpush.msra.mxu3 %v1096_v3 }
 0x621   : > { %1140 = vmatpush.msra.mxu2 %v1095_v4  ;;  %2103 = vmatmul.msk.f32.vlgmr.msra.gmra.mxu3 %vm657_vm6, %v2100_v2 }
 0x622   : > { %2102 = vmatmul.msk.f32.vlgmr.msra.gmra.mxu2 %vm657_vm6, %v2100_v2  ;;  %vm1411_vm6 = vcmp.ge.s32.totalorder %v1409_v47, 0  ;;  %v1522_v2 = vstv %s1521_s26  ;;  %s2508_s26 = smov 108  }
 0x623   : > { %vm1415_vm13 = vmand %vm1411_vm6, %vm1413_vm11  ;;  %vm3051_vm6 = vcmask 998400   ;;  %v1524_v29 = vadd.s32 %v1522_v2, %v2704_v51 }
 0x625   : > { %v2315_v30 = vpop.permute.xlu1 %2314  ;;  %v2325_v31 = vpop.permute.xlu0 %2324  ;;  %vm1526_vm11 = vcmp.ge.s32.totalorder %v1524_v29, 0  ;;  %vm1528_vm5 = vcmp.lt.s32.totalorder %v1524_v29, 64 }
 0x626   : > { %v2317_v7 = vunpack.i.h.bf16 %v2315_v30  ;;  %v2316_v34 = vunpack.i.l.bf16 %v2315_v30  ;;  %v2327_v35 = vunpack.i.h.bf16 %v2325_v31  ;;  %v2326_v36 = vunpack.i.l.bf16 %v2325_v31 }
 0x627   : > { %v1523_v30 = vadd.s32 %v1522_v2, %v2700_v48 }
 0x628   : > { %1397 = vmatpush.msrb.mxu3 %v2317_v7  ;;  %v1355_v37 = vsel %vm997_vm8, %v2316_v34, %v2317_v7  ;;  %v1341_v38 = vsel %vm618_vm3, %v2326_v36, %v2327_v35 }
 0x629   : > { %1377 = vmatpush.msrb.mxu2 %v1355_v37  ;;  %vm1525_vm2 = vcmp.ge.s32.totalorder %v1523_v30, 0 }
 0x62a   : > { %1398 = vmatpush.msrb.mxu3 %v2322_v32 }
 0x62b   : > { %1378 = vmatpush.msrb.mxu2 %v1348_v19 }
 0x62c   : > { %1399 = vmatpush.msrb.mxu3 %v2327_v35 }
 0x62d   : > { %v2330_v39 = vpop.permute.xlu1 %2329  ;;  %1379 = vmatpush.msrb.mxu2 %v1341_v38  ;;  %v1419_v53 = vpop.permute.xlu0 %1418 }
 0x62e   : > { %v2332_v40 = vunpack.i.h.bf16 %v2330_v39  ;;  %v2331_v41 = vunpack.i.l.bf16 %v2330_v39 }
 0x630   : > { %1400 = vmatpush.msrb.mxu3 %v2332_v40  ;;  %v1334_v42 = vsel %vm609_vm4, %v2331_v41, %v2332_v40  ;;  %v2113_v41 = vld [vmem:[%s3042_s10 + $0x8] sm:$0xff] }
 0x631   : > { %1380 = vmatpush.msrb.mxu2 %v1334_v42 }
 0x632   : > { %1401 = vmatpush.msrb.mxu3 %v1325_v16 }
 0x633   : > { %1381 = vmatpush.msrb.mxu2 %v1324_v17  ;;  %2107 = vmatmul.msk.f32.vlgmr.msrb.gmra.mxu3 %vm1264_vm10, %v1326_v43 }
 0x634   : > { %2106 = vmatmul.msk.f32.vlgmr.msrb.gmra.mxu2 %vm1264_vm10, %v1326_v43 }
 0x635   : > { %v1421_v50 = vpop.permute.xlu1 %1420 }
 0x636   : > { %v1426_v59 = vsel %vm1424_vm9, %v1421_v50, %v1423_v52  ;;  %v1425_v61 = vsel %vm1424_vm9, %v1419_v53, %v1421_v50  ;;  %vm1527_vm9 = vcmp.lt.s32.totalorder %v1523_v30, 64 }
 0x6a4   : > { %v2860_v6 = vpop.f32.mrf.mxu3 }
 0x6a5   : > { %v2862_v46 = vpop.f32.mrf.mxu2 }
 0x6b6   : > { %v1403_v55 = vpop.f32.mrf.mxu3 }
 0x6b7   : > { %v1404_v57 = vadd.f32 %v1403_v55, %v1361_v44  ;;  %v1383_v58 = vpop.f32.mrf.mxu2 }
 0x6b8   : > { %v1384_v60 = vadd.f32 %v1383_v58, %v1361_v44 }
 0x6b9   : > { %v1417_v62 = vsel %vm1415_vm13, %v1404_v57, 0.0  ;;  %vm1530_vm13 = vmand %vm1526_vm11, %vm1528_vm5 }
 0x6ba   : > { %v1416_v63 = vsel %vm1414_vm14, %v1384_v60, 0.0  ;;  %v2866_v1 = vadd.f32 %v1426_v59, %v1417_v62  ;;  %vm1529_vm14 = vmand %vm1525_vm2, %vm1527_vm9  ;;  %vm1639_vm9 = vcmask 982016  }
 0x6bb   : > { %v2868_v3 = vadd.f32 %v1425_v61, %v1416_v63  ;;  %v2112_v63 = vld [vmem:[%s3041_s9 + $0x8] sm:$0xff] }
 0x6bc   : > { %vm1432_vm15 = vcmp.ge.f32.partialorder %v2866_v1, 0.0  ;;  %v1434_v4 = vmul.f32 0.1, %v2866_v1 }
 0x6bd   : > { %vm1431_vm0 = vcmp.ge.f32.partialorder %v2868_v3, 0.0  ;;  %v1433_v5 = vmul.f32 0.1, %v2868_v3 }
 0x6be   : > { %v1436_v14 = vsel %vm1432_vm15, %v2866_v1, %v1434_v4 }
 0x6bf   : > { %v1435_v15 = vsel %vm1431_vm0, %v2868_v3, %v1433_v5 }
 0x6c0   : > { %v2344_v22 = vpack.i.bf16 %v1436_v14, %v1435_v15 }
 0x6c2   : > { %2345 = vrot.lane.b32.xlu2 %v2344_v22, %s2498_s20  ;;  %2340 = vrot.lane.b32.xlu1 %v2344_v22, %s2504_s15  ;;  %s2506_s15 = smov 120  }
 0x6c3   : > { %2335 = vrot.lane.b32.xlu0 %v2344_v22, %s2505_s16 }
 0x6ca   : > { %1475 = vperm.xlu1 %2227, %v2109_v23  }
 0x6cb   : > { %2350 = vrot.lane.b32.xlu0 %v2344_v22, %s2497_s25 }
 0x71c   : > { %v2346_v10 = vpop.permute.xlu2 %2345 }
 0x71d   : > { %v2348_v9 = vunpack.i.h.bf16 %v2346_v10  ;;  %v2347_v18 = vunpack.i.l.bf16 %v2346_v10 }
 0x71f   : > { %v1454_v24 = vsel %vm3051_vm6, %v2347_v18, %v2348_v9 }
 0x734   : > { %v2341_v8 = vpop.permute.xlu1 %2340 }
 0x735   : > { %v2336_v11 = vpop.permute.xlu0 %2335  ;;  %v2343_v12 = vunpack.i.h.bf16 %v2341_v8  ;;  %v2342_v13 = vunpack.i.l.bf16 %v2341_v8 }
 0x736   : > { %v2338_v16 = vunpack.i.h.bf16 %v2336_v11  ;;  %v2337_v17 = vunpack.i.l.bf16 %v2336_v11 }
 0x737   : > { %v1462_v21 = vsel %vm1461_vm7, %v2342_v13, %v2343_v12 }
 0x738   : > { %1512 = vmatpush.msrb.mxu1 %v2338_v16  ;;  %v1470_v20 = vsel %vm1469_vm1, %v2337_v17, %v2338_v16 }
 0x739   : > { %1492 = vmatpush.msrb.mxu0 %v1470_v20 }
 0x73a   : > { %1513 = vmatpush.msrb.mxu1 %v2343_v12 }
 0x73b   : > { %1493 = vmatpush.msrb.mxu0 %v1462_v21 }
 0x73c   : > { %1514 = vmatpush.msrb.mxu1 %v2348_v9  ;;  %v1476_v31 = vpop.permute.xlu1 %1475 }
 0x73d   : > { %v2351_v25 = vpop.permute.xlu0 %2350  ;;  %1494 = vmatpush.msrb.mxu0 %v1454_v24 }
 0x73e   : > { %v2353_v26 = vunpack.i.h.bf16 %v2351_v25  ;;  %v2352_v27 = vunpack.i.l.bf16 %v2351_v25  ;;  %v2117_v25 = vld [vmem:[%s3040_s8 + $0x10] sm:$0xff] }
 0x740   : > { %1515 = vmatpush.msrb.mxu1 %v2353_v26  ;;  %v1447_v28 = vsel %vm833_vm12, %v2352_v27, %v2353_v26 }
 0x741   : > { %1495 = vmatpush.msrb.mxu0 %v1447_v28 }
 0x742   : > { %1516 = vmatpush.msrb.mxu1 %v1436_v14 }
 0x743   : > { %1496 = vmatpush.msrb.mxu0 %v1435_v15  ;;  %2111 = vmatmul.msk.f32.vlgmr.msrb.gmra.mxu1 %vm1264_vm10, %v2108_v0 }
 0x744   : > { %2110 = vmatmul.msk.f32.vlgmr.msrb.gmra.mxu0 %vm1264_vm10, %v2108_v0 }
 0x7c0   : > { %v1518_v32 = vpop.f32.mrf.mxu1 }
 0x7c1   : > { %v1519_v33 = vadd.f32 %v1518_v32, %v1476_v31  ;;  %v1498_v7 = vpop.f32.mrf.mxu0 }
 0x7c2   : > { %v1499_v34 = vadd.f32 %v1498_v7, %v1476_v31 }
 0x7c3   : > { %v1532_v35 = vsel %vm1530_vm13, %v1519_v33, 0.0 }
 0x7c4   : > { %vm1534_vm15 = vcmp.ge.f32.partialorder %v1532_v35, 0.0  ;;  %v1536_v36 = vmul.f32 0.1, %v1532_v35  ;;  %v1531_v37 = vsel %vm1529_vm14, %v1499_v34, 0.0 }
 0x7c5   : > { %vm1533_vm0 = vcmp.ge.f32.partialorder %v1531_v37, 0.0  ;;  %v1535_v19 = vmul.f32 0.1, %v1531_v37 }
 0x7c6   : > { %v1538_v38 = vsel %vm1534_vm15, %v1532_v35, %v1536_v36 }
 0x7c7   : > { %v1537_v39 = vsel %vm1533_vm0, %v1531_v37, %v1535_v19  ;;  %vm1683_vm0 = vcmask 883712  }
 0x7c8   : > { %v2364_v40 = vpack.i.bf16 %v1538_v38, %v1537_v39 }
 0x7ca   : > { %2365 = vrot.lane.b32.xlu1 %v2364_v40, %s2493_s24  ;;  %2360 = vrot.lane.b32.xlu0 %v2364_v40, %s2497_s25 }
 0x7cb   : > { %2355 = vrot.lane.b32.xlu2 %v2364_v40, %s2499_s21 }
 0x7d2   : > { %1635 = vrot.lane.b32.xlu1 %v2868_v3, %s2506_s15  ;;  %1575 = vperm.xlu0 %2216, %v2113_v41  }
 0x7d3   : > { %2370 = vrot.lane.b32.xlu2 %v2364_v40, %s2492_s22 }
 0x7db   : > { %1637 = vrot.lane.b32.xlu2 %v2866_v1, %s2506_s15  ;;  %v1622_v1 = vstv %s1621_s30  ;;  %s2507_s15 = smov 113  }
 0x7dc   : > { %v1624_v3 = vadd.s32 %v1622_v1, %v2704_v51  ;;  %v1623_v4 = vadd.s32 %v1622_v1, %v2700_v48 }
 0x7de   : > { %vm1626_vm7 = vcmp.ge.s32.totalorder %v1624_v3, 0  ;;  %vm1628_vm6 = vcmp.lt.s32.totalorder %v1624_v3, 64  ;;  %vm1625_vm11 = vcmp.ge.s32.totalorder %v1623_v4, 0  ;;  %vm1627_vm5 = vcmp.lt.s32.totalorder %v1623_v4, 64 }
 0x7df   : > { %vm1630_vm2 = vmand %vm1626_vm7, %vm1628_vm6  ;;  %vm1675_vm7 = vcmask 924672   ;;  %vm3052_vm6 = vcmask 965632  }
 0x7e0   : > { %vm1629_vm13 = vmand %vm1625_vm11, %vm1627_vm5  ;;  %vm3053_vm11 = vcmask 1006592  }
 0x825   : > { %v2356_v42 = vpop.permute.xlu2 %2355 }
 0x826   : > { %v2358_v43 = vunpack.i.h.bf16 %v2356_v42  ;;  %v2357_v44 = vunpack.i.l.bf16 %v2356_v42 }
 0x828   : > { %1612 = vmatpush.msra.mxu3 %v2358_v43  ;;  %v1570_v45 = vsel %vm997_vm8, %v2357_v44, %v2358_v43 }
 0x829   : > { %1592 = vmatpush.msra.mxu2 %v1570_v45 }
 0x82d   : > { %v2371_v47 = vpop.permute.xlu2 %2370 }
 0x82e   : > { %v2373_v58 = vunpack.i.h.bf16 %v2371_v47  ;;  %v2372_v59 = vunpack.i.l.bf16 %v2371_v47 }
 0x830   : > { %v1549_v62 = vsel %vm609_vm4, %v2372_v59, %v2373_v58  ;;  %v2121_v59 = vld [vmem:[%s3042_s10 + $0x10] sm:$0xff] }
 0x835   : > { %v1638_v10 = vpop.permute.xlu2 %1637 }
 0x83c   : > { %v2366_v49 = vpop.permute.xlu1 %2365  ;;  %v2361_v50 = vpop.permute.xlu0 %2360 }
 0x83d   : > { %v2368_v52 = vunpack.i.h.bf16 %v2366_v49  ;;  %v2367_v53 = vunpack.i.l.bf16 %v2366_v49  ;;  %v2363_v55 = vunpack.i.h.bf16 %v2361_v50  ;;  %v2362_v57 = vunpack.i.l.bf16 %v2361_v50 }
 0x83f   : > { %1613 = vmatpush.msra.mxu3 %v2363_v55  ;;  %v1563_v60 = vsel %vm833_vm12, %v2362_v57, %v2363_v55  ;;  %v1556_v61 = vsel %vm618_vm3, %v2367_v53, %v2368_v52 }
 0x840   : > { %1593 = vmatpush.msra.mxu2 %v1563_v60  ;;  %v2101_v60 = vld [vmem:[%s3038_s6 + $0x10] sm:$0xff] }
 0x841   : > { %1614 = vmatpush.msra.mxu3 %v2368_v52 }
 0x842   : > { %1594 = vmatpush.msra.mxu2 %v1556_v61 }
 0x843   : > { %1615 = vmatpush.msra.mxu3 %v2373_v58 }
 0x844   : > { %1595 = vmatpush.msra.mxu2 %v1549_v62  ;;  %v1576_v5 = vpop.permute.xlu0 %1575  ;;  %v1636_v15 = vpop.permute.xlu1 %1635 }
 0x845   : > { %1616 = vmatpush.msra.mxu3 %v1538_v38  ;;  %v1640_v12 = vsel %vm1639_vm9, %v1636_v15, %v1638_v10  ;;  %v2116_v38 = vld [vmem:[%s3039_s7 + $0x10] sm:$0xff] }
 0x846   : > { %1596 = vmatpush.msra.mxu2 %v1537_v39  ;;  %2115 = vmatmul.msk.f32.vlgmr.msra.gmra.mxu3 %vm1264_vm10, %v2112_v63 }
 0x847   : > { %2114 = vmatmul.msk.f32.vlgmr.msra.gmra.mxu2 %vm1264_vm10, %v2112_v63 }
 0x8c9   : > { %v1618_v14 = vpop.f32.mrf.mxu3 }
 0x8ca   : > { %v1619_v22 = vadd.f32 %v1618_v14, %v1576_v5  ;;  %v1598_v23 = vpop.f32.mrf.mxu2 }
 0x8cb   : > { %v1599_v8 = vadd.f32 %v1598_v23, %v1576_v5 }
 0x8cc   : > { %v1632_v11 = vsel %vm1630_vm2, %v1619_v22, 0.0 }
 0x8cd   : > { %v2914_v13 = vadd.f32 %v1638_v10, %v1632_v11  ;;  %v1631_v16 = vsel %vm1629_vm13, %v1599_v8, 0.0 }
 0x8ce   : > { %v2916_v17 = vadd.f32 %v1640_v12, %v1631_v16  ;;  %v2120_v12 = vld [vmem:[%s3041_s9 + $0x10] sm:$0xff]  ;;  %v1166_v16 = vstv %s1165_s17 }
 0x8cf   : > { %vm1646_vm14 = vcmp.ge.f32.partialorder %v2914_v13, 0.0  ;;  %v1648_v9 = vmul.f32 0.1, %v2914_v13 }
 0x8d0   : > { %vm1645_vm15 = vcmp.ge.f32.partialorder %v2916_v17, 0.0  ;;  %v1647_v18 = vmul.f32 0.1, %v2916_v17 }
 0x8d1   : > { %v1650_v20 = vsel %vm1646_vm14, %v2914_v13, %v1648_v9  ;;  %v1167_v9 = vadd.s32 %v1166_v16, %v2700_v48 }
 0x8d2   : > { %v1649_v21 = vsel %vm1645_vm15, %v2916_v17, %v1647_v18 }
 0x8d3   : > { %v2384_v24 = vpack.i.bf16 %v1650_v20, %v1649_v21 }
 0x8d5   : > { %2385 = vrot.lane.b32.xlu2 %v2384_v24, %s2502_s18  ;;  %2380 = vrot.lane.b32.xlu1 %v2384_v24, %s2507_s15 }
 0x8d6   : > { %2375 = vrot.lane.b32.xlu0 %v2384_v24, %s2508_s26  ;;  %s1735_s26 = sadd.s32 4294967291, %s2697_s14 }
 0x8d7   : > { %v1736_v39 = vstv %s1735_s26 }
 0x8d8   : > { %v1738_v40 = vadd.s32 %v1736_v39, %v2704_v51  ;;  %v1737_v41 = vadd.s32 %v1736_v39, %v2700_v48 }
 0x8da   : > { %vm1740_vm5 = vcmp.ge.s32.totalorder %v1738_v40, 0  ;;  %vm1742_vm2 = vcmp.lt.s32.totalorder %v1738_v40, 64  ;;  %vm1739_vm9 = vcmp.ge.s32.totalorder %v1737_v41, 0  ;;  %vm1741_vm13 = vcmp.lt.s32.totalorder %v1737_v41, 64 }
 0x8db   : > { %vm1744_vm14 = vmand %vm1740_vm5, %vm1742_vm2 }
 0x8dc   : > { %vm1743_vm15 = vmand %vm1739_vm9, %vm1741_vm13  ;;  %vm3058_vm13 = vcmask 998400  }
 0x8dd   : > { %1689 = vperm.xlu1 %2227, %v2117_v25  }
 0x8de   : > { %2390 = vrot.lane.b32.xlu0 %v2384_v24, %s2501_s23 }
 0x92f   : > { %v2386_v27 = vpop.permute.xlu2 %2385 }
 0x930   : > { %v2388_v31 = vunpack.i.h.bf16 %v2386_v27  ;;  %v2387_v32 = vunpack.i.l.bf16 %v2386_v27 }
 0x932   : > { %v1668_v34 = vsel %vm3052_vm6, %v2387_v32, %v2388_v31  ;;  %vm1169_vm6 = vcmp.ge.s32.totalorder %v1167_v9, 0 }
 0x947   : > { %v2381_v26 = vpop.permute.xlu1 %2380 }
 0x948   : > { %v2376_v28 = vpop.permute.xlu0 %2375  ;;  %v2383_v0 = vunpack.i.h.bf16 %v2381_v26  ;;  %v2382_v2 = vunpack.i.l.bf16 %v2381_v26 }
 0x949   : > { %v2378_v29 = vunpack.i.h.bf16 %v2376_v28  ;;  %v2377_v30 = vunpack.i.l.bf16 %v2376_v28 }
 0x94a   : > { %v1676_v7 = vsel %vm1675_vm7, %v2382_v2, %v2383_v0 }
 0x94b   : > { %1726 = vmatpush.msra.mxu1 %v2378_v29  ;;  %v1684_v33 = vsel %vm1683_vm0, %v2377_v30, %v2378_v29 }
 0x94c   : > { %1706 = vmatpush.msra.mxu0 %v1684_v33 }
 0x94d   : > { %1727 = vmatpush.msra.mxu1 %v2383_v0 }
 0x94e   : > { %1707 = vmatpush.msra.mxu0 %v1676_v7 }
 0x94f   : > { %1728 = vmatpush.msra.mxu1 %v2388_v31  ;;  %v1690_v42 = vpop.permute.xlu1 %1689 }
 0x950   : > { %v2391_v35 = vpop.permute.xlu0 %2390  ;;  %1708 = vmatpush.msra.mxu0 %v1668_v34 }
 0x951   : > { %v2393_v36 = vunpack.i.h.bf16 %v2391_v35  ;;  %v2392_v37 = vunpack.i.l.bf16 %v2391_v35 }
 0x953   : > { %1729 = vmatpush.msra.mxu1 %v2393_v36  ;;  %v1661_v19 = vsel %vm3053_vm11, %v2392_v37, %v2393_v36  ;;  %vm1171_vm11 = vcmp.lt.s32.totalorder %v1167_v9, 64 }
 0x954   : > { %1709 = vmatpush.msra.mxu0 %v1661_v19  ;;  %vm2971_vm9 = vmand %vm1169_vm6, %vm1171_vm11 }
 0x955   : > { %1730 = vmatpush.msra.mxu1 %v1650_v20  ;;  %v1168_v20 = vadd.s32 %v1166_v16, %v2704_v51  ;;  %v1930_v16 = vstv %s2697_s14 }
 0x956   : > { %1710 = vmatpush.msra.mxu0 %v1649_v21  ;;  %2119 = vmatmul.msk.f32.vlgmr.msra.gmra.mxu1 %vm1264_vm10, %v2116_v38 }
 0x957   : > { %2118 = vmatmul.msk.f32.vlgmr.msra.gmra.mxu0 %vm1264_vm10, %v2116_v38  ;;  %vm1170_vm5 = vcmp.ge.s32.totalorder %v1168_v20, 0  ;;  %vm1172_vm2 = vcmp.lt.s32.totalorder %v1168_v20, 64 }
 0x9d3   : > { %v1732_v43 = vpop.f32.mrf.mxu1 }
 0x9d4   : > { %v1733_v44 = vadd.f32 %v1732_v43, %v1690_v42  ;;  %v1712_v45 = vpop.f32.mrf.mxu0 }
 0x9d5   : > { %v1713_v47 = vadd.f32 %v1712_v45, %v1690_v42 }
 0x9d6   : > { %v1746_v49 = vsel %vm1744_vm14, %v1733_v44, 0.0 }
 0x9d7   : > { %vm1748_vm0 = vcmp.ge.f32.partialorder %v1746_v49, 0.0  ;;  %v1750_v50 = vmul.f32 0.1, %v1746_v49  ;;  %v1745_v52 = vsel %vm1743_vm15, %v1713_v47, 0.0  ;;  %vm3059_vm15 = vmmov %vm3058_vm13 }
 0x9d8   : > { %vm1747_vm7 = vcmp.ge.f32.partialorder %v1745_v52, 0.0  ;;  %v1749_v53 = vmul.f32 0.1, %v1745_v52 }
 0x9d9   : > { %v1752_v55 = vsel %vm1748_vm0, %v1746_v49, %v1750_v50  ;;  %v1861_v50 = vld [vmem:[%s3044_s12] sm:$0xff]  ;;  %vm3060_vm0 = vcmask 1006592  }
 0x9da   : > { %v1751_v57 = vsel %vm1747_vm7, %v1745_v52, %v1749_v53 }
 0x9db   : > { %v2404_v58 = vpack.i.bf16 %v1752_v55, %v1751_v57 }
 0x9dd   : > { %2405 = vrot.lane.b32.xlu1 %v2404_v58, %s2493_s24  ;;  %2400 = vrot.lane.b32.xlu0 %v2404_v58, %s2497_s25 }
 0x9de   : > { %2395 = vrot.lane.b32.xlu2 %v2404_v58, %s2499_s21 }
 0x9e5   : > { %1789 = vperm.xlu1 %2227, %v2121_v59   ;;  %1119 = vperm.xlu0 %2216, %v2101_v60  }
 0x9e6   : > { %2410 = vrot.lane.b32.xlu2 %v2404_v58, %s2492_s22 }
 0x9ed   : > { %1839 = vrot.lane.b32.xlu1 %v2916_v17, %s2505_s16  ;;  %1181 = vrot.lane.b32.xlu0 %v2780_v54, %s2498_s20 }
 0x9ee   : > { %1179 = vrot.lane.b32.xlu2 %v2782_v56, %s2498_s20 }
 0x9f6   : > { %1841 = vrot.lane.b32.xlu2 %v2914_v13, %s2505_s16 }
 0xa38   : > { %v2396_v61 = vpop.permute.xlu2 %2395 }
 0xa39   : > { %v2398_v62 = vunpack.i.h.bf16 %v2396_v61  ;;  %v2397_v63 = vunpack.i.l.bf16 %v2396_v61 }
 0xa3b   : > { %1826 = vmatpush.msrb.mxu3 %v2398_v62  ;;  %v1784_v1 = vsel %vm997_vm8, %v2397_v63, %v2398_v62 }
 0xa3c   : > { %1806 = vmatpush.msrb.mxu2 %v1784_v1 }
 0xa40   : > { %v2411_v3 = vpop.permute.xlu2 %2410 }
 0xa41   : > { %v2413_v23 = vunpack.i.h.bf16 %v2411_v3  ;;  %v2412_v56 = vunpack.i.l.bf16 %v2411_v3 }
 0xa43   : > { %v1763_v11 = vsel %vm609_vm4, %v2412_v56, %v2413_v23 }
 0xa48   : > { %v1180_v18 = vpop.permute.xlu2 %1179 }
 0xa4f   : > { %v2406_v4 = vpop.permute.xlu1 %2405  ;;  %v2401_v5 = vpop.permute.xlu0 %2400 }
 0xa50   : > { %v2408_v14 = vunpack.i.h.bf16 %v2406_v4  ;;  %v2407_v15 = vunpack.i.l.bf16 %v2406_v4  ;;  %v2403_v22 = vunpack.i.h.bf16 %v2401_v5  ;;  %v2402_v54 = vunpack.i.l.bf16 %v2401_v5  ;;  %v1842_v31 = vpop.permute.xlu2 %1841 }
 0xa52   : > { %1827 = vmatpush.msrb.mxu3 %v2403_v22  ;;  %v1777_v8 = vsel %vm833_vm12, %v2402_v54, %v2403_v22  ;;  %v1770_v10 = vsel %vm618_vm3, %v2407_v15, %v2408_v14 }
 0xa53   : > { %1807 = vmatpush.msrb.mxu2 %v1777_v8 }
 0xa54   : > { %1828 = vmatpush.msrb.mxu3 %v2408_v14 }
 0xa55   : > { %1808 = vmatpush.msrb.mxu2 %v1770_v10 }
 0xa56   : > { %1829 = vmatpush.msrb.mxu3 %v2413_v23 }
 0xa57   : > { %1809 = vmatpush.msrb.mxu2 %v1763_v11  ;;  %v1120_v13 = vpop.permute.xlu0 %1119  ;;  %v1790_v17 = vpop.permute.xlu1 %1789 }
 0xa58   : > { %1830 = vmatpush.msrb.mxu3 %v1752_v55  ;;  %v1143_v21 = vadd.f32 %v2862_v46, %v1120_v13  ;;  %v1163_v24 = vadd.f32 %v2860_v6, %v1120_v13  ;;  %v1860_v13 = vld [vmem:[%s3043_s11] sm:$0xff] }
 0xa59   : > { %1810 = vmatpush.msrb.mxu2 %v1751_v57  ;;  %2123 = vmatmul.msk.f32.vlgmr.msrb.gmra.mxu3 %vm1264_vm10, %v2120_v12 }
 0xa5a   : > { %2122 = vmatmul.msk.f32.vlgmr.msrb.gmra.mxu2 %vm1264_vm10, %v2120_v12  ;;  %vm2975_vm10 = vmand %vm1170_vm5, %vm1172_vm2  ;;  %v1175_v6 = vsel %vm2971_vm9, %v1143_v21, 0.0 }
 0xa5b   : > { %v1176_v46 = vsel %vm2975_vm10, %v1163_v24, 0.0 }
 0xa5f   : > { %v1182_v26 = vpop.permute.xlu0 %1181  ;;  %v1840_v0 = vpop.permute.xlu1 %1839 }
 0xa60   : > { %v1183_v29 = vsel %vm3058_vm13, %v1180_v18, %v1182_v26  ;;  %v1843_v33 = vsel %vm1469_vm1, %v1840_v0, %v1842_v31  ;;  %v1187_v7 = vadd.f32 %v1182_v26, %v1176_v46  ;;  %v1931_v18 = vadd.s32 %v1930_v16, %v2700_v48 }
 0xa61   : > { %v1186_v36 = vadd.f32 %v1183_v29, %v1175_v6 }
 0xadc   : > { %v1832_v28 = vpop.f32.mrf.mxu3 }
 0xadd   : > { %v1833_v51 = vadd.f32 %v1832_v28, %v1790_v17  ;;  %v1812_v2 = vpop.f32.mrf.mxu2 }
 0xade   : > { %v1813_v30 = vadd.f32 %v1812_v2, %v1790_v17 }
 0xadf   : > { %v1836_v32 = vsel %vm2975_vm10, %v1833_v51, 0.0 }
 0xae0   : > { %v1847_v34 = vadd.f32 %v1842_v31, %v1836_v32  ;;  %v1835_v35 = vsel %vm2971_vm9, %v1813_v30, 0.0 }
 0xae1   : > { %v1846_v37 = vadd.f32 %v1843_v33, %v1835_v35 }
 0xae2   : > { %v1849_v19 = vadd.f32 %v1847_v34, %v1187_v7 }
 0xae3   : > { %v1848_v38 = vadd.f32 %v1846_v37, %v1186_v36 }
 0xae4   : > { %v1851_v39 = vmul.f32 0.5, %v1849_v19 }
 0xae5   : > { %v1850_v40 = vmul.f32 0.5, %v1848_v38 }
 0xae6   : > { %v1853_v41 = vsel %vm2975_vm10, %v1851_v39, 0.0 }
 0xae7   : > { %vm1855_vm14 = vcmp.ge.f32.partialorder %v1853_v41, 0.0  ;;  %v1857_v42 = vmul.f32 0.01, %v1853_v41  ;;  %v1852_v43 = vsel %vm2971_vm9, %v1850_v40, 0.0 }
 0xae8   : > { %vm1854_vm1 = vcmp.ge.f32.partialorder %v1852_v43, 0.0  ;;  %v1856_v44 = vmul.f32 0.01, %v1852_v43 }
 0xae9   : > { %v1859_v45 = vsel %vm1855_vm14, %v1853_v41, %v1857_v42 }
 0xaea   : > { %v1858_v47 = vsel %vm1854_vm1, %v1852_v43, %v1856_v44 }
 0xaeb   : > { %v2424_v49 = vpack.i.bf16 %v1859_v45, %v1858_v47 }
 0xaed   : > { %2425 = vrot.lane.b32.xlu2 %v2424_v49, %s2499_s21  ;;  %2420 = vrot.lane.b32.xlu1 %v2424_v49, %s2501_s23  ;;  %s575_s21 = scalar_lea.vmem %s3045_s13, %s2617_s19 }
 0xaee   : > { %2415 = vrot.lane.b32.xlu0 %v2424_v49, %s2498_s20 }
 0xaf5   : > { %2440 = vrot.lane.b32.xlu2 %v2424_v49, %s2492_s22  ;;  %2435 = vrot.lane.b32.xlu1 %v2424_v49, %s2493_s24 }
 0xaf6   : > { %2430 = vrot.lane.b32.xlu0 %v2424_v49, %s2497_s25 }
 0xafe   : > { %1902 = vperm.xlu0 %2216, %v1861_v50  }
 0xb47   : > { %v2426_v52 = vpop.permute.xlu2 %2425 }
 0xb48   : > { %v2428_v61 = vunpack.i.h.bf16 %v2426_v52  ;;  %v2427_v62 = vunpack.i.l.bf16 %v2426_v52 }
 0xb4a   : > { %v1886_v4 = vsel %vm997_vm8, %v2427_v62, %v2428_v61  ;;  %vm1905_vm8 = vcmask 457728  }
 0xb4f   : > { %v2441_v5 = vpop.permute.xlu2 %2440 }
 0xb50   : > { %v2443_v56 = vunpack.i.h.bf16 %v2441_v5  ;;  %v2442_v8 = vunpack.i.l.bf16 %v2441_v5 }
 0xb52   : > { %v1868_v12 = vsel %vm609_vm4, %v2442_v8, %v2443_v56 }
 0xb5f   : > { %v2421_v53 = vpop.permute.xlu1 %2420 }
 0xb60   : > { %v2416_v55 = vpop.permute.xlu0 %2415  ;;  %v2423_v57 = vunpack.i.h.bf16 %v2421_v53  ;;  %v2422_v58 = vunpack.i.l.bf16 %v2421_v53 }
 0xb61   : > { %v2418_v59 = vunpack.i.h.bf16 %v2416_v55  ;;  %v2417_v60 = vunpack.i.l.bf16 %v2416_v55 }
 0xb62   : > { %v1892_v1 = vsel %vm3060_vm0, %v2422_v58, %v2423_v57 }
 0xb63   : > { %v1898_v63 = vsel %vm3059_vm15, %v2417_v60, %v2418_v59 }
 0xb64   : > { %1918 = vmatpush.msrb.mxu0 %v1898_v63 }
 0xb66   : > { %1919 = vmatpush.msrb.mxu0 %v1892_v1 }
 0xb67   : > { %v2436_v3 = vpop.permute.xlu1 %2435 }
 0xb68   : > { %v2431_v14 = vpop.permute.xlu0 %2430  ;;  %1920 = vmatpush.msrb.mxu0 %v1886_v4  ;;  %v2438_v15 = vunpack.i.h.bf16 %v2436_v3  ;;  %v2437_v22 = vunpack.i.l.bf16 %v2436_v3 }
 0xb69   : > { %v2433_v54 = vunpack.i.h.bf16 %v2431_v14  ;;  %v2432_v23 = vunpack.i.l.bf16 %v2431_v14 }
 0xb6a   : > { %v1874_v11 = vsel %vm618_vm3, %v2437_v22, %v2438_v15  ;;  %vm1932_vm3 = vcmp.ge.s32.totalorder %v1931_v18, 0 }
 0xb6b   : > { %v1880_v10 = vsel %vm833_vm12, %v2432_v23, %v2433_v54  ;;  %vm1933_vm12 = vcmp.lt.s32.totalorder %v1931_v18, 64 }
 0xb6c   : > { %1921 = vmatpush.msrb.mxu0 %v1880_v10  ;;  %vm1934_vm7 = vmand %vm1932_vm3, %vm1933_vm12 }
 0xb6e   : > { %1922 = vmatpush.msrb.mxu0 %v1874_v11 }
 0xb70   : > { %1923 = vmatpush.msrb.mxu0 %v1868_v12  ;;  %v1903_v17 = vpop.permute.xlu0 %1902 }
 0xb72   : > { %1924 = vmatpush.msrb.mxu0 %v1858_v47 }
 0xb73   : > { %2124 = vmatmul.msk.f32.vlgmr.msrb.gmra.mxu0 %vm1905_vm8, %v1860_v13 }
 0xbf0   : > { %v1926_v9 = vpop.f32.mrf.mxu0 }
 0xbf1   : > { %v1927_v20 = vadd.f32 %v1926_v9, %v1903_v17 }
 0xbf3   : > { %2450 = vtanh.f32 %v1927_v20 }
 0xbf9   : > { %v2451_v21 = vpop.eup %2450 }
 0xbfa   : > { %v1935_v24 = vsel %vm1934_vm7, %v2451_v21, 0.0 }
 0xbfb   : > { %1936 = vst [vmem:[%s575_s21] sm:$0xff] %v1935_v24 }
 0xbfc PF: > { %s23_s29 = sadd.s32 1, %s2490_s29   ;;  %s3061_s14 = sld [smem:[#allocation2_spill]] }
 0xbfd   : > { %p20_p11 = scmp.ge.s32.totalorder %s23_s29, 10   ;;  %s3062_s23 = sld [smem:[#allocation3_spill]] }
 0xbfe   : > { %s3063_s25 = smov %s2482_s27  ;;  %s3064_s26 = smov %s2486_s28 }
 0xbff   :  { %22 = sbr.rel (!%p20_p11) target bundleno = 3 (0x3), region = 124 }
 0xc02   : > { %s3065_s27 = smov %s3061_s14 }
 0xc03   : > { %s3066_s28 = smov %s3062_s23 }

</bundles_post_ra>
